<compile_context>
chip_gen: v7x
topology: tpu7x:2x2x1
jax: 0.10.0
libtpu: 0.0.40
codegen_flags: <defaults>
</compile_context>

<pallas_src>
import numpy as np
import jax
import jax.numpy as jnp
from jax import lax
from jax.experimental import pallas as pl
from jax.experimental.pallas import tpu as pltpu


# -----------------------------------------------------------------------------
# in-kernel math helpers
# -----------------------------------------------------------------------------
_SQRT_2_OVER_PI = 0.7978845608028654


def _gelu(x):
    # tanh-approx GELU: a handful of VALU ops plus one EUP tanh (its own VLIW
    # slot), instead of the previous ~30-op erf polynomial per application.
    return 0.5 * x * (1.0 + jnp.tanh(_SQRT_2_OVER_PI * (x + 0.044715 * x * x * x)))


def _gelu2(x):
    # TODO(synk): the PyTorch forward calls `self.GELU()` (an undefined attribute)
    # followed by `self.gate1/2` (nn.GELU()); interpreted literally as two GELUs.
    return _gelu(_gelu(x))


# -----------------------------------------------------------------------------
# Pallas kernels (all operate on channels-first (C, thw) tiles)
# -----------------------------------------------------------------------------
def _branch1_kernel(x_ref, halo_ref, a1_ref, c1_ref, w1_ref, b1_ref,
                    kdw_ref, bdw_ref, u_ref, pool_ref, he_ref):
    """LN1-apply -> conv1(1x1) -> depthwise 3x3 -> GELU(GELU(.)) + SCA pooled sums."""
    j = pl.program_id(1)
    nt = pl.num_programs(1)
    ch = x_ref.shape[1]
    thw = x_ref.shape[2]
    wim = halo_ref.shape[3] // 2          # image width W

    a1 = a1_ref[0]                        # (C, 1) fused LN1 scale  (= rstd * gn_weight)
    c1 = c1_ref[0]                        # (C, 1) fused LN1 shift
    w1 = w1_ref[...]                      # (C, C) bf16
    b1 = b1_ref[...]                      # (C, 1) f32

    def ln_conv1(v):                      # v: (C, m) f32 -> (C, m) f32
        vn = (v * a1 + c1).astype(jnp.bfloat16)
        return jnp.dot(w1, vn, preferred_element_type=jnp.float32) + b1

    y = ln_conv1(x_ref[0])                # main tile after conv1, (C, thw) f32

    # halo-extended slab [top row | main | bottom row] of the post-conv1 map;
    # rows outside the image are zeros (the depthwise conv's padding).
    he_ref[:, wim:wim + thw] = y

    @pl.when(j > 0)
    def _():
        he_ref[:, 0:wim] = ln_conv1(halo_ref[0, 0, :, 0:wim])

    @pl.when(j == 0)
    def _():
        he_ref[:, 0:wim] = jnp.zeros((ch, wim), jnp.float32)

    @pl.when(j < nt - 1)
    def _():
        he_ref[:, wim + thw:2 * wim + thw] = ln_conv1(halo_ref[0, 0, :, wim:2 * wim])

    @pl.when(j == nt - 1)
    def _():
        he_ref[:, wim + thw:2 * wim + thw] = jnp.zeros((ch, wim), jnp.float32)

    slab_up = he_ref[:, 0:thw]                      # rows shifted by -1 (aligned when W%128==0)
    slab_dn = he_ref[:, 2 * wim:2 * wim + thw]      # rows shifted by +1
    k = kdw_ref[...]                                # (C, 9) depthwise taps [3*a + b]

    def tap(idx):
        return k[:, idx:idx + 1]                    # (C, 1)

    # sum over the row offset first; shift/mask the column offset once per side
    center = tap(1) * slab_up + tap(4) * y + tap(7) * slab_dn
    left_n = tap(0) * slab_up + tap(3) * y + tap(6) * slab_dn
    right_n = tap(2) * slab_up + tap(5) * y + tap(8) * slab_dn

    col = lax.broadcasted_iota(jnp.int32, (1, thw), 1) % wim
    lmask = (col != 0).astype(jnp.float32)          # column 0 has no left neighbour
    rmask = (col != wim - 1).astype(jnp.float32)    # column W-1 has no right neighbour

    acc = (center
           + lmask * pltpu.roll(left_n, 1, axis=1)          # XLU lane rotate
           + rmask * pltpu.roll(right_n, thw - 1, axis=1))  # == roll by -1

    u = _gelu2(acc + bdw_ref[...])                  # f32
    u_ref[0] = u.astype(u_ref.dtype)                # bf16, lane-dense store

    @pl.when(j == 0)
    def _():
        pool_ref[...] = jnp.zeros_like(pool_ref)

    pool_ref[...] += jnp.sum(u, axis=1, keepdims=True)[None]   # f32 SCA partial sums


def _merge1_kernel(u_ref, x_ref, m3_ref, b3_ref, beta_ref, x1_ref, s_ref, q_ref):
    """x1 = (M3 @ u + b3eff) * beta + x ; accumulate GroupNorm-2 statistics."""
    j = pl.program_id(1)
    u = u_ref[0]                                    # (C, thw) bf16
    x = x_ref[0]                                    # (C, thw) f32
    z = jnp.dot(m3_ref[0], u, preferred_element_type=jnp.float32) + b3_ref[0]
    x1 = z * beta_ref[...] + x                      # f32 residual add
    x1_ref[0] = x1.astype(x1_ref.dtype)             # bf16 store

    @pl.when(j == 0)
    def _():
        s_ref[...] = jnp.zeros_like(s_ref)
        q_ref[...] = jnp.zeros_like(q_ref)

    # TODO(synk): single-pass E[x^2]-E[x]^2 in f32; switch to Welford/two-pass for
    # very large images where the cancellation becomes significant.
    s_ref[...] += jnp.sum(x1)
    q_ref[...] += jnp.sum(x1 * x1)


def _branch2_kernel(x1_ref, a2_ref, c2_ref, w4_ref, b4_ref, w45_ref, b45_ref,
                    gamma_ref, o_ref):
    """out = (W45 @ GELU(GELU(W4 @ LN2(x1) + b4)) + b45) * gamma + x1."""
    x1 = x1_ref[0].astype(jnp.float32)              # (C, thw)
    xn = (x1 * a2_ref[0] + c2_ref[0]).astype(jnp.bfloat16)
    h = jnp.dot(w4_ref[...], xn, preferred_element_type=jnp.float32) + b4_ref[...]
    u2 = _gelu2(h).astype(jnp.bfloat16)
    z2 = jnp.dot(w45_ref[...], u2, preferred_element_type=jnp.float32) + b45_ref[...]
    o_ref[0] = (z2 * gamma_ref[...] + x1).astype(o_ref.dtype)


# -----------------------------------------------------------------------------
# per-generation sizing + tiling helpers
# -----------------------------------------------------------------------------
def _vmem_plan():
    """(vmem_limit_bytes, target activation-tile bytes) sized per TPU generation."""
    try:
        cap = pltpu.get_tpu_info().vmem_capacity_bytes
    except Exception:
        cap = 64 << 20                      # unknown -> assume v7x-sized VMEM
    if cap >= (100 << 20):                  # v5e / v6e: 128 MiB physical VMEM
        return 96 << 20, 4 << 20
    return 44 << 20, 2 << 20                # v7x-class: 64 MiB per TensorCore


def _pick_tile_h(h, w, c, target_tile_bytes):
    """Largest divisor of H whose (tile_h*W) is lane-legal and near the byte target."""
    target_rows = max(1, target_tile_bytes // (w * c * 4))
    best = None
    for cand in range(1, h + 1):
        if h % cand:
            continue
        if (cand * w) % 128 != 0 and cand != h:
            continue                         # keep x / u / x1 blocks lane-legal
        if cand <= target_rows:
            best = cand
    if best is not None and best * w * c * 4 >= target_tile_bytes // 8:
        return best
    # degenerate divisors (e.g. prime H): one whole-image tile beats many tiny steps.
    # TODO(synk): ragged last tile (pl.cdiv grid + in-kernel masking) instead.
    if best is None or h * w * c * 4 <= 2 * target_tile_bytes:
        return h
    return best


# -----------------------------------------------------------------------------
# forward (pallas_call plumbing + tiny per-sample glue)
# -----------------------------------------------------------------------------
def nafblock_gelu_forward(x_nchw, p, tile_h=None):
    n, c, h, w = x_nchw.shape
    assert c % 4 == 0, "gate_conv groups = c // 4 requires c % 4 == 0"
    hw = h * w

    vmem_limit, tile_target = _vmem_plan()
    if tile_h is None:
        tile_h = _pick_tile_h(h, w, c, tile_target)
    assert h % tile_h == 0, "tile_h must divide H"
    assert (tile_h * w) % 128 == 0 or tile_h == h, \
        "row tile must be lane-dense (tile_h*W % 128 == 0) or cover the whole image"
    nt = h // tile_h
    thw = tile_h * w
    cnt = float(c * hw)
    f32, bf16 = jnp.float32, jnp.bfloat16

    x4 = x_nchw.astype(f32)                          # (N, C, H, W)
    x = x4.reshape(n, c, hw)                         # channels-first: NO transpose

    # ---- GroupNorm-1 statistics: plain XLA two-pass reduction on x -------------
    mean1 = jnp.mean(x, axis=(1, 2))
    var1 = jnp.mean(jnp.square(x - mean1[:, None, None]), axis=(1, 2))
    rstd1 = lax.rsqrt(var1 + 1e-5)
    a1 = (rstd1[:, None] * p['n1_w'][None, :]).reshape(n, c, 1)
    c1v = (p['n1_b'][None, :]
           - mean1[:, None] * rstd1[:, None] * p['n1_w'][None, :]).reshape(n, c, 1)

    # ---- halo rows for the depthwise 3x3: one thin (N, nt, C, 2W) side input ----
    rows = np.arange(nt)
    top_rows = np.clip(rows * tile_h - 1, 0, h - 1)
    bot_rows = np.clip(rows * tile_h + tile_h, 0, h - 1)
    halos = jnp.concatenate([x4[:, :, top_rows, :], x4[:, :, bot_rows, :]], axis=-1)
    halos = jnp.transpose(halos, (0, 2, 1, 3))       # (N, nt, C, 2W), ~2/tile_h of |x|

    cp_acc = pltpu.CompilerParams(dimension_semantics=("parallel", "arbitrary"),
                                  vmem_limit_bytes=vmem_limit)
    cp_par = pltpu.CompilerParams(dimension_semantics=("parallel", "parallel"),
                                  vmem_limit_bytes=vmem_limit)

    row_spec = pl.BlockSpec((1, c, thw), lambda i, j: (i, 0, j))      # activation tiles
    vec_ns = pl.BlockSpec((1, c, 1), lambda i, j: (i, 0, 0))          # per-sample (C,1)
    vec_sh = pl.BlockSpec((c, 1), lambda i, j: (0, 0))                # shared (C,1)
    mat_sh = pl.BlockSpec((c, c), lambda i, j: (0, 0))                # shared (C,C)
    acc_sc = pl.BlockSpec((1, 1, 128), lambda i, j: (i, 0, 0))        # scalar accumulators

    # ---- pass 1: LN1 + conv1 + depthwise 3x3 + GELU.GELU, + SCA pooled sums -----
    u, pool = pl.pallas_call(
        _branch1_kernel,
        grid=(n, nt),
        in_specs=[row_spec,
                  pl.BlockSpec((1, 1, c, 2 * w), lambda i, j: (i, j, 0, 0)),  # halos
                  vec_ns, vec_ns,                                  # LN1 scale / shift
                  mat_sh, vec_sh,                                  # conv1 w (bf16) / b
                  pl.BlockSpec((c, 9), lambda i, j: (0, 0)),       # depthwise taps
                  vec_sh],                                         # depthwise bias
        out_specs=[row_spec, vec_ns],
        out_shape=(jax.ShapeDtypeStruct((n, c, hw), bf16),
                   jax.ShapeDtypeStruct((n, c, 1), f32)),
        scratch_shapes=[pltpu.VMEM((c, (tile_h + 2) * w), f32)],
        compiler_params=cp_acc,
    )(x, halos, a1, c1v,
      p['c1_w'].astype(bf16), p['c1_b'].reshape(c, 1),
      p['c2_k'], p['c2_b'].reshape(c, 1))

    # ---- fold gate_conv1 + SCA scale + conv3 into ONE per-sample (C,C) matmul ---
    pooled_u = pool[:, :, 0] / float(hw)                       # (N, C) mean of u
    pooled_g = pooled_u @ p['g1_w'].T + p['g1_b'][None, :]     # mean of gate_conv1(u)
    s = pooled_g @ p['sca_w'].T + p['sca_b'][None, :]          # (N, C) channel scale
    m3 = jnp.einsum('pc,nc,ci->npi', p['c3_w'], s, p['g1_w']).astype(bf16)
    b3e = ((s * p['g1_b'][None, :]) @ p['c3_w'].T
           + p['c3_b'][None, :]).reshape(n, c, 1)

    # ---- pass 2: x1 = (M3 @ u + b3e) * beta + x ; GroupNorm-2 statistics --------
    x1, s2, q2 = pl.pallas_call(
        _merge1_kernel,
        grid=(n, nt),
        in_specs=[row_spec, row_spec,
                  pl.BlockSpec((1, c, c), lambda i, j: (i, 0, 0)),
                  vec_ns, vec_sh],
        out_specs=[row_spec, acc_sc, acc_sc],
        out_shape=(jax.ShapeDtypeStruct((n, c, hw), bf16),
                   jax.ShapeDtypeStruct((n, 1, 128), f32),
                   jax.ShapeDtypeStruct((n, 1, 128), f32)),
        compiler_params=cp_acc,
    )(u, x, m3, b3e, p['beta'].reshape(c, 1))

    mean2 = s2[:, 0, 0] / cnt
    var2 = jnp.maximum(q2[:, 0, 0] / cnt - mean2 * mean2, 0.0)
    rstd2 = lax.rsqrt(var2 + 1e-5)
    a2 = (rstd2[:, None] * p['n2_w'][None, :]).reshape(n, c, 1)
    c2v = (p['n2_b'][None, :]
           - mean2[:, None] * rstd2[:, None] * p['n2_w'][None, :]).reshape(n, c, 1)

    # ---- fold gate_conv2 + conv5 (both linear, nothing in between) --------------
    w45 = (p['c5_w'] @ p['g2_w']).astype(bf16)
    b45 = (p['c5_w'] @ p['g2_b'] + p['c5_b']).reshape(c, 1)

    # ---- pass 3: LN2 + conv4 + GELU.GELU + folded (gate_conv2 . conv5) + gamma --
    out = pl.pallas_call(
        _branch2_kernel,
        grid=(n, nt),
        in_specs=[row_spec, vec_ns, vec_ns, mat_sh, vec_sh, mat_sh, vec_sh, vec_sh],
        out_specs=row_spec,
        out_shape=jax.ShapeDtypeStruct((n, c, hw), x_nchw.dtype),
        compiler_params=cp_par,
    )(x1, a2, c2v, p['c4_w'].astype(bf16), p['c4_b'].reshape(c, 1),
      w45, b45, p['gamma'].reshape(c, 1))

    return out.reshape(n, c, h, w)                   # channels-first: NO transpose


# -----------------------------------------------------------------------------
# deterministic parameter init (shapes follow the PyTorch __init__; weights are
# stored (out, in) so that per-pixel y = W @ x matches nn.Conv2d 1x1 semantics)
# -----------------------------------------------------------------------------
class _KeyGen:
    def __init__(self, key):
        self._key = key

    def __call__(self):
        self._key, k = jax.random.split(self._key)
        return k


def init_params(key, c):
    kg = _KeyGen(key)

    def nrm(shape, scale=0.1):
        return jax.random.normal(kg(), shape, dtype=jnp.float32) * scale

    def grouped_1x1(c_):
        # Conv2d(c, c, 1, groups=c//4) as a block-diagonal (out, in) matrix.
        g = c_ // 4
        wsmall = np.asarray(nrm((g, 4, 4)))
        wbd = np.zeros((c_, c_), np.float32)
        for gi in range(g):
            wbd[gi * 4:(gi + 1) * 4, gi * 4:(gi + 1) * 4] = wsmall[gi]
        return jnp.asarray(wbd)

    return dict(
        n1_w=1.0 + nrm((c,)), n1_b=nrm((c,)),
        c1_w=nrm((c, c)), c1_b=nrm((c,)),
        c2_k=nrm((c, 9)), c2_b=nrm((c,)),          # depthwise taps [ch, 3*a + b]
        g1_w=grouped_1x1(c), g1_b=nrm((c,)),
        sca_w=nrm((c, c)), sca_b=nrm((c,)),
        c3_w=nrm((c, c)), c3_b=nrm((c,)),
        beta=nrm((c,)),        # PyTorch inits beta/gamma to zero; nonzero to exercise path
        n2_w=1.0 + nrm((c,)), n2_b=nrm((c,)),
        c4_w=nrm((c, c)), c4_b=nrm((c,)),
        g2_w=grouped_1x1(c), g2_b=nrm((c,)),
        c5_w=nrm((c, c)), c5_b=nrm((c,)),
        gamma=nrm((c,)),
    )


# -----------------------------------------------------------------------------
# pure-JAX reference (exact-erf GELU, f32) for the self-check
# -----------------------------------------------------------------------------
def _reference_forward(x, p):
    n, c, h, w = x.shape
    eps = 1e-5

    def gn(v, wt, bs):
        mu = jnp.mean(v, axis=(1, 2, 3), keepdims=True)
        var = jnp.mean((v - mu) ** 2, axis=(1, 2, 3), keepdims=True)
        return ((v - mu) / jnp.sqrt(var + eps)
                * wt[None, :, None, None] + bs[None, :, None, None])

    def conv1x1(v, wmat, bias):          # wmat: (out, in)
        return jnp.einsum('nchw,oc->nohw', v, wmat) + bias[None, :, None, None]

    def dwconv(v, k9, bias):             # k9: (C, 9) taps [3*a + b]
        vp = jnp.pad(v, ((0, 0), (0, 0), (1, 1), (1, 1)))
        out = jnp.zeros_like(v)
        for a in range(3):
            for b in range(3):
                out = out + vp[:, :, a:a + h, b:b + w] * k9[:, 3 * a + b][None, :, None, None]
        return out + bias[None, :, None, None]

    def gelu(v):
        return 0.5 * v * (1.0 + lax.erf(v * 0.7071067811865476))

    x1 = gn(x, p['n1_w'], p['n1_b'])
    x1 = conv1x1(x1, p['c1_w'], p['c1_b'])
    x1 = dwconv(x1, p['c2_k'], p['c2_b'])
    x1 = gelu(gelu(x1))
    x1 = conv1x1(x1, p['g1_w'], p['g1_b'])
    s = jnp.mean(x1, axis=(2, 3)) @ p['sca_w'].T + p['sca_b'][None, :]
    x1 = x1 * s[:, :, None, None]
    x1 = conv1x1(x1, p['c3_w'], p['c3_b'])
    x1 = x1 * p['beta'][None, :, None, None] + x
    x2 = gn(x1, p['n2_w'], p['n2_b'])
    x2 = conv1x1(x2, p['c4_w'], p['c4_b'])
    x2 = gelu(gelu(x2))
    x2 = conv1x1(x2, p['g2_w'], p['g2_b'])
    x2 = conv1x1(x2, p['c5_w'], p['c5_b'])
    return x2 * p['gamma'][None, :, None, None] + x1


# -----------------------------------------------------------------------------
# demo
# -----------------------------------------------------------------------------
if __name__ == "__main__":
    root = jax.random.PRNGKey(0)
    k_inp, k_par = jax.random.split(root)

    # W = 128 keeps every lane slice aligned; tile_h = 8 -> two row tiles per
    # sample, exercising the halo, roll-mask and accumulator paths.
    N, C, H, W = 2, 16, 16, 128
    params = init_params(k_par, C)
    x = jax.random.normal(k_inp, (N, C, H, W), dtype=jnp.float32)   # NCHW like PyTorch

    fwd = jax.jit(lambda inp: nafblock_gelu_forward(inp, params, tile_h=8))
    out = jax.block_until_ready(fwd(x))

    assert out.shape == (N, C, H, W), out.shape
    assert bool(jnp.all(jnp.isfinite(out)))

    ref = _reference_forward(x, params)
    # bf16 storage of u / x1 bounds the deviation at ~4e-3 relative; GN stats,
    # pooled sums, residual adds and matmul accumulation are all f32.
    assert bool(jnp.allclose(out, ref, atol=1e-3, rtol=1e-2)), \
        float(jnp.max(jnp.abs(out - ref)))

    print("KERNEL_OK")
</pallas_src>

<mosaic_0001>
module attributes {stable_mosaic.version = 11 : i64} {
  func.func @_branch1_kernel(%arg0: i32, %arg1: i32, %arg2: memref<1x16x1024xf32, #tpu.memory_space<vmem>>, %arg3: memref<1x1x16x256xf32, #tpu.memory_space<vmem>>, %arg4: memref<1x16x1xf32, #tpu.memory_space<vmem>>, %arg5: memref<1x16x1xf32, #tpu.memory_space<vmem>>, %arg6: memref<16x16xbf16, #tpu.memory_space<vmem>>, %arg7: memref<16x1xf32, #tpu.memory_space<vmem>>, %arg8: memref<16x9xf32, #tpu.memory_space<vmem>>, %arg9: memref<16x1xf32, #tpu.memory_space<vmem>>, %arg10: memref<1x16x1024xbf16, #tpu.memory_space<vmem>>, %arg11: memref<1x16x1xf32, #tpu.memory_space<vmem>>, %arg12: memref<16x1280xf32, #tpu.memory_space<vmem>>) attributes {dimension_semantics = [#tpu.dimension_semantics<parallel>, #tpu.dimension_semantics<arbitrary>], iteration_bounds = array<i64: 2, 2>, scalar_prefetch = 0 : i64, scratch_operands = 1 : i64, tpu.core_type = #tpu.core_type<tc>, window_params = [{transform_indices = @transform_0, window_bounds = array<i64: 1, 16, 1024>}, {transform_indices = @transform_1, window_bounds = array<i64: 1, 1, 16, 256>}, {transform_indices = @transform_2, window_bounds = array<i64: 1, 16, 1>}, {transform_indices = @transform_3, window_bounds = array<i64: 1, 16, 1>}, {pipeline_mode = #tpu.pipeline_mode<synchronous>, transform_indices = @transform_4, window_bounds = array<i64: 16, 16>}, {pipeline_mode = #tpu.pipeline_mode<synchronous>, transform_indices = @transform_5, window_bounds = array<i64: 16, 1>}, {pipeline_mode = #tpu.pipeline_mode<synchronous>, transform_indices = @transform_6, window_bounds = array<i64: 16, 9>}, {pipeline_mode = #tpu.pipeline_mode<synchronous>, transform_indices = @transform_7, window_bounds = array<i64: 16, 1>}, {transform_indices = @transform_8, window_bounds = array<i64: 1, 16, 1024>}, {transform_indices = @transform_9, window_bounds = array<i64: 1, 16, 1>}]} {
    %c0 = arith.constant 0 : index
    %c0_0 = arith.constant 0 : index
    %c0_1 = arith.constant 0 : index
    %0 = vector.load %arg4[%c0, %c0_0, %c0_1] : memref<1x16x1xf32, #tpu.memory_space<vmem>>, vector<1x16x1xf32>
    %1 = vector.shape_cast %0 : vector<1x16x1xf32> to vector<16x1xf32>
    %c0_2 = arith.constant 0 : index
    %c0_3 = arith.constant 0 : index
    %c0_4 = arith.constant 0 : index
    %2 = vector.load %arg5[%c0_2, %c0_3, %c0_4] : memref<1x16x1xf32, #tpu.memory_space<vmem>>, vector<1x16x1xf32>
    %3 = vector.shape_cast %2 : vector<1x16x1xf32> to vector<16x1xf32>
    %c0_5 = arith.constant 0 : index
    %c0_6 = arith.constant 0 : index
    %4 = vector.load %arg6[%c0_5, %c0_6] : memref<16x16xbf16, #tpu.memory_space<vmem>>, vector<16x16xbf16>
    %c0_7 = arith.constant 0 : index
    %c0_8 = arith.constant 0 : index
    %5 = vector.load %arg7[%c0_7, %c0_8] : memref<16x1xf32, #tpu.memory_space<vmem>>, vector<16x1xf32>
    %c0_9 = arith.constant 0 : index
    %c0_10 = arith.constant 0 : index
    %c0_11 = arith.constant 0 : index
    %6 = vector.load %arg2[%c0_9, %c0_10, %c0_11] : memref<1x16x1024xf32, #tpu.memory_space<vmem>>, vector<1x16x1024xf32>
    %7 = vector.shape_cast %6 : vector<1x16x1024xf32> to vector<16x1024xf32>
    %8 = vector.broadcast %1 : vector<16x1xf32> to vector<16x1024xf32>
    %9 = arith.mulf %7, %8 : vector<16x1024xf32>
    %10 = vector.broadcast %3 : vector<16x1xf32> to vector<16x1024xf32>
    %11 = arith.addf %9, %10 : vector<16x1024xf32>
    %12 = arith.truncf %11 : vector<16x1024xf32> to vector<16x1024xbf16>
    %cst = arith.constant dense<0.000000e+00> : vector<16x1024xf32>
    %13 = tpu.matmul %4, %12, %cst {dimension_numbers = #tpu.dot_dimension_numbers<[1], [0], [0], [1], [0, 0, 1, 1], [], []>} : vector<16x16xbf16>, vector<16x1024xbf16>, vector<16x1024xf32> -> vector<16x1024xf32>
    %14 = vector.broadcast %5 : vector<16x1xf32> to vector<16x1024xf32>
    %15 = arith.addf %13, %14 : vector<16x1024xf32>
    %c0_12 = arith.constant 0 : index
    %c128 = arith.constant 128 : index
    %16 = vector.load %arg12[%c0_12, %c128] : memref<16x1280xf32, #tpu.memory_space<vmem>>, vector<16x1024xf32>
    tpu.vector_store %arg12[%c0_12, %c128], %15 {strides = array<i32>} : memref<16x1280xf32, #tpu.memory_space<vmem>>, vector<16x1024xf32>,
    %c0_i32 = arith.constant 0 : i32
    %17 = arith.cmpi sgt, %arg1, %c0_i32 : i32
    %18 = arith.extui %17 : i1 to i32
    %c0_i32_13 = arith.constant 0 : i32
    %19 = arith.cmpi ne, %18, %c0_i32_13 : i32
    scf.if %19 {
      %c0_53 = arith.constant 0 : index
      %c0_54 = arith.constant 0 : index
      %c0_55 = arith.constant 0 : index
      %c0_56 = arith.constant 0 : index
      %140 = vector.load %arg3[%c0_53, %c0_54, %c0_55, %c0_56] : memref<1x1x16x256xf32, #tpu.memory_space<vmem>>, vector<1x1x16x128xf32>
      %141 = vector.shape_cast %140 : vector<1x1x16x128xf32> to vector<16x128xf32>
      %142 = vector.broadcast %1 : vector<16x1xf32> to vector<16x128xf32>
      %143 = arith.mulf %141, %142 : vector<16x128xf32>
      %144 = vector.broadcast %3 : vector<16x1xf32> to vector<16x128xf32>
      %145 = arith.addf %143, %144 : vector<16x128xf32>
      %146 = arith.truncf %145 : vector<16x128xf32> to vector<16x128xbf16>
      %cst_57 = arith.constant dense<0.000000e+00> : vector<16x128xf32>
      %147 = tpu.matmul %4, %146, %cst_57 {dimension_numbers = #tpu.dot_dimension_numbers<[1], [0], [0], [1], [0, 0, 1, 1], [], []>} : vector<16x16xbf16>, vector<16x128xbf16>, vector<16x128xf32> -> vector<16x128xf32>
      %148 = vector.broadcast %5 : vector<16x1xf32> to vector<16x128xf32>
      %149 = arith.addf %147, %148 : vector<16x128xf32>
      %c0_58 = arith.constant 0 : index
      %c0_59 = arith.constant 0 : index
      %150 = vector.load %arg12[%c0_58, %c0_59] : memref<16x1280xf32, #tpu.memory_space<vmem>>, vector<16x128xf32>
      tpu.vector_store %arg12[%c0_58, %c0_59], %149 {strides = array<i32>} : memref<16x1280xf32, #tpu.memory_space<vmem>>, vector<16x128xf32>,
    } else {
    }
    %c0_i32_14 = arith.constant 0 : i32
    %20 = arith.cmpi eq, %arg1, %c0_i32_14 : i32
    %21 = arith.extui %20 : i1 to i32
    %c0_i32_15 = arith.constant 0 : i32
    %22 = arith.cmpi ne, %21, %c0_i32_15 : i32
    scf.if %22 {
      %cst_53 = arith.constant 0.000000e+00 : f32
      %140 = vector.broadcast %cst_53 : f32 to vector<16x128xf32>
      %c0_54 = arith.constant 0 : index
      %c0_55 = arith.constant 0 : index
      %141 = vector.load %arg12[%c0_54, %c0_55] : memref<16x1280xf32, #tpu.memory_space<vmem>>, vector<16x128xf32>
      tpu.vector_store %arg12[%c0_54, %c0_55], %140 {strides = array<i32>} : memref<16x1280xf32, #tpu.memory_space<vmem>>, vector<16x128xf32>,
    } else {
    }
    %c1_i32 = arith.constant 1 : i32
    %23 = arith.cmpi slt, %arg1, %c1_i32 : i32
    %24 = arith.extui %23 : i1 to i32
    %c0_i32_16 = arith.constant 0 : i32
    %25 = arith.cmpi ne, %24, %c0_i32_16 : i32
    scf.if %25 {
      %c0_53 = arith.constant 0 : index
      %c0_54 = arith.constant 0 : index
      %c0_55 = arith.constant 0 : index
      %c128_56 = arith.constant 128 : index
      %140 = vector.load %arg3[%c0_53, %c0_54, %c0_55, %c128_56] : memref<1x1x16x256xf32, #tpu.memory_space<vmem>>, vector<1x1x16x128xf32>
      %141 = vector.shape_cast %140 : vector<1x1x16x128xf32> to vector<16x128xf32>
      %142 = vector.broadcast %1 : vector<16x1xf32> to vector<16x128xf32>
      %143 = arith.mulf %141, %142 : vector<16x128xf32>
      %144 = vector.broadcast %3 : vector<16x1xf32> to vector<16x128xf32>
      %145 = arith.addf %143, %144 : vector<16x128xf32>
      %146 = arith.truncf %145 : vector<16x128xf32> to vector<16x128xbf16>
      %cst_57 = arith.constant dense<0.000000e+00> : vector<16x128xf32>
      %147 = tpu.matmul %4, %146, %cst_57 {dimension_numbers = #tpu.dot_dimension_numbers<[1], [0], [0], [1], [0, 0, 1, 1], [], []>} : vector<16x16xbf16>, vector<16x128xbf16>, vector<16x128xf32> -> vector<16x128xf32>
      %148 = vector.broadcast %5 : vector<16x1xf32> to vector<16x128xf32>
      %149 = arith.addf %147, %148 : vector<16x128xf32>
      %c0_58 = arith.constant 0 : index
      %c1152 = arith.constant 1152 : index
      %150 = vector.load %arg12[%c0_58, %c1152] : memref<16x1280xf32, #tpu.memory_space<vmem>>, vector<16x128xf32>
      tpu.vector_store %arg12[%c0_58, %c1152], %149 {strides = array<i32>} : memref<16x1280xf32, #tpu.memory_space<vmem>>, vector<16x128xf32>,
    } else {
    }
    %c1_i32_17 = arith.constant 1 : i32
    %26 = arith.cmpi eq, %arg1, %c1_i32_17 : i32
    %27 = arith.extui %26 : i1 to i32
    %c0_i32_18 = arith.constant 0 : i32
    %28 = arith.cmpi ne, %27, %c0_i32_18 : i32
    scf.if %28 {
      %cst_53 = arith.constant 0.000000e+00 : f32
      %140 = vector.broadcast %cst_53 : f32 to vector<16x128xf32>
      %c0_54 = arith.constant 0 : index
      %c1152 = arith.constant 1152 : index
      %141 = vector.load %arg12[%c0_54, %c1152] : memref<16x1280xf32, #tpu.memory_space<vmem>>, vector<16x128xf32>
      tpu.vector_store %arg12[%c0_54, %c1152], %140 {strides = array<i32>} : memref<16x1280xf32, #tpu.memory_space<vmem>>, vector<16x128xf32>,
    } else {
    }
    %c0_19 = arith.constant 0 : index
    %c0_20 = arith.constant 0 : index
    %29 = vector.load %arg12[%c0_19, %c0_20] : memref<16x1280xf32, #tpu.memory_space<vmem>>, vector<16x1024xf32>
    %c0_21 = arith.constant 0 : index
    %c256 = arith.constant 256 : index
    %30 = vector.load %arg12[%c0_21, %c256] : memref<16x1280xf32, #tpu.memory_space<vmem>>, vector<16x1024xf32>
    %c0_22 = arith.constant 0 : index
    %c0_23 = arith.constant 0 : index
    %31 = vector.load %arg8[%c0_22, %c0_23] : memref<16x9xf32, #tpu.memory_space<vmem>>, vector<16x9xf32>
    %32 = vector.extract_strided_slice %31 {offsets = [0, 1], sizes = [16, 1], strides = [1, 1]} : vector<16x9xf32> to vector<16x1xf32>
    %33 = vector.broadcast %32 : vector<16x1xf32> to vector<16x1024xf32>
    %34 = arith.mulf %33, %29 : vector<16x1024xf32>
    %35 = vector.extract_strided_slice %31 {offsets = [0, 4], sizes = [16, 1], strides = [1, 1]} : vector<16x9xf32> to vector<16x1xf32>
    %36 = vector.broadcast %35 : vector<16x1xf32> to vector<16x1024xf32>
    %37 = arith.mulf %36, %15 : vector<16x1024xf32>
    %38 = arith.addf %34, %37 : vector<16x1024xf32>
    %39 = vector.extract_strided_slice %31 {offsets = [0, 7], sizes = [16, 1], strides = [1, 1]} : vector<16x9xf32> to vector<16x1xf32>
    %40 = vector.broadcast %39 : vector<16x1xf32> to vector<16x1024xf32>
    %41 = arith.mulf %40, %30 : vector<16x1024xf32>
    %42 = arith.addf %38, %41 : vector<16x1024xf32>
    %43 = vector.extract_strided_slice %31 {offsets = [0, 0], sizes = [16, 1], strides = [1, 1]} : vector<16x9xf32> to vector<16x1xf32>
    %44 = vector.broadcast %43 : vector<16x1xf32> to vector<16x1024xf32>
    %45 = arith.mulf %44, %29 : vector<16x1024xf32>
    %46 = vector.extract_strided_slice %31 {offsets = [0, 3], sizes = [16, 1], strides = [1, 1]} : vector<16x9xf32> to vector<16x1xf32>
    %47 = vector.broadcast %46 : vector<16x1xf32> to vector<16x1024xf32>
    %48 = arith.mulf %47, %15 : vector<16x1024xf32>
    %49 = arith.addf %45, %48 : vector<16x1024xf32>
    %50 = vector.extract_strided_slice %31 {offsets = [0, 6], sizes = [16, 1], strides = [1, 1]} : vector<16x9xf32> to vector<16x1xf32>
    %51 = vector.broadcast %50 : vector<16x1xf32> to vector<16x1024xf32>
    %52 = arith.mulf %51, %30 : vector<16x1024xf32>
    %53 = arith.addf %49, %52 : vector<16x1024xf32>
    %54 = vector.extract_strided_slice %31 {offsets = [0, 2], sizes = [16, 1], strides = [1, 1]} : vector<16x9xf32> to vector<16x1xf32>
    %55 = vector.broadcast %54 : vector<16x1xf32> to vector<16x1024xf32>
    %56 = arith.mulf %55, %29 : vector<16x1024xf32>
    %57 = vector.extract_strided_slice %31 {offsets = [0, 5], sizes = [16, 1], strides = [1, 1]} : vector<16x9xf32> to vector<16x1xf32>
    %58 = vector.broadcast %57 : vector<16x1xf32> to vector<16x1024xf32>
    %59 = arith.mulf %58, %15 : vector<16x1024xf32>
    %60 = arith.addf %56, %59 : vector<16x1024xf32>
    %61 = vector.extract_strided_slice %31 {offsets = [0, 8], sizes = [16, 1], strides = [1, 1]} : vector<16x9xf32> to vector<16x1xf32>
    %62 = vector.broadcast %61 : vector<16x1xf32> to vector<16x1024xf32>
    %63 = arith.mulf %62, %30 : vector<16x1024xf32>
    %64 = arith.addf %60, %63 : vector<16x1024xf32>
    %65 = tpu.iota {dimensions = array<i32: 1>} : vector<1x1024xi32>
    %c128_i32 = arith.constant 128 : i32
    %c0_i32_24 = arith.constant 0 : i32
    %66 = arith.cmpi eq, %c128_i32, %c0_i32_24 : i32
    %c1_i32_25 = arith.constant 1 : i32
    %67 = arith.select %66, %c1_i32_25, %c128_i32 : i32
    %68 = vector.broadcast %67 : i32 to vector<1x1024xi32>
    %69 = arith.remsi %65, %68 : vector<1x1024xi32>
    %c0_i32_26 = arith.constant 0 : i32
    %70 = vector.broadcast %c0_i32_26 : i32 to vector<1x1024xi32>
    %71 = arith.cmpi ne, %69, %70 : vector<1x1024xi32>
    %c0_i32_27 = arith.constant 0 : i32
    %72 = vector.broadcast %c0_i32_27 : i32 to vector<1x1024xi32>
    %73 = arith.cmpi slt, %69, %72 : vector<1x1024xi32>
    %c0_i32_28 = arith.constant 0 : i32
    %74 = arith.cmpi slt, %67, %c0_i32_28 : i32
    %75 = vector.broadcast %74 : i1 to vector<1x1024xi1>
    %76 = vector.broadcast %75 : vector<1x1024xi1> to vector<1x1024xi1>
    %77 = arith.xori %73, %76 : vector<1x1024xi1>
    %78 = arith.andi %77, %71 : vector<1x1024xi1>
    %79 = vector.broadcast %67 : i32 to vector<1x1024xi32>
    %80 = arith.addi %69, %79 : vector<1x1024xi32>
    %81 = arith.select %78, %80, %69 : vector<1x1024xi1>, vector<1x1024xi32>
    %c0_i32_29 = arith.constant 0 : i32
    %82 = vector.broadcast %c0_i32_29 : i32 to vector<1x1024xi32>
    %83 = arith.cmpi ne, %81, %82 : vector<1x1024xi32>
    %84 = arith.extui %83 : vector<1x1024xi1> to vector<1x1024xi32>
    %85 = arith.sitofp %84 : vector<1x1024xi32> to vector<1x1024xf32>
    %c127_i32 = arith.constant 127 : i32
    %86 = vector.broadcast %c127_i32 : i32 to vector<1x1024xi32>
    %87 = arith.cmpi ne, %81, %86 : vector<1x1024xi32>
    %88 = arith.extui %87 : vector<1x1024xi1> to vector<1x1024xi32>
    %89 = arith.sitofp %88 : vector<1x1024xi32> to vector<1x1024xf32>
    %c1_i32_30 = arith.constant 1 : i32
    %90 = tpu.dynamic_rotate %53 by %c1_i32_30 dim 1 : vector<16x1024xf32>, i32 -> vector<16x1024xf32>
    %91 = vector.broadcast %85 : vector<1x1024xf32> to vector<16x1024xf32>
    %92 = arith.mulf %91, %90 : vector<16x1024xf32>
    %93 = arith.addf %42, %92 : vector<16x1024xf32>
    %c1023_i32 = arith.constant 1023 : i32
    %94 = tpu.dynamic_rotate %64 by %c1023_i32 dim 1 : vector<16x1024xf32>, i32 -> vector<16x1024xf32>
    %95 = vector.broadcast %89 : vector<1x1024xf32> to vector<16x1024xf32>
    %96 = arith.mulf %95, %94 : vector<16x1024xf32>
    %97 = arith.addf %93, %96 : vector<16x1024xf32>
    %c0_31 = arith.constant 0 : index
    %c0_32 = arith.constant 0 : index
    %98 = vector.load %arg9[%c0_31, %c0_32] : memref<16x1xf32, #tpu.memory_space<vmem>>, vector<16x1xf32>
    %99 = vector.broadcast %98 : vector<16x1xf32> to vector<16x1024xf32>
    %100 = arith.addf %97, %99 : vector<16x1024xf32>
    %cst_33 = arith.constant 5.000000e-01 : f32
    %101 = vector.broadcast %cst_33 : f32 to vector<16x1024xf32>
    %102 = arith.mulf %101, %100 : vector<16x1024xf32>
    %cst_34 = arith.constant 4.471500e-02 : f32
    %103 = vector.broadcast %cst_34 : f32 to vector<16x1024xf32>
    %104 = arith.mulf %103, %100 : vector<16x1024xf32>
    %105 = arith.mulf %104, %100 : vector<16x1024xf32>
    %106 = arith.mulf %105, %100 : vector<16x1024xf32>
    %107 = arith.addf %100, %106 : vector<16x1024xf32>
    %cst_35 = arith.constant 0.797884583 : f32
    %108 = vector.broadcast %cst_35 : f32 to vector<16x1024xf32>
    %109 = arith.mulf %108, %107 : vector<16x1024xf32>
    %110 = math.tanh %109 : vector<16x1024xf32>
    %cst_36 = arith.constant 1.000000e+00 : f32
    %111 = vector.broadcast %cst_36 : f32 to vector<16x1024xf32>
    %112 = arith.addf %111, %110 : vector<16x1024xf32>
    %113 = arith.mulf %102, %112 : vector<16x1024xf32>
    %cst_37 = arith.constant 5.000000e-01 : f32
    %114 = vector.broadcast %cst_37 : f32 to vector<16x1024xf32>
    %115 = arith.mulf %114, %113 : vector<16x1024xf32>
    %cst_38 = arith.constant 4.471500e-02 : f32
    %116 = vector.broadcast %cst_38 : f32 to vector<16x1024xf32>
    %117 = arith.mulf %116, %113 : vector<16x1024xf32>
    %118 = arith.mulf %117, %113 : vector<16x1024xf32>
    %119 = arith.mulf %118, %113 : vector<16x1024xf32>
    %120 = arith.addf %113, %119 : vector<16x1024xf32>
    %cst_39 = arith.constant 0.797884583 : f32
    %121 = vector.broadcast %cst_39 : f32 to vector<16x1024xf32>
    %122 = arith.mulf %121, %120 : vector<16x1024xf32>
    %123 = math.tanh %122 : vector<16x1024xf32>
    %cst_40 = arith.constant 1.000000e+00 : f32
    %124 = vector.broadcast %cst_40 : f32 to vector<16x1024xf32>
    %125 = arith.addf %124, %123 : vector<16x1024xf32>
    %126 = arith.mulf %115, %125 : vector<16x1024xf32>
    %127 = arith.truncf %126 : vector<16x1024xf32> to vector<16x1024xbf16>
    %c0_41 = arith.constant 0 : index
    %c0_42 = arith.constant 0 : index
    %c0_43 = arith.constant 0 : index
    %128 = vector.load %arg10[%c0_41, %c0_42, %c0_43] : memref<1x16x1024xbf16, #tpu.memory_space<vmem>>, vector<1x16x1024xbf16>
    %129 = vector.shape_cast %128 : vector<1x16x1024xbf16> to vector<16x1024xbf16>
    %130 = vector.shape_cast %127 : vector<16x1024xbf16> to vector<1x16x1024xbf16>
    tpu.vector_store %arg10[%c0_41, %c0_42, %c0_43], %130 {strides = array<i32>} : memref<1x16x1024xbf16, #tpu.memory_space<vmem>>, vector<1x16x1024xbf16>,
    %c0_i32_44 = arith.constant 0 : i32
    %131 = arith.cmpi eq, %arg1, %c0_i32_44 : i32
    %132 = arith.extui %131 : i1 to i32
    %c0_i32_45 = arith.constant 0 : i32
    %133 = arith.cmpi ne, %132, %c0_i32_45 : i32
    scf.if %133 {
      %cst_53 = arith.constant 0.000000e+00 : f32
      %140 = vector.broadcast %cst_53 : f32 to vector<1x16x1xf32>
      %c0_54 = arith.constant 0 : index
      %c0_55 = arith.constant 0 : index
      %c0_56 = arith.constant 0 : index
      %141 = vector.load %arg11[%c0_54, %c0_55, %c0_56] : memref<1x16x1xf32, #tpu.memory_space<vmem>>, vector<1x16x1xf32>
      tpu.vector_store %arg11[%c0_54, %c0_55, %c0_56], %140 {strides = array<i32>} : memref<1x16x1xf32, #tpu.memory_space<vmem>>, vector<1x16x1xf32>,
    } else {
    }
    %c0_46 = arith.constant 0 : index
    %c0_47 = arith.constant 0 : index
    %c0_48 = arith.constant 0 : index
    %134 = vector.load %arg11[%c0_46, %c0_47, %c0_48] : memref<1x16x1xf32, #tpu.memory_space<vmem>>, vector<1x16x1xf32>
    %cst_49 = arith.constant dense<0.000000e+00> : vector<16xf32>
    %135 = vector.multi_reduction <add>, %126, %cst_49 [1] : vector<16x1024xf32> to vector<16xf32>
    %136 = vector.shape_cast %135 : vector<16xf32> to vector<16x1xf32>
    %137 = vector.shape_cast %136 : vector<16x1xf32> to vector<1x16x1xf32>
    %138 = arith.addf %134, %137 : vector<1x16x1xf32>
    %c0_50 = arith.constant 0 : index
    %c0_51 = arith.constant 0 : index
    %c0_52 = arith.constant 0 : index
    %139 = vector.load %arg11[%c0_50, %c0_51, %c0_52] : memref<1x16x1xf32, #tpu.memory_space<vmem>>, vector<1x16x1xf32>
    tpu.vector_store %arg11[%c0_50, %c0_51, %c0_52], %138 {strides = array<i32>} : memref<1x16x1xf32, #tpu.memory_space<vmem>>, vector<1x16x1xf32>,
    return
  }
  func.func @transform_0(%arg0: i32, %arg1: i32) -> (i32, i32, i32) {
    %c0_i32 = arith.constant 0 : i32
    %c0_i32_0 = arith.constant 0 : i32
    return %arg0, %c0_i32, %arg1 : i32, i32, i32
  }
  func.func @transform_1(%arg0: i32, %arg1: i32) -> (i32, i32, i32, i32) {
    %c0_i32 = arith.constant 0 : i32
    %c0_i32_0 = arith.constant 0 : i32
    %c0_i32_1 = arith.constant 0 : i32
    return %arg0, %arg1, %c0_i32, %c0_i32_0 : i32, i32, i32, i32
  }
  func.func @transform_2(%arg0: i32, %arg1: i32) -> (i32, i32, i32) {
    %c0_i32 = arith.constant 0 : i32
    %c0_i32_0 = arith.constant 0 : i32
    %c0_i32_1 = arith.constant 0 : i32
    return %arg0, %c0_i32, %c0_i32_0 : i32, i32, i32
  }
  func.func @transform_3(%arg0: i32, %arg1: i32) -> (i32, i32, i32) {
    %c0_i32 = arith.constant 0 : i32
    %c0_i32_0 = arith.constant 0 : i32
    %c0_i32_1 = arith.constant 0 : i32
    return %arg0, %c0_i32, %c0_i32_0 : i32, i32, i32
  }
  func.func @transform_4(%arg0: i32, %arg1: i32) -> (i32, i32) {
    %c0_i32 = arith.constant 0 : i32
    %c0_i32_0 = arith.constant 0 : i32
    %c0_i32_1 = arith.constant 0 : i32
    return %c0_i32, %c0_i32_0 : i32, i32
  }
  func.func @transform_5(%arg0: i32, %arg1: i32) -> (i32, i32) {
    %c0_i32 = arith.constant 0 : i32
    %c0_i32_0 = arith.constant 0 : i32
    %c0_i32_1 = arith.constant 0 : i32
    return %c0_i32, %c0_i32_0 : i32, i32
  }
  func.func @transform_6(%arg0: i32, %arg1: i32) -> (i32, i32) {
    %c0_i32 = arith.constant 0 : i32
    %c0_i32_0 = arith.constant 0 : i32
    %c0_i32_1 = arith.constant 0 : i32
    return %c0_i32, %c0_i32_0 : i32, i32
  }
  func.func @transform_7(%arg0: i32, %arg1: i32) -> (i32, i32) {
    %c0_i32 = arith.constant 0 : i32
    %c0_i32_0 = arith.constant 0 : i32
    %c0_i32_1 = arith.constant 0 : i32
    return %c0_i32, %c0_i32_0 : i32, i32
  }
  func.func @transform_8(%arg0: i32, %arg1: i32) -> (i32, i32, i32) {
    %c0_i32 = arith.constant 0 : i32
    %c0_i32_0 = arith.constant 0 : i32
    return %arg0, %c0_i32, %arg1 : i32, i32, i32
  }
  func.func @transform_9(%arg0: i32, %arg1: i32) -> (i32, i32, i32) {
    %c0_i32 = arith.constant 0 : i32
    %c0_i32_0 = arith.constant 0 : i32
    %c0_i32_1 = arith.constant 0 : i32
    return %arg0, %c0_i32, %c0_i32_0 : i32, i32, i32
  }
}

module attributes {stable_mosaic.version = 11 : i64} {
  func.func @_merge1_kernel(%arg0: i32, %arg1: i32, %arg2: memref<1x16x1024xbf16, #tpu.memory_space<vmem>>, %arg3: memref<1x16x1024xf32, #tpu.memory_space<vmem>>, %arg4: memref<1x16x16xbf16, #tpu.memory_space<vmem>>, %arg5: memref<1x16x1xf32, #tpu.memory_space<vmem>>, %arg6: memref<16x1xf32, #tpu.memory_space<vmem>>, %arg7: memref<1x16x1024xbf16, #tpu.memory_space<vmem>>, %arg8: memref<1x1x128xf32, #tpu.memory_space<vmem>>, %arg9: memref<1x1x128xf32, #tpu.memory_space<vmem>>) attributes {dimension_semantics = [#tpu.dimension_semantics<parallel>, #tpu.dimension_semantics<arbitrary>], iteration_bounds = array<i64: 2, 2>, scalar_prefetch = 0 : i64, scratch_operands = 0 : i64, tpu.core_type = #tpu.core_type<tc>, window_params = [{transform_indices = @transform_0, window_bounds = array<i64: 1, 16, 1024>}, {transform_indices = @transform_1, window_bounds = array<i64: 1, 16, 1024>}, {transform_indices = @transform_2, window_bounds = array<i64: 1, 16, 16>}, {transform_indices = @transform_3, window_bounds = array<i64: 1, 16, 1>}, {pipeline_mode = #tpu.pipeline_mode<synchronous>, transform_indices = @transform_4, window_bounds = array<i64: 16, 1>}, {transform_indices = @transform_5, window_bounds = array<i64: 1, 16, 1024>}, {transform_indices = @transform_6, window_bounds = array<i64: 1, 1, 128>}, {transform_indices = @transform_7, window_bounds = array<i64: 1, 1, 128>}]} {
    %c0 = arith.constant 0 : index
    %c0_0 = arith.constant 0 : index
    %c0_1 = arith.constant 0 : index
    %0 = vector.load %arg2[%c0, %c0_0, %c0_1] : memref<1x16x1024xbf16, #tpu.memory_space<vmem>>, vector<1x16x1024xbf16>
    %1 = vector.shape_cast %0 : vector<1x16x1024xbf16> to vector<16x1024xbf16>
    %c0_2 = arith.constant 0 : index
    %c0_3 = arith.constant 0 : index
    %c0_4 = arith.constant 0 : index
    %2 = vector.load %arg3[%c0_2, %c0_3, %c0_4] : memref<1x16x1024xf32, #tpu.memory_space<vmem>>, vector<1x16x1024xf32>
    %3 = vector.shape_cast %2 : vector<1x16x1024xf32> to vector<16x1024xf32>
    %c0_5 = arith.constant 0 : index
    %c0_6 = arith.constant 0 : index
    %c0_7 = arith.constant 0 : index
    %4 = vector.load %arg4[%c0_5, %c0_6, %c0_7] : memref<1x16x16xbf16, #tpu.memory_space<vmem>>, vector<1x16x16xbf16>
    %5 = vector.shape_cast %4 : vector<1x16x16xbf16> to vector<16x16xbf16>
    %cst = arith.constant dense<0.000000e+00> : vector<16x1024xf32>
    %6 = tpu.matmul %5, %1, %cst {dimension_numbers = #tpu.dot_dimension_numbers<[1], [0], [0], [1], [0, 0, 1, 1], [], []>} : vector<16x16xbf16>, vector<16x1024xbf16>, vector<16x1024xf32> -> vector<16x1024xf32>
    %c0_8 = arith.constant 0 : index
    %c0_9 = arith.constant 0 : index
    %c0_10 = arith.constant 0 : index
    %7 = vector.load %arg5[%c0_8, %c0_9, %c0_10] : memref<1x16x1xf32, #tpu.memory_space<vmem>>, vector<1x16x1xf32>
    %8 = vector.shape_cast %7 : vector<1x16x1xf32> to vector<16x1xf32>
    %9 = vector.broadcast %8 : vector<16x1xf32> to vector<16x1024xf32>
    %10 = arith.addf %6, %9 : vector<16x1024xf32>
    %c0_11 = arith.constant 0 : index
    %c0_12 = arith.constant 0 : index
    %11 = vector.load %arg6[%c0_11, %c0_12] : memref<16x1xf32, #tpu.memory_space<vmem>>, vector<16x1xf32>
    %12 = vector.broadcast %11 : vector<16x1xf32> to vector<16x1024xf32>
    %13 = arith.mulf %10, %12 : vector<16x1024xf32>
    %14 = arith.addf %13, %3 : vector<16x1024xf32>
    %15 = arith.truncf %14 : vector<16x1024xf32> to vector<16x1024xbf16>
    %c0_13 = arith.constant 0 : index
    %c0_14 = arith.constant 0 : index
    %c0_15 = arith.constant 0 : index
    %16 = vector.load %arg7[%c0_13, %c0_14, %c0_15] : memref<1x16x1024xbf16, #tpu.memory_space<vmem>>, vector<1x16x1024xbf16>
    %17 = vector.shape_cast %16 : vector<1x16x1024xbf16> to vector<16x1024xbf16>
    %18 = vector.shape_cast %15 : vector<16x1024xbf16> to vector<1x16x1024xbf16>
    tpu.vector_store %arg7[%c0_13, %c0_14, %c0_15], %18 {strides = array<i32>} : memref<1x16x1024xbf16, #tpu.memory_space<vmem>>, vector<1x16x1024xbf16>,
    %c0_i32 = arith.constant 0 : i32
    %19 = arith.cmpi eq, %arg1, %c0_i32 : i32
    %20 = arith.extui %19 : i1 to i32
    %c0_i32_16 = arith.constant 0 : i32
    %21 = arith.cmpi ne, %20, %c0_i32_16 : i32
    scf.if %21 {
      %cst_31 = arith.constant 0.000000e+00 : f32
      %39 = vector.broadcast %cst_31 : f32 to vector<1x1x128xf32>
      %c0_32 = arith.constant 0 : index
      %c0_33 = arith.constant 0 : index
      %c0_34 = arith.constant 0 : index
      %40 = vector.load %arg8[%c0_32, %c0_33, %c0_34] : memref<1x1x128xf32, #tpu.memory_space<vmem>>, vector<1x1x128xf32>
      tpu.vector_store %arg8[%c0_32, %c0_33, %c0_34], %39 {strides = array<i32>} : memref<1x1x128xf32, #tpu.memory_space<vmem>>, vector<1x1x128xf32>,
      %cst_35 = arith.constant 0.000000e+00 : f32
      %41 = vector.broadcast %cst_35 : f32 to vector<1x1x128xf32>
      %c0_36 = arith.constant 0 : index
      %c0_37 = arith.constant 0 : index
      %c0_38 = arith.constant 0 : index
      %42 = vector.load %arg9[%c0_36, %c0_37, %c0_38] : memref<1x1x128xf32, #tpu.memory_space<vmem>>, vector<1x1x128xf32>
      tpu.vector_store %arg9[%c0_36, %c0_37, %c0_38], %41 {strides = array<i32>} : memref<1x1x128xf32, #tpu.memory_space<vmem>>, vector<1x1x128xf32>,
    } else {
    }
    %c0_17 = arith.constant 0 : index
    %c0_18 = arith.constant 0 : index
    %c0_19 = arith.constant 0 : index
    %22 = vector.load %arg8[%c0_17, %c0_18, %c0_19] : memref<1x1x128xf32, #tpu.memory_space<vmem>>, vector<1x1x128xf32>
    %23 = vector.shape_cast %14 : vector<16x1024xf32> to vector<1x16x1024xf32>
    %cst_20 = arith.constant dense<0.000000e+00> : vector<1xf32>
    %24 = vector.multi_reduction <add>, %23, %cst_20 [1, 2] : vector<1x16x1024xf32> to vector<1xf32>
    %25 = vector.shape_cast %24 : vector<1xf32> to vector<1x1x1xf32>
    %26 = vector.extract %25[0, 0, 0] : f32 from vector<1x1x1xf32>
    %27 = vector.broadcast %26 : f32 to vector<1x1x128xf32>
    %28 = arith.addf %22, %27 : vector<1x1x128xf32>
    %c0_21 = arith.constant 0 : index
    %c0_22 = arith.constant 0 : index
    %c0_23 = arith.constant 0 : index
    %29 = vector.load %arg8[%c0_21, %c0_22, %c0_23] : memref<1x1x128xf32, #tpu.memory_space<vmem>>, vector<1x1x128xf32>
    tpu.vector_store %arg8[%c0_21, %c0_22, %c0_23], %28 {strides = array<i32>} : memref<1x1x128xf32, #tpu.memory_space<vmem>>, vector<1x1x128xf32>,
    %c0_24 = arith.constant 0 : index
    %c0_25 = arith.constant 0 : index
    %c0_26 = arith.constant 0 : index
    %30 = vector.load %arg9[%c0_24, %c0_25, %c0_26] : memref<1x1x128xf32, #tpu.memory_space<vmem>>, vector<1x1x128xf32>
    %31 = arith.mulf %14, %14 : vector<16x1024xf32>
    %32 = vector.shape_cast %31 : vector<16x1024xf32> to vector<1x16x1024xf32>
    %cst_27 = arith.constant dense<0.000000e+00> : vector<1xf32>
    %33 = vector.multi_reduction <add>, %32, %cst_27 [1, 2] : vector<1x16x1024xf32> to vector<1xf32>
    %34 = vector.shape_cast %33 : vector<1xf32> to vector<1x1x1xf32>
    %35 = vector.extract %34[0, 0, 0] : f32 from vector<1x1x1xf32>
    %36 = vector.broadcast %35 : f32 to vector<1x1x128xf32>
    %37 = arith.addf %30, %36 : vector<1x1x128xf32>
    %c0_28 = arith.constant 0 : index
    %c0_29 = arith.constant 0 : index
    %c0_30 = arith.constant 0 : index
    %38 = vector.load %arg9[%c0_28, %c0_29, %c0_30] : memref<1x1x128xf32, #tpu.memory_space<vmem>>, vector<1x1x128xf32>
    tpu.vector_store %arg9[%c0_28, %c0_29, %c0_30], %37 {strides = array<i32>} : memref<1x1x128xf32, #tpu.memory_space<vmem>>, vector<1x1x128xf32>,
    return
  }
  func.func @transform_0(%arg0: i32, %arg1: i32) -> (i32, i32, i32) {
    %c0_i32 = arith.constant 0 : i32
    %c0_i32_0 = arith.constant 0 : i32
    return %arg0, %c0_i32, %arg1 : i32, i32, i32
  }
  func.func @transform_1(%arg0: i32, %arg1: i32) -> (i32, i32, i32) {
    %c0_i32 = arith.constant 0 : i32
    %c0_i32_0 = arith.constant 0 : i32
    return %arg0, %c0_i32, %arg1 : i32, i32, i32
  }
  func.func @transform_2(%arg0: i32, %arg1: i32) -> (i32, i32, i32) {
    %c0_i32 = arith.constant 0 : i32
    %c0_i32_0 = arith.constant 0 : i32
    %c0_i32_1 = arith.constant 0 : i32
    return %arg0, %c0_i32, %c0_i32_0 : i32, i32, i32
  }
  func.func @transform_3(%arg0: i32, %arg1: i32) -> (i32, i32, i32) {
    %c0_i32 = arith.constant 0 : i32
    %c0_i32_0 = arith.constant 0 : i32
    %c0_i32_1 = arith.constant 0 : i32
    return %arg0, %c0_i32, %c0_i32_0 : i32, i32, i32
  }
  func.func @transform_4(%arg0: i32, %arg1: i32) -> (i32, i32) {
    %c0_i32 = arith.constant 0 : i32
    %c0_i32_0 = arith.constant 0 : i32
    %c0_i32_1 = arith.constant 0 : i32
    return %c0_i32, %c0_i32_0 : i32, i32
  }
  func.func @transform_5(%arg0: i32, %arg1: i32) -> (i32, i32, i32) {
    %c0_i32 = arith.constant 0 : i32
    %c0_i32_0 = arith.constant 0 : i32
    return %arg0, %c0_i32, %arg1 : i32, i32, i32
  }
  func.func @transform_6(%arg0: i32, %arg1: i32) -> (i32, i32, i32) {
    %c0_i32 = arith.constant 0 : i32
    %c0_i32_0 = arith.constant 0 : i32
    %c0_i32_1 = arith.constant 0 : i32
    return %arg0, %c0_i32, %c0_i32_0 : i32, i32, i32
  }
  func.func @transform_7(%arg0: i32, %arg1: i32) -> (i32, i32, i32) {
    %c0_i32 = arith.constant 0 : i32
    %c0_i32_0 = arith.constant 0 : i32
    %c0_i32_1 = arith.constant 0 : i32
    return %arg0, %c0_i32, %c0_i32_0 : i32, i32, i32
  }
}

module attributes {stable_mosaic.version = 11 : i64} {
  func.func @_branch2_kernel(%arg0: i32, %arg1: i32, %arg2: memref<1x16x1024xbf16, #tpu.memory_space<vmem>>, %arg3: memref<1x16x1xf32, #tpu.memory_space<vmem>>, %arg4: memref<1x16x1xf32, #tpu.memory_space<vmem>>, %arg5: memref<16x16xbf16, #tpu.memory_space<vmem>>, %arg6: memref<16x1xf32, #tpu.memory_space<vmem>>, %arg7: memref<16x16xbf16, #tpu.memory_space<vmem>>, %arg8: memref<16x1xf32, #tpu.memory_space<vmem>>, %arg9: memref<16x1xf32, #tpu.memory_space<vmem>>, %arg10: memref<1x16x1024xf32, #tpu.memory_space<vmem>>) attributes {dimension_semantics = [#tpu.dimension_semantics<parallel>, #tpu.dimension_semantics<parallel>], iteration_bounds = array<i64: 2, 2>, scalar_prefetch = 0 : i64, scratch_operands = 0 : i64, tpu.core_type = #tpu.core_type<tc>, window_params = [{transform_indices = @transform_0, window_bounds = array<i64: 1, 16, 1024>}, {transform_indices = @transform_1, window_bounds = array<i64: 1, 16, 1>}, {transform_indices = @transform_2, window_bounds = array<i64: 1, 16, 1>}, {pipeline_mode = #tpu.pipeline_mode<synchronous>, transform_indices = @transform_3, window_bounds = array<i64: 16, 16>}, {pipeline_mode = #tpu.pipeline_mode<synchronous>, transform_indices = @transform_4, window_bounds = array<i64: 16, 1>}, {pipeline_mode = #tpu.pipeline_mode<synchronous>, transform_indices = @transform_5, window_bounds = array<i64: 16, 16>}, {pipeline_mode = #tpu.pipeline_mode<synchronous>, transform_indices = @transform_6, window_bounds = array<i64: 16, 1>}, {pipeline_mode = #tpu.pipeline_mode<synchronous>, transform_indices = @transform_7, window_bounds = array<i64: 16, 1>}, {transform_indices = @transform_8, window_bounds = array<i64: 1, 16, 1024>}]} {
    %c0 = arith.constant 0 : index
    %c0_0 = arith.constant 0 : index
    %c0_1 = arith.constant 0 : index
    %0 = vector.load %arg2[%c0, %c0_0, %c0_1] : memref<1x16x1024xbf16, #tpu.memory_space<vmem>>, vector<1x16x1024xbf16>
    %1 = vector.shape_cast %0 : vector<1x16x1024xbf16> to vector<16x1024xbf16>
    %2 = arith.extf %1 : vector<16x1024xbf16> to vector<16x1024xf32>
    %c0_2 = arith.constant 0 : index
    %c0_3 = arith.constant 0 : index
    %c0_4 = arith.constant 0 : index
    %3 = vector.load %arg3[%c0_2, %c0_3, %c0_4] : memref<1x16x1xf32, #tpu.memory_space<vmem>>, vector<1x16x1xf32>
    %4 = vector.shape_cast %3 : vector<1x16x1xf32> to vector<16x1xf32>
    %5 = vector.broadcast %4 : vector<16x1xf32> to vector<16x1024xf32>
    %6 = arith.mulf %2, %5 : vector<16x1024xf32>
    %c0_5 = arith.constant 0 : index
    %c0_6 = arith.constant 0 : index
    %c0_7 = arith.constant 0 : index
    %7 = vector.load %arg4[%c0_5, %c0_6, %c0_7] : memref<1x16x1xf32, #tpu.memory_space<vmem>>, vector<1x16x1xf32>
    %8 = vector.shape_cast %7 : vector<1x16x1xf32> to vector<16x1xf32>
    %9 = vector.broadcast %8 : vector<16x1xf32> to vector<16x1024xf32>
    %10 = arith.addf %6, %9 : vector<16x1024xf32>
    %11 = arith.truncf %10 : vector<16x1024xf32> to vector<16x1024xbf16>
    %c0_8 = arith.constant 0 : index
    %c0_9 = arith.constant 0 : index
    %12 = vector.load %arg5[%c0_8, %c0_9] : memref<16x16xbf16, #tpu.memory_space<vmem>>, vector<16x16xbf16>
    %cst = arith.constant dense<0.000000e+00> : vector<16x1024xf32>
    %13 = tpu.matmul %12, %11, %cst {dimension_numbers = #tpu.dot_dimension_numbers<[1], [0], [0], [1], [0, 0, 1, 1], [], []>} : vector<16x16xbf16>, vector<16x1024xbf16>, vector<16x1024xf32> -> vector<16x1024xf32>
    %c0_10 = arith.constant 0 : index
    %c0_11 = arith.constant 0 : index
    %14 = vector.load %arg6[%c0_10, %c0_11] : memref<16x1xf32, #tpu.memory_space<vmem>>, vector<16x1xf32>
    %15 = vector.broadcast %14 : vector<16x1xf32> to vector<16x1024xf32>
    %16 = arith.addf %13, %15 : vector<16x1024xf32>
    %cst_12 = arith.constant 5.000000e-01 : f32
    %17 = vector.broadcast %cst_12 : f32 to vector<16x1024xf32>
    %18 = arith.mulf %17, %16 : vector<16x1024xf32>
    %cst_13 = arith.constant 4.471500e-02 : f32
    %19 = vector.broadcast %cst_13 : f32 to vector<16x1024xf32>
    %20 = arith.mulf %19, %16 : vector<16x1024xf32>
    %21 = arith.mulf %20, %16 : vector<16x1024xf32>
    %22 = arith.mulf %21, %16 : vector<16x1024xf32>
    %23 = arith.addf %16, %22 : vector<16x1024xf32>
    %cst_14 = arith.constant 0.797884583 : f32
    %24 = vector.broadcast %cst_14 : f32 to vector<16x1024xf32>
    %25 = arith.mulf %24, %23 : vector<16x1024xf32>
    %26 = math.tanh %25 : vector<16x1024xf32>
    %cst_15 = arith.constant 1.000000e+00 : f32
    %27 = vector.broadcast %cst_15 : f32 to vector<16x1024xf32>
    %28 = arith.addf %27, %26 : vector<16x1024xf32>
    %29 = arith.mulf %18, %28 : vector<16x1024xf32>
    %cst_16 = arith.constant 5.000000e-01 : f32
    %30 = vector.broadcast %cst_16 : f32 to vector<16x1024xf32>
    %31 = arith.mulf %30, %29 : vector<16x1024xf32>
    %cst_17 = arith.constant 4.471500e-02 : f32
    %32 = vector.broadcast %cst_17 : f32 to vector<16x1024xf32>
    %33 = arith.mulf %32, %29 : vector<16x1024xf32>
    %34 = arith.mulf %33, %29 : vector<16x1024xf32>
    %35 = arith.mulf %34, %29 : vector<16x1024xf32>
    %36 = arith.addf %29, %35 : vector<16x1024xf32>
    %cst_18 = arith.constant 0.797884583 : f32
    %37 = vector.broadcast %cst_18 : f32 to vector<16x1024xf32>
    %38 = arith.mulf %37, %36 : vector<16x1024xf32>
    %39 = math.tanh %38 : vector<16x1024xf32>
    %cst_19 = arith.constant 1.000000e+00 : f32
    %40 = vector.broadcast %cst_19 : f32 to vector<16x1024xf32>
    %41 = arith.addf %40, %39 : vector<16x1024xf32>
    %42 = arith.mulf %31, %41 : vector<16x1024xf32>
    %43 = arith.truncf %42 : vector<16x1024xf32> to vector<16x1024xbf16>
    %c0_20 = arith.constant 0 : index
    %c0_21 = arith.constant 0 : index
    %44 = vector.load %arg7[%c0_20, %c0_21] : memref<16x16xbf16, #tpu.memory_space<vmem>>, vector<16x16xbf16>
    %cst_22 = arith.constant dense<0.000000e+00> : vector<16x1024xf32>
    %45 = tpu.matmul %44, %43, %cst_22 {dimension_numbers = #tpu.dot_dimension_numbers<[1], [0], [0], [1], [0, 0, 1, 1], [], []>} : vector<16x16xbf16>, vector<16x1024xbf16>, vector<16x1024xf32> -> vector<16x1024xf32>
    %c0_23 = arith.constant 0 : index
    %c0_24 = arith.constant 0 : index
    %46 = vector.load %arg8[%c0_23, %c0_24] : memref<16x1xf32, #tpu.memory_space<vmem>>, vector<16x1xf32>
    %47 = vector.broadcast %46 : vector<16x1xf32> to vector<16x1024xf32>
    %48 = arith.addf %45, %47 : vector<16x1024xf32>
    %c0_25 = arith.constant 0 : index
    %c0_26 = arith.constant 0 : index
    %49 = vector.load %arg9[%c0_25, %c0_26] : memref<16x1xf32, #tpu.memory_space<vmem>>, vector<16x1xf32>
    %50 = vector.broadcast %49 : vector<16x1xf32> to vector<16x1024xf32>
    %51 = arith.mulf %48, %50 : vector<16x1024xf32>
    %52 = arith.addf %51, %2 : vector<16x1024xf32>
    %c0_27 = arith.constant 0 : index
    %c0_28 = arith.constant 0 : index
    %c0_29 = arith.constant 0 : index
    %53 = vector.load %arg10[%c0_27, %c0_28, %c0_29] : memref<1x16x1024xf32, #tpu.memory_space<vmem>>, vector<1x16x1024xf32>
    %54 = vector.shape_cast %53 : vector<1x16x1024xf32> to vector<16x1024xf32>
    %55 = vector.shape_cast %52 : vector<16x1024xf32> to vector<1x16x1024xf32>
    tpu.vector_store %arg10[%c0_27, %c0_28, %c0_29], %55 {strides = array<i32>} : memref<1x16x1024xf32, #tpu.memory_space<vmem>>, vector<1x16x1024xf32>,
    return
  }
  func.func @transform_0(%arg0: i32, %arg1: i32) -> (i32, i32, i32) {
    %c0_i32 = arith.constant 0 : i32
    %c0_i32_0 = arith.constant 0 : i32
    return %arg0, %c0_i32, %arg1 : i32, i32, i32
  }
  func.func @transform_1(%arg0: i32, %arg1: i32) -> (i32, i32, i32) {
    %c0_i32 = arith.constant 0 : i32
    %c0_i32_0 = arith.constant 0 : i32
    %c0_i32_1 = arith.constant 0 : i32
    return %arg0, %c0_i32, %c0_i32_0 : i32, i32, i32
  }
  func.func @transform_2(%arg0: i32, %arg1: i32) -> (i32, i32, i32) {
    %c0_i32 = arith.constant 0 : i32
    %c0_i32_0 = arith.constant 0 : i32
    %c0_i32_1 = arith.constant 0 : i32
    return %arg0, %c0_i32, %c0_i32_0 : i32, i32, i32
  }
  func.func @transform_3(%arg0: i32, %arg1: i32) -> (i32, i32) {
    %c0_i32 = arith.constant 0 : i32
    %c0_i32_0 = arith.constant 0 : i32
    %c0_i32_1 = arith.constant 0 : i32
    return %c0_i32, %c0_i32_0 : i32, i32
  }
  func.func @transform_4(%arg0: i32, %arg1: i32) -> (i32, i32) {
    %c0_i32 = arith.constant 0 : i32
    %c0_i32_0 = arith.constant 0 : i32
    %c0_i32_1 = arith.constant 0 : i32
    return %c0_i32, %c0_i32_0 : i32, i32
  }
  func.func @transform_5(%arg0: i32, %arg1: i32) -> (i32, i32) {
    %c0_i32 = arith.constant 0 : i32
    %c0_i32_0 = arith.constant 0 : i32
    %c0_i32_1 = arith.constant 0 : i32
    return %c0_i32, %c0_i32_0 : i32, i32
  }
  func.func @transform_6(%arg0: i32, %arg1: i32) -> (i32, i32) {
    %c0_i32 = arith.constant 0 : i32
    %c0_i32_0 = arith.constant 0 : i32
    %c0_i32_1 = arith.constant 0 : i32
    return %c0_i32, %c0_i32_0 : i32, i32
  }
  func.func @transform_7(%arg0: i32, %arg1: i32) -> (i32, i32) {
    %c0_i32 = arith.constant 0 : i32
    %c0_i32_0 = arith.constant 0 : i32
    %c0_i32_1 = arith.constant 0 : i32
    return %c0_i32, %c0_i32_0 : i32, i32
  }
  func.func @transform_8(%arg0: i32, %arg1: i32) -> (i32, i32, i32) {
    %c0_i32 = arith.constant 0 : i32
    %c0_i32_0 = arith.constant 0 : i32
    return %arg0, %c0_i32, %arg1 : i32, i32, i32
  }
}

</mosaic_0001>

<bundles_post_ra>
// kernel: _lambda_.4
= control target key start
LH: loop header
LB: loop body
LE: loop exit
PB: predicated region body
PF: predicated region fallthrough
CT: control target
= control target key end

     0   :  { %s1627_s0 = inlined_call_operand.vmem [shape: bf16[2,16,2048], index: 0, kind: input, shape index: {}]   ;;  %s1628_s1 = inlined_call_operand.vmem [shape: f32[2,16,2048], index: 1, kind: input, shape index: {}]   ;;  %s1629_s2 = inlined_call_operand.vmem [shape: bf16[2,16,16], index: 2, kind: input, shape index: {}]   ;;  %s1630_s3 = inlined_call_operand.vmem [shape: f32[2,16,1], index: 3, kind: input, shape index: {}]   ;;  %s1631_s4 = inlined_call_operand.vmem [shape: f32[16,1], index: 4, kind: input, shape index: {}]   ;;  %s1632_s5 = inlined_call_operand.vmem [shape: bf16[2,16,2048], index: 5, kind: output, shape index: {0}]   ;;  %s1633_s6 = inlined_call_operand.vmem [shape: f32[2,1,128], index: 6, kind: output, shape index: {1}]   ;;  %s1634_s7 = inlined_call_operand.vmem [shape: f32[2,1,128], index: 7, kind: output, shape index: {2}]  }
   0x1   :  { %1636 = sst [smem:[#allocation5_spill]] %s1627_s0 }
   0x2   :  { %1637 = sst [smem:[#allocation6_spill]] %s1628_s1 }
   0x3   :  { %s1330_s24 = smov 0   ;;  %s1332_s25 = smov 0  }
   0x4   :  { %s1334_s26 = smov 0   ;;  %s1336_s27 = smov 0  }
   0x5   :  { %s1338_s28 = smov 0   ;;  %s1340_s29 = smov 0  }
   0x6   :  { %s1342_s30 = smov 0  }
   0x7 LB: > { %s27_s8 = sadd.s32 1, %s1278_s28  ;;  %s30_s9 = sadd.s32 1, %s1282_s29  ;;  %s1286_s30 = sphi %s1342_s30, %s18_s30   ;;  %s1282_s29 = sphi %s1340_s29, %s1648_s29   ;;  %s1278_s28 = sphi %s1338_s28, %s1647_s28   ;;  %s1274_s27 = sphi %s1336_s27, %s1646_s27   ;;  %s1270_s26 = sphi %s1334_s26, %s1645_s26   ;;  %s1266_s25 = sphi %s1332_s25, %s1644_s25   ;;  %s1262_s24 = sphi %s1330_s24, %s1643_s24  }
   0x8   : > { %p28_p0 = scmp.ge.s32.totalorder %s27_s8, 2  ;;  %s1109_s10 = sadd.s32 4294967295, %s1286_s30  }
   0x9   : > { %p46_p1 = scmp.ne.s32.totalorder %s1266_s25, %s1262_s24  ;;  %p47_p2 = scmp.eq.s32.totalorder %s1286_s30, 0 }
   0xa   : > { %s1650_s8 = smov (%p28_p0, %s27_s8), 0  ;;  %s1652_s9 = smov (!%p28_p0, %s30_s9), %s1282_s29 }
   0xb   : > { %p32_p3 = scmp.ge.s32.totalorder %s1652_s9, 2  ;;  %p179_p4 = scmp.eq.s32.totalorder %s1109_s10, 3 }
   0xc   : > { %s35_s11 = ssub.s32 %s1278_s28, %s1650_s8  ;;  %p1376_p5 = por %p47_p2, %p46_p1 }
   0xd   : > { %s1654_s9 = smov (%p32_p3, %s1652_s9), 0  ;;  %p1382_p6 = por %p179_p4, %p46_p1 }
   0xe   : > { %s34_s14 = ssub.s32 %s1282_s29, %s1654_s9  ;;  %s39_s16 = sadd.s32 1, %s1266_s25 }
   0xf   : > { %s36_s15 = sor.u32 %s35_s11, %s34_s14  ;;  %p1112_p8 = scmp.ge.s32.totalorder %s1286_s30, 4 }
  0x10   : > { %p37_p7 = scmp.eq.s32.totalorder %s36_s15, 0 }
  0x11   : > { %256 = sbr.rel (%p1112_p8) target bundleno = 56 (0x38), region = 20 }
  0x12   : > { %s1390_s17 = scalar_select %p37_p7, %s1266_s25, %s39_s16  }
  0x18   : > { %259 = sbr.rel (!%p1376_p5) target bundleno = 38 (0x26), region = 24  ;;  %s261_s18 = sand.u32 (%p1376_p5), 1, %s1266_s25  }
  0x19   : > { %s1114_s19 = sshll.u32 (%p1376_p5), %s1278_s28, 3  ;;  %s1113_s20 = sshll.u32 (%p1376_p5), %s261_s18, 6 }
  0x1a   : > { %s1115_s21 = sshll.u32 (%p1376_p5), %s1282_s29, 5  ;;  %s1640_s0 = sld [smem:[#allocation5_spill]] (%p1376_p5) }
  0x1b   : > { %s266_s22 = sadd.s32 (%p1376_p5), %s1115_s21, %s1114_s19  ;;  %s263_s15 = scalar_lea.vmem (%p1376_p5), [#allocation2], %s1113_s20 }
  0x1c   : > { %s1116_s23 = sshll.u32 (%p1376_p5), %s266_s22, 2 }
  0x20   : > { %s268_s14 = scalar_lea.vmem %s1640_s0, %s1116_s23 }
  0x21   : > { %v281_v0 = vld [vmem:[%s268_s14] sm:$0xff]  ;;  %v283_v1 = vld [vmem:[%s268_s14 + $0x8] sm:$0xff]  ;;  %v285_v2 = vld [vmem:[%s268_s14 + $0x10] sm:$0xff] }
  0x22   : > { %282 = vst [vmem:[%s263_s15] sm:$0xff] %v281_v0  ;;  %284 = vst [vmem:[%s263_s15 + $0x8] sm:$0xff] %v283_v1  ;;  %v287_v3 = vld [vmem:[%s268_s14 + $0x18] sm:$0xff]  ;;  %v289_v4 = vld [vmem:[%s268_s14 + $0x40] sm:$0xff] }
  0x23   : > { %286 = vst [vmem:[%s263_s15 + $0x10] sm:$0xff] %v285_v2  ;;  %v291_v5 = vld [vmem:[%s268_s14 + $0x48] sm:$0xff]  ;;  %288 = vst [vmem:[%s263_s15 + $0x18] sm:$0xff] %v287_v3  ;;  %v293_v6 = vld [vmem:[%s268_s14 + $0x50] sm:$0xff] }
  0x24   : > { %290 = vst [vmem:[%s263_s15 + $0x20] sm:$0xff] %v289_v4  ;;  %292 = vst [vmem:[%s263_s15 + $0x28] sm:$0xff] %v291_v5  ;;  %v295_v7 = vld [vmem:[%s268_s14 + $0x58] sm:$0xff] }
  0x25   : > { %294 = vst [vmem:[%s263_s15 + $0x30] sm:$0xff] %v293_v6  ;;  %296 = vst [vmem:[%s263_s15 + $0x38] sm:$0xff] %v295_v7 }
  0x26 PF: > { %302 = sbr.rel (!%p1376_p5) target bundleno = 56 (0x38), region = 47  ;;  %s304_s16 = sand.u32 (%p1376_p5), 1, %s1266_s25  }
  0x27   : > { %s1118_s18 = sshll.u32 (%p1376_p5), %s1278_s28, 3  ;;  %s1117_s19 = sshll.u32 (%p1376_p5), %s304_s16, 7 }
  0x28   : > { %s1119_s20 = sshll.u32 (%p1376_p5), %s1282_s29, 5  ;;  %s1641_s1 = sld [smem:[#allocation6_spill]] (%p1376_p5) }
  0x29   : > { %s309_s21 = sadd.s32 (%p1376_p5), %s1119_s20, %s1118_s18  ;;  %s306_s12 = scalar_lea.vmem (%p1376_p5), [#allocation3], %s1117_s19 }
  0x2a   : > { %s1120_s22 = sshll.u32 (%p1376_p5), %s309_s21, 3 }
  0x2e   : > { %s1409_s11 = scalar_lea.vmem %s1641_s1, %s1120_s22 }
  0x2f   : > { %v324_v8 = vld [vmem:[%s1409_s11] sm:$0xff]  ;;  %v326_v9 = vld [vmem:[%s1409_s11 + $0x8] sm:$0xff]  ;;  %v328_v10 = vld [vmem:[%s1409_s11 + $0x10] sm:$0xff] }
  0x30   : > { %325 = vst [vmem:[%s306_s12] sm:$0xff] %v324_v8  ;;  %327 = vst [vmem:[%s306_s12 + $0x8] sm:$0xff] %v326_v9  ;;  %v330_v11 = vld [vmem:[%s1409_s11 + $0x18] sm:$0xff]  ;;  %v332_v12 = vld [vmem:[%s1409_s11 + $0x20] sm:$0xff] }
  0x31   : > { %329 = vst [vmem:[%s306_s12 + $0x10] sm:$0xff] %v328_v10  ;;  %v334_v13 = vld [vmem:[%s1409_s11 + $0x28] sm:$0xff]  ;;  %331 = vst [vmem:[%s306_s12 + $0x18] sm:$0xff] %v330_v11  ;;  %v336_v14 = vld [vmem:[%s1409_s11 + $0x30] sm:$0xff] }
  0x32   : > { %333 = vst [vmem:[%s306_s12 + $0x20] sm:$0xff] %v332_v12  ;;  %335 = vst [vmem:[%s306_s12 + $0x28] sm:$0xff] %v334_v13  ;;  %v338_v15 = vld [vmem:[%s1409_s11 + $0x38] sm:$0xff]  ;;  %v340_v16 = vld [vmem:[%s1409_s11 + $0x80] sm:$0xff] }
  0x33   : > { %337 = vst [vmem:[%s306_s12 + $0x30] sm:$0xff] %v336_v14  ;;  %339 = vst [vmem:[%s306_s12 + $0x38] sm:$0xff] %v338_v15  ;;  %v342_v17 = vld [vmem:[%s1409_s11 + $0x88] sm:$0xff]  ;;  %v344_v18 = vld [vmem:[%s1409_s11 + $0x90] sm:$0xff] }
  0x34   : > { %341 = vst [vmem:[%s306_s12 + $0x40] sm:$0xff] %v340_v16  ;;  %v346_v19 = vld [vmem:[%s1409_s11 + $0x98] sm:$0xff]  ;;  %343 = vst [vmem:[%s306_s12 + $0x48] sm:$0xff] %v342_v17  ;;  %v348_v20 = vld [vmem:[%s1409_s11 + $0xa0] sm:$0xff] }
  0x35   : > { %345 = vst [vmem:[%s306_s12 + $0x50] sm:$0xff] %v344_v18  ;;  %347 = vst [vmem:[%s306_s12 + $0x58] sm:$0xff] %v346_v19  ;;  %v350_v21 = vld [vmem:[%s1409_s11 + $0xa8] sm:$0xff]  ;;  %v352_v22 = vld [vmem:[%s1409_s11 + $0xb0] sm:$0xff] }
  0x36   : > { %349 = vst [vmem:[%s306_s12 + $0x60] sm:$0xff] %v348_v20  ;;  %351 = vst [vmem:[%s306_s12 + $0x68] sm:$0xff] %v350_v21  ;;  %v354_v23 = vld [vmem:[%s1409_s11 + $0xb8] sm:$0xff] }
  0x37   : > { %353 = vst [vmem:[%s306_s12 + $0x70] sm:$0xff] %v352_v22  ;;  %355 = vst [vmem:[%s306_s12 + $0x78] sm:$0xff] %v354_v23 }
  0x38 PF: > { %p1121_p9 = scmp.ge.s32.totalorder %s1286_s30, 1  ;;  %p376_p10 = scmp.lt.s32.totalorder %s1286_s30, 5 }
  0x3a   : > { %p377_p11 = pnand %p1121_p9, %p376_p10 }
  0x3b   : > { %s1635_s14 = sand.u32 (!%p377_p11), 1, %s1262_s24   ;;  %p442_p12 = scmp.lt.s32.totalorder (!%p377_p11), %s1274_s27, 1  ;;  %v719_v24 = vld [vmem:[%s1631_s4] sm:$0xff] (!%p377_p11)  ;;  %v1288_v25 = vmov (!%p377_p11), 0   ;;  %v720_v40 = vld [vmem:[%s1631_s4 + $0x8] sm:$0xff] (!%p377_p11)  ;;  %vm543_vm0 = vcmask (!%p377_p11), 130048  }
  0x3c   : > { %380 = sbr.rel (%p377_p11) target bundleno = 552 (0x228), region = 78  ;;  %s1436_s18 = sshll.u32 (!%p377_p11), %s1635_s14, 6  ;;  %579 = vmatprep.mubr.bf16.mxu0 (!%p377_p11), %v1288_v25  ;;  %622 = vmatprep.mubr.bf16.mxu1 (!%p377_p11), %v1288_v25 }
  0x3d   : > { %1229 = vset.pattern.permute.xlu0 (!%p377_p11), %v1288_v25  ;;  %1230 = vset.pattern.permute.xlu1 (!%p377_p11), %v1288_v25  ;;  %s385_s19 = scalar_lea.vmem (!%p377_p11), [#allocation2], %s1436_s18  ;;  %s1642_s0 = sand.u32 (!%p377_p11), 1, %s1262_s24  }
  0x3e   : > { %v460_v26 = vld [vmem:[%s385_s19] sm:$0xff] (!%p377_p11)  ;;  %v461_v28 = vld [vmem:[%s385_s19 + $0x8] sm:$0xff] (!%p377_p11)  ;;  %723 = vperm.xlu1 (!%p377_p11), %1230, %v719_v24   ;;  %v462_v32 = vld [vmem:[%s385_s19 + $0x10] sm:$0xff] (!%p377_p11)  ;;  %s1523_s24 = scalar_lea.vmem (!%p377_p11), [#allocation4], %s1436_s18  ;;  %p1150_p13 = scmp.ne.s32.totalorder (!%p377_p11), %s1270_s26, 0 }
  0x3f   : > { %v464_v27 = vld [vmem:[%s385_s19 + $0x20] sm:$0xff] (!%p377_p11)  ;;  %v465_v30 = vld [vmem:[%s385_s19 + $0x28] sm:$0xff] (!%p377_p11)  ;;  %v466_v33 = vld [vmem:[%s385_s19 + $0x30] sm:$0xff] (!%p377_p11) }
  0x40   : > { %v1131_v29 = vcombine.high (!%p377_p11), %v460_v26, %v464_v27  ;;  %v1130_v31 = vcombine.low (!%p377_p11), %v460_v26, %v464_v27  ;;  %v1133_v34 = vcombine.high (!%p377_p11), %v461_v28, %v465_v30  ;;  %v1132_v35 = vcombine.low (!%p377_p11), %v461_v28, %v465_v30  ;;  %v463_v37 = vld [vmem:[%s385_s19 + $0x18] sm:$0xff] (!%p377_p11) }
  0x41   : > { %v1135_v36 = vcombine.high (!%p377_p11), %v462_v32, %v466_v33  ;;  %v467_v38 = vld [vmem:[%s385_s19 + $0x38] sm:$0xff] (!%p377_p11)  ;;  %v1134_v41 = vcombine.low (!%p377_p11), %v462_v32, %v466_v33 }
  0x42   : > { %547 = vmatprep.subr.bf16.mxu0 (!%p377_p11), %v1131_v29  ;;  %v1137_v39 = vcombine.high (!%p377_p11), %v463_v37, %v467_v38  ;;  %590 = vmatprep.subr.bf16.mxu1 (!%p377_p11), %v1133_v34  ;;  %v1136_v43 = vcombine.low (!%p377_p11), %v463_v37, %v467_v38 }
  0x43   : > { %s443_s20 = scalar_select %p442_p12, %s1274_s27, 1  ;;  %548 = vmatpush1.bf16.msra.mxu0 %v1130_v31  ;;  %591 = vmatpush1.bf16.msra.mxu1 %v1132_v35 }
  0x44   : > { %633 = vmatprep.subr.bf16.mxu0 %v1135_v36  ;;  %676 = vmatprep.subr.bf16.mxu1 %v1137_v39 }
  0x45   : > { %s1157_s21 = sshll.u32 %s443_s20, 3  ;;  %s1445_s10 = scalar_lea.vmem %s1633_s6, %s443_s20  ;;  %728 = vperm.xlu1 %1230, %v720_v40  }
  0x46   : > { %s446_s14 = scalar_lea.vmem %s1629_s2, %s1157_s21  ;;  %s1456_s1 = scalar_lea.vmem %s1634_s7, %s443_s20 }
  0x47   : > { %v1231_v42 = vld [vmem:[%s446_s14] sm:$0xff]   ;;  %s1158_s22 = sshll.u32 %s443_s20, 4  ;;  %s1123_s14 = sshll.u32 %s1642_s0, 7 }
  0x48   : > { %s451_s12 = scalar_lea.vmem %s1630_s3, %s1158_s22  ;;  %1138 = vmatmul.mubr.msk.bf16.vlgmr.msra.gmra.mrb[0].mxu0 %vm543_vm0, %v1231_v42  ;;  %1139 = vmatmul.mubr.msk.bf16.vlgmr.msra.gmra.mrb[0].mxu1 %vm543_vm0, %v1231_v42  ;;  %s1476_s20 = scalar_lea.vmem [#allocation3], %s1123_s14 }
  0x49   : > { %v486_v44 = vld [vmem:[%s451_s12] sm:$0xff]  ;;  %634 = vmatpush1.bf16.msra.mxu0 %v1134_v41  ;;  %677 = vmatpush1.bf16.msra.mxu1 %v1136_v43  ;;  %v487_v45 = vld [vmem:[%s451_s12 + $0x8] sm:$0xff]  ;;  %v470_v60 = vld [vmem:[%s1476_s20 + $0x10] sm:$0xff] }
  0x4a   : > { %665 = vmatprep.mubr.bf16.mxu0 %v1288_v25  ;;  %708 = vmatprep.mubr.bf16.mxu1 %v1288_v25  ;;  %v468_v54 = vld [vmem:[%s1476_s20] sm:$0xff]  ;;  %v469_v61 = vld [vmem:[%s1476_s20 + $0x8] sm:$0xff]  ;;  %v471_v4 = vld [vmem:[%s1476_s20 + $0x18] sm:$0xff] }
  0x4b   : > { %490 = vperm.xlu0 %1229, %v486_v44   ;;  %v476_v8 = vld [vmem:[%s1476_s20 + $0x40] sm:$0xff]  ;;  %v477_v12 = vld [vmem:[%s1476_s20 + $0x48] sm:$0xff]  ;;  %v478_v13 = vld [vmem:[%s1476_s20 + $0x50] sm:$0xff] }
  0x4c   : > { %v479_v17 = vld [vmem:[%s1476_s20 + $0x58] sm:$0xff]  ;;  %v472_v33 = vld [vmem:[%s1476_s20 + $0x20] sm:$0xff]  ;;  %v474_v40 = vld [vmem:[%s1476_s20 + $0x30] sm:$0xff] }
  0x4d   : > { %v473_v41 = vld [vmem:[%s1476_s20 + $0x28] sm:$0xff] }
  0x4f   : > { %495 = vperm.xlu0 %1229, %v487_v45  }
  0x50   : > { %1140 = vmatmul.mubr.msk.bf16.vlgmr.msra.gmra.mrb[4].mxu0 %vm543_vm0, %v1231_v42  ;;  %1141 = vmatmul.mubr.msk.bf16.vlgmr.msra.gmra.mrb[4].mxu1 %vm543_vm0, %v1231_v42 }
  0xbd   : > { %v1465_v46 = vpop.permute.xlu1 %723 }
  0xc4   : > { %v1471_v48 = vpop.permute.xlu1 %728 }
  0xca   : > { %v1467_v47 = vpop.permute.xlu0 %490 }
  0xce   : > { %v1473_v50 = vpop.permute.xlu0 %495 }
 0x11b   : > { %v581_v49 = vpop.f32.mrb[0].mxu0  ;;  %v624_v52 = vpop.f32.mrb[0].mxu1 }
 0x11c   : > { %v582_v51 = vadd.f32 %v581_v49, %v1467_v47  ;;  %v583_v53 = vpop.f32.mrb[1].mxu0  ;;  %v625_v55 = vadd.f32 %v624_v52, %v1467_v47  ;;  %v626_v57 = vpop.f32.mrb[1].mxu1  ;;  %v475_v52 = vld [vmem:[%s1476_s20 + $0x38] sm:$0xff] }
 0x11d   : > { %v584_v56 = vadd.f32 %v583_v53, %v1467_v47  ;;  %v585_v58 = vpop.f32.mrb[2].mxu0  ;;  %v627_v62 = vadd.f32 %v626_v57, %v1467_v47  ;;  %v628_v0 = vpop.f32.mrb[2].mxu1  ;;  %v480_v53 = vld [vmem:[%s1476_s20 + $0x60] sm:$0xff] }
 0x11e   : > { %v731_v59 = vmul.f32 %v1465_v46, %v582_v51  ;;  %v586_v63 = vadd.f32 %v585_v58, %v1473_v50  ;;  %v587_v1 = vpop.f32.mrb[3].mxu0  ;;  %v733_v2 = vmul.f32 %v1465_v46, %v625_v55  ;;  %v629_v5 = vadd.f32 %v628_v0, %v1473_v50  ;;  %v630_v7 = vpop.f32.mrb[3].mxu1 }
 0x11f   : > { %v732_v3 = vmul.f32 %v1465_v46, %v584_v56  ;;  %v588_v6 = vadd.f32 %v587_v1, %v1473_v50  ;;  %v734_v10 = vmul.f32 %v1465_v46, %v627_v62  ;;  %v631_v11 = vadd.f32 %v630_v7, %v1473_v50 }
 0x120   : > { %v1492_v9 = vadd.f32 %v731_v59, %v468_v54  ;;  %v739_v14 = vmul.f32 %v1471_v48, %v586_v63  ;;  %v1499_v15 = vadd.f32 %v733_v2, %v470_v60  ;;  %v741_v19 = vmul.f32 %v1471_v48, %v629_v5  ;;  %v482_v59 = vld [vmem:[%s1476_s20 + $0x70] sm:$0xff]  ;;  %v481_v60 = vld [vmem:[%s1476_s20 + $0x68] sm:$0xff]  ;;  %v483_v2 = vld [vmem:[%s1476_s20 + $0x78] sm:$0xff] }
 0x121   : > { %v1501_v16 = vadd.f32 %v732_v3, %v469_v61  ;;  %v740_v18 = vmul.f32 %v1471_v48, %v588_v6  ;;  %v1506_v20 = vadd.f32 %v734_v10, %v471_v4  ;;  %v742_v21 = vmul.f32 %v1471_v48, %v631_v11 }
 0x122   : > { %v1509_v22 = vadd.f32 %v739_v14, %v476_v8  ;;  %v1515_v25 = vadd.f32 %v741_v19, %v478_v13 }
 0x123   : > { %v1159_v23 = vpack.c.bf16 %v1501_v16, %v1492_v9  ;;  %v1513_v24 = vadd.f32 %v740_v18, %v477_v12  ;;  %v667_v26 = vpop.f32.mrb[4].mxu0  ;;  %v1160_v27 = vpack.c.bf16 %v1506_v20, %v1499_v15  ;;  %v1519_v28 = vadd.f32 %v742_v21, %v479_v17  ;;  %v710_v30 = vpop.f32.mrb[4].mxu1 }
 0x124   : > { %v668_v29 = vadd.f32 %v667_v26, %v1467_v47  ;;  %v669_v31 = vpop.f32.mrb[5].mxu0  ;;  %v711_v34 = vadd.f32 %v710_v30, %v1467_v47  ;;  %v712_v36 = vpop.f32.mrb[5].mxu1  ;;  %v1289_v12 = vmov (!%p1150_p13), 0.0  }
 0x125   : > { %811 = vst [vmem:[%s1523_s24] sm:$0xff] %v1159_v23  ;;  %v1163_v32 = vpack.c.bf16 %v1513_v24, %v1509_v22  ;;  %v670_v35 = vadd.f32 %v669_v31, %v1467_v47  ;;  %v671_v37 = vpop.f32.mrb[6].mxu0  ;;  %812 = vst [vmem:[%s1523_s24 + $0x8] sm:$0xff] %v1160_v27  ;;  %v1164_v38 = vpack.c.bf16 %v1519_v28, %v1515_v25  ;;  %v714_v44 = vpop.f32.mrb[6].mxu1 }
 0x126   : > { %v735_v39 = vmul.f32 %v1465_v46, %v668_v29  ;;  %v713_v42 = vadd.f32 %v712_v36, %v1467_v47  ;;  %v672_v43 = vadd.f32 %v671_v37, %v1473_v50  ;;  %v673_v45 = vpop.f32.mrb[7].mxu0  ;;  %v737_v49 = vmul.f32 %v1465_v46, %v711_v34  ;;  %v716_v56 = vpop.f32.mrb[7].mxu1  ;;  %823 = vst [vmem:[%s1445_s10] sm:$0x1] (!%p1150_p13), %v1289_v12 }
 0x127   : > { %815 = vst [vmem:[%s1523_s24 + $0x20] sm:$0xff] %v1163_v32  ;;  %v736_v51 = vmul.f32 %v1465_v46, %v670_v35  ;;  %v715_v54 = vadd.f32 %v714_v44, %v1473_v50  ;;  %v674_v55 = vadd.f32 %v673_v45, %v1473_v50  ;;  %816 = vst [vmem:[%s1523_s24 + $0x28] sm:$0xff] %v1164_v38 }
 0x128   : > { %v751_v47 = vadd.f32 %v735_v39, %v472_v33  ;;  %v738_v57 = vmul.f32 %v1465_v46, %v713_v42  ;;  %v743_v58 = vmul.f32 %v1471_v48, %v672_v43  ;;  %v717_v61 = vadd.f32 %v716_v56, %v1473_v50  ;;  %824 = vst [vmem:[%s1456_s1] sm:$0x1] (!%p1150_p13), %v1289_v12 }
 0x129   : > { %v753_v62 = vadd.f32 %v737_v49, %v474_v40  ;;  %v752_v63 = vadd.f32 %v736_v51, %v473_v41  ;;  %v745_v0 = vmul.f32 %v1471_v48, %v715_v54  ;;  %v744_v1 = vmul.f32 %v1471_v48, %v674_v55 }
 0x12a   : > { %v754_v3 = vadd.f32 %v738_v57, %v475_v52  ;;  %v759_v4 = vadd.f32 %v743_v58, %v480_v53  ;;  %v746_v46 = vmul.f32 %v1471_v48, %v717_v61  ;;  %822 = sbr.rel (%p1150_p13) target bundleno = 305 (0x131), region = 90 }
 0x12b   : > { %v1161_v5 = vpack.c.bf16 %v752_v63, %v751_v47  ;;  %v761_v6 = vadd.f32 %v745_v0, %v482_v59  ;;  %v760_v7 = vadd.f32 %v744_v1, %v481_v60 }
 0x12c   : > { %v1162_v8 = vpack.c.bf16 %v754_v3, %v753_v62  ;;  %v762_v10 = vadd.f32 %v746_v46, %v483_v2 }
 0x12d   : > { %813 = vst [vmem:[%s1523_s24 + $0x10] sm:$0xff] %v1161_v5  ;;  %v1165_v50 = vpack.c.bf16 %v760_v7, %v759_v4 }
 0x12e   : > { %814 = vst [vmem:[%s1523_s24 + $0x18] sm:$0xff] %v1162_v8  ;;  %v1166_v11 = vpack.c.bf16 %v762_v10, %v761_v6 }
 0x12f   : > { %817 = vst [vmem:[%s1523_s24 + $0x30] sm:$0xff] %v1165_v50 }
 0x130   : > { %818 = vst [vmem:[%s1523_s24 + $0x38] sm:$0xff] %v1166_v11 }
 0x131 PF: > { %v826_v48 = vadd.f32 %v1501_v16, %v1492_v9  ;;  %v854_v13 = vmul.f32 %v1492_v9, %v1492_v9  ;;  %v855_v14 = vmul.f32 %v1501_v16, %v1501_v16  ;;  %v856_v18 = vmul.f32 %v1499_v15, %v1499_v15  ;;  %v853_v12 = vld [vmem:[%s1456_s1] sm:$0x1]  ;;  %s1152_s15 = sshll.u32 (%p1382_p6), %s1270_s26, 3  ;;  %s1153_s16 = sshll.u32 (%p1382_p6), %s1274_s27, 5 }
 0x132   : > { %v857_v21 = vmul.f32 %v1506_v20, %v1506_v20  ;;  %v858_v27 = vmul.f32 %v751_v47, %v751_v47  ;;  %v859_v31 = vmul.f32 %v752_v63, %v752_v63  ;;  %v860_v33 = vmul.f32 %v753_v62, %v753_v62 }
 0x133   : > { %v827_v17 = vadd.f32 %v826_v48, %v1499_v15  ;;  %v870_v23 = vadd.f32 %v855_v14, %v854_v13  ;;  %v861_v35 = vmul.f32 %v754_v3, %v754_v3  ;;  %v862_v37 = vmul.f32 %v1509_v22, %v1509_v22  ;;  %v927_v14 = vld [vmem:[%s1523_s24] sm:$0xff] (%p1382_p6) }
 0x134   : > { %v863_v39 = vmul.f32 %v1513_v24, %v1513_v24  ;;  %v864_v42 = vmul.f32 %v1515_v25, %v1515_v25  ;;  %v865_v45 = vmul.f32 %v1519_v28, %v1519_v28  ;;  %v866_v51 = vmul.f32 %v759_v4, %v759_v4 }
 0x135   : > { %v828_v19 = vadd.f32 %v827_v17, %v1506_v20  ;;  %v871_v29 = vadd.f32 %v870_v23, %v856_v18  ;;  %v867_v54 = vmul.f32 %v760_v7, %v760_v7  ;;  %v868_v56 = vmul.f32 %v761_v6, %v761_v6  ;;  %v929_v17 = vld [vmem:[%s1523_s24 + $0x8] sm:$0xff] (%p1382_p6)  ;;  %v931_v18 = vld [vmem:[%s1523_s24 + $0x10] sm:$0xff] (%p1382_p6) }
 0x136   : > { %v869_v58 = vmul.f32 %v762_v10, %v762_v10  ;;  %v937_v23 = vld [vmem:[%s1523_s24 + $0x28] sm:$0xff] (%p1382_p6) }
 0x137   : > { %v829_v26 = vadd.f32 %v828_v19, %v751_v47  ;;  %v872_v9 = vadd.f32 %v871_v29, %v857_v21  ;;  %v933_v19 = vld [vmem:[%s1523_s24 + $0x18] sm:$0xff] (%p1382_p6)  ;;  %v935_v21 = vld [vmem:[%s1523_s24 + $0x20] sm:$0xff] (%p1382_p6) }
 0x139   : > { %v830_v30 = vadd.f32 %v829_v26, %v752_v63  ;;  %v873_v16 = vadd.f32 %v872_v9, %v858_v27  ;;  %v939_v26 = vld [vmem:[%s1523_s24 + $0x30] sm:$0xff] (%p1382_p6)  ;;  %v941_v27 = vld [vmem:[%s1523_s24 + $0x38] sm:$0xff] (%p1382_p6) }
 0x13b   : > { %v831_v32 = vadd.f32 %v830_v30, %v753_v62  ;;  %v874_v36 = vadd.f32 %v873_v16, %v859_v31 }
 0x13d   : > { %v832_v34 = vadd.f32 %v831_v32, %v754_v3  ;;  %v875_v38 = vadd.f32 %v874_v36, %v860_v33 }
 0x13f   : > { %v833_v15 = vadd.f32 %v832_v34, %v1509_v22  ;;  %v876_v40 = vadd.f32 %v875_v38, %v861_v35 }
 0x141   : > { %v834_v20 = vadd.f32 %v833_v15, %v1513_v24  ;;  %v877_v43 = vadd.f32 %v876_v40, %v862_v37 }
 0x143   : > { %v835_v41 = vadd.f32 %v834_v20, %v1515_v25  ;;  %v878_v49 = vadd.f32 %v877_v43, %v863_v39 }
 0x145   : > { %v836_v44 = vadd.f32 %v835_v41, %v1519_v28  ;;  %v879_v52 = vadd.f32 %v878_v49, %v864_v42 }
 0x147   : > { %v837_v22 = vadd.f32 %v836_v44, %v759_v4  ;;  %v880_v55 = vadd.f32 %v879_v52, %v865_v45 }
 0x149   : > { %v838_v53 = vadd.f32 %v837_v22, %v760_v7  ;;  %v881_v47 = vadd.f32 %v880_v55, %v866_v51 }
 0x14b   : > { %v839_v24 = vadd.f32 %v838_v53, %v761_v6  ;;  %v882_v59 = vadd.f32 %v881_v47, %v867_v54 }
 0x14d   : > { %v840_v57 = vadd.f32 %v839_v24, %v762_v10  ;;  %v883_v25 = vadd.f32 %v882_v59, %v868_v56  ;;  %v825_v10 = vld [vmem:[%s1445_s10] sm:$0x1] }
 0x14f   : > { %841 = vadd.xlane.f32.xlu0 %v840_v57  ;;  %v884_v60 = vadd.f32 %v883_v25, %v869_v58 }
 0x153   : > { %885 = vadd.xlane.f32.xlu0 %v884_v60 }
 0x1dc   : > { %v842_v61 = vpop.xlane.xlu0 %841 }
 0x1dd   : > { %v843_v28 = vrot.slane %v842_v61, 4 }
 0x1df   : > { %v844_v62 = vadd.f32 %v843_v28, %v842_v61 }
 0x1e0   : > { %v886_v63 = vpop.xlane.xlu0 %885 }
 0x1e1   : > { %v845_v0 = vrot.slane %v844_v62, 2  ;;  %v887_v1 = vrot.slane %v886_v63, 4 }
 0x1e3   : > { %v888_v2 = vadd.f32 %v887_v1, %v886_v63  ;;  %v846_v3 = vadd.f32 %v845_v0, %v844_v62 }
 0x1e5   : > { %v889_v4 = vrot.slane %v888_v2, 2  ;;  %v847_v46 = vrot.slane %v846_v3, 1 }
 0x1e7   : > { %v890_v5 = vadd.f32 %v889_v4, %v888_v2  ;;  %v848_v6 = vadd.f32 %v847_v46, %v846_v3 }
 0x1e9   : > { %1167 = vpush %v848_v6  ;;  %v891_v7 = vrot.slane %v890_v5, 1 }
 0x1eb   : > { %v892_v8 = vadd.f32 %v891_v7, %v890_v5 }
 0x1ed   : > { %1169 = vpush %v892_v8 }
 0x21a   : > { %s1168_s18 = spop %1167 }
 0x21b   : > { %v850_v50 = vstv %s1168_s18 }
 0x21c   : > { %v851_v11 = vadd.f32 %v850_v50, %v825_v10  ;;  %909 = sbr.rel (!%p1382_p6) target bundleno = 552 (0x228), region = 94 }
 0x21e   : > { %852 = vst [vmem:[%s1445_s10] sm:$0x1] %v851_v11  ;;  %s1170_s21 = spop %1169  ;;  %s912_s10 = sadd.s32 (%p1382_p6), %s1153_s16, %s1152_s15 }
 0x21f   : > { %v894_v48 = vstv %s1170_s21 }
 0x220   : > { %v895_v13 = vadd.f32 %v894_v48, %v853_v12 }
 0x222   : > { %896 = vst [vmem:[%s1456_s1] sm:$0x1] %v895_v13  ;;  %s1154_s1 = sshll.u32 (%p1382_p6), %s912_s10, 2 }
 0x223   : > { %s914_s22 = scalar_lea.vmem %s1632_s5, %s1154_s1 }
 0x224   : > { %928 = vst [vmem:[%s914_s22] sm:$0xff] %v927_v14  ;;  %930 = vst [vmem:[%s914_s22 + $0x8] sm:$0xff] %v929_v17 }
 0x225   : > { %932 = vst [vmem:[%s914_s22 + $0x10] sm:$0xff] %v931_v18  ;;  %934 = vst [vmem:[%s914_s22 + $0x18] sm:$0xff] %v933_v19 }
 0x226   : > { %936 = vst [vmem:[%s914_s22 + $0x40] sm:$0xff] %v935_v21  ;;  %938 = vst [vmem:[%s914_s22 + $0x48] sm:$0xff] %v937_v23 }
 0x227   : > { %940 = vst [vmem:[%s914_s22 + $0x50] sm:$0xff] %v939_v26  ;;  %942 = vst [vmem:[%s914_s22 + $0x58] sm:$0xff] %v941_v27 }
 0x228 PF: > { %s18_s30 = sadd.s32 1, %s1286_s30   ;;  %s1643_s24 = smov %s1266_s25 }
 0x229   : > { %p15_p0 = scmp.ge.s32.totalorder %s18_s30, 6   ;;  %s1644_s25 = smov %s1390_s17 }
 0x22a   : > { %s1645_s26 = smov %s1278_s28  ;;  %s1646_s27 = smov %s1282_s29 }
 0x22b   : > { %s1647_s28 = smov %s1650_s8  ;;  %s1648_s29 = smov %s1654_s9 }
 0x22c   :  { %17 = sbr.rel (!%p15_p0) target bundleno = 7 (0x7), region = 186 }

// kernel: _lambda_.5
= control target key start
LH: loop header
LB: loop body
LE: loop exit
PB: predicated region body
PF: predicated region fallthrough
CT: control target
= control target key end

     0   :  { %s1645_s27 = smov 0   ;;  %s1647_s28 = smov 0   ;;  %s2157_s0 = inlined_call_operand.vmem [shape: bf16[2,16,2048], index: 0, kind: input, shape index: {}]   ;;  %s2158_s1 = inlined_call_operand.vmem [shape: f32[2,16,1], index: 1, kind: input, shape index: {}]   ;;  %s2159_s2 = inlined_call_operand.vmem [shape: f32[2,16,1], index: 2, kind: input, shape index: {}]   ;;  %s2160_s3 = inlined_call_operand.vmem [shape: bf16[16,16], index: 3, kind: input, shape index: {}]   ;;  %s2161_s4 = inlined_call_operand.vmem [shape: f32[16,1], index: 4, kind: input, shape index: {}]   ;;  %s2162_s5 = inlined_call_operand.vmem [shape: bf16[16,16], index: 5, kind: input, shape index: {}]   ;;  %s2163_s6 = inlined_call_operand.vmem [shape: f32[16,1], index: 6, kind: input, shape index: {}]   ;;  %s2164_s7 = inlined_call_operand.vmem [shape: f32[16,1], index: 7, kind: input, shape index: {}]   ;;  %s2165_s8 = inlined_call_operand.vmem [shape: f32[2,16,2048], index: 8, kind: output, shape index: {}]  }
   0x1   :  { %s1649_s29 = smov 0   ;;  %s1651_s30 = smov 0  }
   0x2   :  { %s1653_s9 = smov 0   ;;  %s1655_s10 = smov 0  }
   0x3   :  { %s1657_s11 = smov 0  }
   0x4 LB: > { %s27_s12 = sadd.s32 1, %s1589_s9  ;;  %s30_s13 = sadd.s32 1, %s1593_s10  ;;  %s1597_s11 = sphi %s1657_s11, %s18_s11   ;;  %s1593_s10 = sphi %s1655_s10, %s2181_s10   ;;  %s1589_s9 = sphi %s1653_s9, %s2180_s9   ;;  %s1585_s30 = sphi %s1651_s30, %s2179_s30   ;;  %s1581_s29 = sphi %s1649_s29, %s2178_s29   ;;  %s1577_s28 = sphi %s1647_s28, %s2177_s28   ;;  %s1573_s27 = sphi %s1645_s27, %s2176_s27  }
   0x5   : > { %p28_p0 = scmp.ge.s32.totalorder %s27_s12, 2  ;;  %s1385_s14 = sadd.s32 4294967295, %s1597_s11  }
   0x6   : > { %p46_p1 = scmp.ne.s32.totalorder %s1577_s28, %s1573_s27  ;;  %p47_p2 = scmp.eq.s32.totalorder %s1597_s11, 0 }
   0x7   : > { %s2183_s12 = smov (%p28_p0, %s27_s12), 0  ;;  %s2185_s13 = smov (!%p28_p0, %s30_s13), %s1593_s10 }
   0x8   : > { %p32_p3 = scmp.ge.s32.totalorder %s2185_s13, 2  ;;  %p235_p4 = scmp.eq.s32.totalorder %s1385_s14, 3 }
   0x9   : > { %s35_s15 = ssub.s32 %s1589_s9, %s2183_s12  ;;  %p48_p5 = por %p47_p2, %p46_p1 }
   0xa   : > { %s2187_s13 = smov (%p32_p3, %s2185_s13), 0  ;;  %p1693_p6 = por %p235_p4, %p46_p1 }
   0xb   : > { %2170 = sst [smem:[#allocation4_spill]] %s2187_s13  ;;  %s34_s17 = ssub.s32 %s1593_s10, %s2187_s13 }
   0xc   : > { %s36_s18 = sor.u32 %s35_s15, %s34_s17  ;;  %s39_s19 = sadd.s32 1, %s1577_s28 }
   0xd   : > { %p37_p7 = scmp.eq.s32.totalorder %s36_s18, 0  ;;  %p1388_p8 = scmp.ge.s32.totalorder %s1597_s11, 4 }
   0xf   : > { %s1701_s20 = scalar_select %p37_p7, %s1577_s28, %s39_s19  }
  0x10   : > { %272 = sbr.rel (%p1388_p8) target bundleno = 34 (0x22), region = 36 }
  0x17   : > { %275 = sbr.rel (!%p48_p5) target bundleno = 34 (0x22), region = 40  ;;  %s277_s21 = sand.u32 (%p48_p5), 1, %s1577_s28  }
  0x18   : > { %s1390_s22 = sshll.u32 (%p48_p5), %s1589_s9, 3  ;;  %s1389_s23 = sshll.u32 (%p48_p5), %s277_s21, 6 }
  0x19   : > { %s1391_s24 = sshll.u32 (%p48_p5), %s1593_s10, 5  ;;  %s279_s17 = scalar_lea.vmem (%p48_p5), [#allocation2], %s1389_s23 }
  0x1a   : > { %s282_s25 = sadd.s32 (%p48_p5), %s1391_s24, %s1390_s22 }
  0x1b   : > { %s1392_s26 = sshll.u32 (%p48_p5), %s282_s25, 2 }
  0x1c   : > { %s284_s15 = scalar_lea.vmem (%p48_p5), %s2157_s0, %s1392_s26 }
  0x1d   : > { %v297_v0 = vld [vmem:[%s284_s15] sm:$0xff] (%p48_p5)  ;;  %v299_v1 = vld [vmem:[%s284_s15 + $0x8] sm:$0xff] (%p48_p5)  ;;  %v301_v2 = vld [vmem:[%s284_s15 + $0x10] sm:$0xff] (%p48_p5) }
  0x1e   : > { %298 = vst [vmem:[%s279_s17] sm:$0xff] %v297_v0  ;;  %300 = vst [vmem:[%s279_s17 + $0x8] sm:$0xff] %v299_v1  ;;  %v303_v3 = vld [vmem:[%s284_s15 + $0x18] sm:$0xff]  ;;  %v305_v4 = vld [vmem:[%s284_s15 + $0x40] sm:$0xff] }
  0x1f   : > { %302 = vst [vmem:[%s279_s17 + $0x10] sm:$0xff] %v301_v2  ;;  %v307_v5 = vld [vmem:[%s284_s15 + $0x48] sm:$0xff]  ;;  %304 = vst [vmem:[%s279_s17 + $0x18] sm:$0xff] %v303_v3  ;;  %v309_v6 = vld [vmem:[%s284_s15 + $0x50] sm:$0xff] }
  0x20   : > { %306 = vst [vmem:[%s279_s17 + $0x20] sm:$0xff] %v305_v4  ;;  %308 = vst [vmem:[%s279_s17 + $0x28] sm:$0xff] %v307_v5  ;;  %v311_v7 = vld [vmem:[%s284_s15 + $0x58] sm:$0xff] }
  0x21   : > { %310 = vst [vmem:[%s279_s17 + $0x30] sm:$0xff] %v309_v6  ;;  %312 = vst [vmem:[%s279_s17 + $0x38] sm:$0xff] %v311_v7 }
  0x22 PF: > { %p1393_p9 = scmp.ge.s32.totalorder %s1597_s11, 1  ;;  %p333_p10 = scmp.lt.s32.totalorder %s1597_s11, 5 }
  0x24   : > { %p334_p11 = pnand %p1393_p9, %p333_p10 }
  0x25   : > { %p383_p12 = scmp.lt.s32.totalorder (!%p334_p11), %s1585_s30, 1  ;;  %v1599_v8 = vmov (!%p334_p11), 0   ;;  %v486_v13 = vld [vmem:[%s2161_s4 + $0x8] sm:$0xff] (!%p334_p11)  ;;  %v485_v14 = vld [vmem:[%s2161_s4] sm:$0xff] (!%p334_p11)  ;;  %s340_s26 = sand.u32 (!%p334_p11), 1, %s1573_s27   ;;  %vm502_vm0 = vcmask (!%p334_p11), 130048  }
  0x26   : > { %337 = sbr.rel (%p334_p11) target bundleno = 729 (0x2d9), region = 71  ;;  %1476 = vset.pattern.permute.xlu1 (!%p334_p11), %v1599_v8  ;;  %1475 = vset.pattern.permute.xlu0 (!%p334_p11), %v1599_v8  ;;  %v977_v15 = vld [vmem:[%s2163_s6 + $0x8] sm:$0xff] (!%p334_p11)  ;;  %v976_v16 = vld [vmem:[%s2163_s6] sm:$0xff] (!%p334_p11)  ;;  %s1394_s14 = sshll.u32 (!%p334_p11), %s340_s26, 6 }
  0x27   : > { %538 = vmatprep.mubr.bf16.mxu0 (!%p334_p11), %v1599_v8  ;;  %581 = vmatprep.mubr.bf16.mxu1 (!%p334_p11), %v1599_v8  ;;  %v1169_v17 = vld [vmem:[%s2164_s7 + $0x8] sm:$0xff] (!%p334_p11)  ;;  %v1168_v18 = vld [vmem:[%s2164_s7] sm:$0xff] (!%p334_p11)  ;;  %s342_s15 = scalar_lea.vmem (!%p334_p11), [#allocation2], %s1394_s14  ;;  %s1395_s21 = sshll.u32 (!%p334_p11), %s340_s26, 7 }
  0x28   : > { %v1745_v19 = vld [vmem:[%s342_s15] sm:$0xff] (!%p334_p11)  ;;  %v1747_v20 = vld [vmem:[%s342_s15 + $0x8] sm:$0xff] (!%p334_p11)  ;;  %v1749_v21 = vld [vmem:[%s342_s15 + $0x10] sm:$0xff] (!%p334_p11)  ;;  %s2051_s27 = scalar_lea.vmem (!%p334_p11), [#allocation3], %s1395_s21 }
  0x29   : > { %v1751_v22 = vld [vmem:[%s342_s15 + $0x18] sm:$0xff] (!%p334_p11)  ;;  %v1753_v23 = vld [vmem:[%s342_s15 + $0x20] sm:$0xff] (!%p334_p11)  ;;  %v404_v24 = vunpack.c.h.bf16 (!%p334_p11), %v1745_v19  ;;  %v1756_v25 = vld [vmem:[%s342_s15 + $0x28] sm:$0xff] (!%p334_p11)  ;;  %v406_v26 = vunpack.c.h.bf16 (!%p334_p11), %v1747_v20  ;;  %v403_v27 = vunpack.c.l.bf16 (!%p334_p11), %v1745_v19  ;;  %v405_v28 = vunpack.c.l.bf16 (!%p334_p11), %v1747_v20 }
  0x2a   : > { %v1761_v29 = vld [vmem:[%s342_s15 + $0x30] sm:$0xff] (!%p334_p11)  ;;  %v407_v30 = vunpack.c.l.bf16 (!%p334_p11), %v1749_v21  ;;  %v408_v31 = vunpack.c.h.bf16 (!%p334_p11), %v1749_v21  ;;  %v1765_v32 = vld [vmem:[%s342_s15 + $0x38] sm:$0xff] (!%p334_p11)  ;;  %v409_v33 = vunpack.c.l.bf16 (!%p334_p11), %v1751_v22  ;;  %v2169_v34 = vunpack.c.h.bf16 (!%p334_p11), %v1751_v22 }
  0x2b   : > { %v412_v37 = vunpack.c.h.bf16 (!%p334_p11), %v1753_v23  ;;  %v414_v38 = vunpack.c.h.bf16 (!%p334_p11), %v1756_v25  ;;  %v411_v39 = vunpack.c.l.bf16 (!%p334_p11), %v1753_v23  ;;  %v413_v40 = vunpack.c.l.bf16 (!%p334_p11), %v1756_v25 }
  0x2c   : > { %v415_v45 = vunpack.c.l.bf16 (!%p334_p11), %v1761_v29  ;;  %v416_v46 = vunpack.c.h.bf16 (!%p334_p11), %v1761_v29  ;;  %v2168_v47 = vunpack.c.l.bf16 (!%p334_p11), %v1765_v32  ;;  %v2167_v48 = vunpack.c.h.bf16 (!%p334_p11), %v1765_v32 }
  0x2d   : > { %s384_s13 = scalar_select %p383_p12, %s1585_s30, 1 }
  0x2e   : > { %s1412_s23 = sshll.u32 (%p1693_p6), %s1585_s30, 5 }
  0x2f   : > { %s1416_s18 = sshll.u32 %s384_s13, 4 }
  0x30   : > { %s392_s22 = scalar_lea.vmem %s2159_s2, %s1416_s18  ;;  %s387_s25 = scalar_lea.vmem %s2158_s1, %s1416_s18 }
  0x31   : > { %v447_v9 = vld [vmem:[%s392_s22] sm:$0xff]  ;;  %v448_v11 = vld [vmem:[%s392_s22 + $0x8] sm:$0xff]  ;;  %s1411_s22 = sshll.u32 (%p1693_p6), %s1581_s29, 3 }
  0x32   : > { %v419_v10 = vld [vmem:[%s387_s25] sm:$0xff]  ;;  %451 = vperm.xlu1 %1476, %v447_v9   ;;  %v420_v12 = vld [vmem:[%s387_s25 + $0x8] sm:$0xff]  ;;  %s1237_s16 = sadd.s32 (%p1693_p6), %s1412_s23, %s1411_s22 }
  0x33   : > { %423 = vperm.xlu0 %1475, %v419_v10   ;;  %s1413_s24 = sshll.u32 (%p1693_p6), %s1237_s16, 3 }
  0x34   : > { %s1239_s14 = scalar_lea.vmem (%p1693_p6), %s2165_s8, %s1413_s24 }
  0x36   : > { %456 = vperm.xlu1 %1476, %v448_v11  }
  0x37   : > { %428 = vperm.xlu0 %1475, %v420_v12  }
  0x3a   : > { %494 = vperm.xlu1 %1476, %v486_v13  }
  0x3b   : > { %489 = vperm.xlu0 %1475, %v485_v14  }
  0x3e   : > { %985 = vperm.xlu1 %1476, %v977_v15  }
  0x3f   : > { %980 = vperm.xlu0 %1475, %v976_v16  }
  0x42   : > { %1177 = vperm.xlu1 %1476, %v1169_v17  }
  0x43   : > { %1172 = vperm.xlu0 %1475, %v1168_v18  }
  0xb1   : > { %v452_v35 = vpop.permute.xlu1 %451 }
  0xb2   : > { %v424_v36 = vpop.permute.xlu0 %423 }
  0xb3   : > { %v432_v41 = vmul.f32 %v424_v36, %v404_v24  ;;  %v434_v42 = vmul.f32 %v424_v36, %v406_v26  ;;  %v431_v43 = vmul.f32 %v424_v36, %v403_v27  ;;  %v433_v44 = vmul.f32 %v424_v36, %v405_v28 }
  0xb4   : > { %v436_v49 = vmul.f32 %v424_v36, %v408_v31  ;;  %v438_v50 = vmul.f32 %v424_v36, %v2169_v34  ;;  %v435_v51 = vmul.f32 %v424_v36, %v407_v30  ;;  %v437_v52 = vmul.f32 %v424_v36, %v409_v33 }
  0xb5   : > { %v460_v54 = vadd.f32 %v452_v35, %v432_v41  ;;  %v462_v55 = vadd.f32 %v452_v35, %v434_v42  ;;  %v459_v56 = vadd.f32 %v452_v35, %v431_v43  ;;  %v461_v57 = vadd.f32 %v452_v35, %v433_v44  ;;  %v457_v62 = vpop.permute.xlu1 %456  ;;  %v1477_v41 = vld [vmem:[%s2160_s3] sm:$0xff]  }
  0xb6   : > { %v429_v53 = vpop.permute.xlu0 %428  ;;  %v464_v7 = vadd.f32 %v452_v35, %v436_v49  ;;  %v466_v10 = vadd.f32 %v452_v35, %v438_v50  ;;  %v463_v42 = vadd.f32 %v452_v35, %v435_v51  ;;  %v465_v43 = vadd.f32 %v452_v35, %v437_v52 }
  0xb7   : > { %v440_v58 = vmul.f32 %v429_v53, %v412_v37  ;;  %v442_v59 = vmul.f32 %v429_v53, %v414_v38  ;;  %v439_v60 = vmul.f32 %v429_v53, %v411_v39  ;;  %v441_v61 = vmul.f32 %v429_v53, %v413_v40 }
  0xb8   : > { %v444_v63 = vmul.f32 %v429_v53, %v416_v46  ;;  %v446_v0 = vmul.f32 %v429_v53, %v2167_v48  ;;  %v443_v1 = vmul.f32 %v429_v53, %v415_v45  ;;  %v445_v2 = vmul.f32 %v429_v53, %v2168_v47 }
  0xb9   : > { %v468_v3 = vadd.f32 %v457_v62, %v440_v58  ;;  %v470_v4 = vadd.f32 %v457_v62, %v442_v59  ;;  %v467_v5 = vadd.f32 %v457_v62, %v439_v60  ;;  %v469_v6 = vadd.f32 %v457_v62, %v441_v61 }
  0xba   : > { %v472_v9 = vadd.f32 %v457_v62, %v444_v63  ;;  %v474_v11 = vadd.f32 %v457_v62, %v446_v0  ;;  %v471_v16 = vadd.f32 %v457_v62, %v443_v1  ;;  %v473_v17 = vadd.f32 %v457_v62, %v445_v2  ;;  %v1820_v35 = vpop.permute.xlu0 %489  ;;  %v1828_v62 = vpop.permute.xlu1 %494 }
  0xbb   : > { %v476_v12 = vpack.c.bf16 %v468_v3, %v460_v54  ;;  %v478_v13 = vpack.c.bf16 %v470_v4, %v462_v55  ;;  %v475_v14 = vpack.c.bf16 %v467_v5, %v459_v56  ;;  %v477_v15 = vpack.c.bf16 %v469_v6, %v461_v57 }
  0xbc   : > { %v480_v18 = vpack.c.bf16 %v472_v9, %v464_v7  ;;  %v482_v36 = vpack.c.bf16 %v474_v11, %v466_v10  ;;  %v479_v44 = vpack.c.bf16 %v471_v16, %v463_v42  ;;  %v481_v49 = vpack.c.bf16 %v473_v17, %v465_v43 }
  0xbd   : > { %506 = vmatprep.subr.bf16.mxu0 %v476_v12  ;;  %549 = vmatprep.subr.bf16.mxu1 %v478_v13 }
  0xbe   : > { %507 = vmatpush1.bf16.msra.mxu0 %v475_v14  ;;  %550 = vmatpush1.bf16.msra.mxu1 %v477_v15 }
  0xbf   : > { %592 = vmatprep.subr.bf16.mxu0 %v480_v18  ;;  %635 = vmatprep.subr.bf16.mxu1 %v482_v36 }
  0xc1   : > { %1401 = vmatmul.mubr.msk.bf16.vlgmr.msra.gmra.mrb[0].mxu0 %vm502_vm0, %v1477_v41  ;;  %1402 = vmatmul.mubr.msk.bf16.vlgmr.msra.gmra.mrb[0].mxu1 %vm502_vm0, %v1477_v41 }
  0xc2   : > { %593 = vmatpush1.bf16.msra.mxu0 %v479_v44  ;;  %636 = vmatpush1.bf16.msra.mxu1 %v481_v49 }
  0xc3   : > { %624 = vmatprep.mubr.bf16.mxu0 %v1599_v8  ;;  %667 = vmatprep.mubr.bf16.mxu1 %v1599_v8 }
  0xc9   : > { %1403 = vmatmul.mubr.msk.bf16.vlgmr.msra.gmra.mrb[4].mxu0 %vm502_vm0, %v1477_v41  ;;  %1404 = vmatmul.mubr.msk.bf16.vlgmr.msra.gmra.mrb[4].mxu1 %vm502_vm0, %v1477_v41 }
  0xca   : > { %1028 = vmatprep.mubr.bf16.mxu0 %v1599_v8  ;;  %1071 = vmatprep.mubr.bf16.mxu1 %v1599_v8 }
 0x194   : > { %v540_v50 = vpop.f32.mrb[0].mxu0  ;;  %v583_v51 = vpop.f32.mrb[0].mxu1 }
 0x195   : > { %v541_v52 = vadd.f32 %v540_v50, %v1820_v35  ;;  %v584_v53 = vadd.f32 %v583_v51, %v1820_v35  ;;  %v542_v54 = vpop.f32.mrb[1].mxu0  ;;  %v585_v55 = vpop.f32.mrb[1].mxu1 }
 0x196   : > { %v543_v56 = vadd.f32 %v542_v54, %v1820_v35  ;;  %v1826_v57 = vadd.f32 %v585_v55, %v1820_v35  ;;  %v544_v58 = vpop.f32.mrb[2].mxu0  ;;  %v587_v59 = vpop.f32.mrb[2].mxu1 }
 0x197   : > { %v694_v60 = vmul.f32 0.044715, %v541_v52  ;;  %v696_v61 = vmul.f32 0.044715, %v584_v53  ;;  %v1832_v3 = vadd.f32 %v544_v58, %v1828_v62  ;;  %v1835_v4 = vadd.f32 %v587_v59, %v1828_v62  ;;  %v546_v5 = vpop.f32.mrb[3].mxu0  ;;  %v589_v6 = vpop.f32.mrb[3].mxu1 }
 0x198   : > { %v695_v63 = vmul.f32 0.044715, %v543_v56  ;;  %v697_v0 = vmul.f32 0.044715, %v1826_v57  ;;  %v1839_v10 = vadd.f32 %v546_v5, %v1828_v62  ;;  %v1846_v43 = vadd.f32 %v589_v6, %v1828_v62 }
 0x199   : > { %v710_v1 = vmul.f32 %v694_v60, %v541_v52  ;;  %v712_v2 = vmul.f32 %v696_v61, %v584_v53  ;;  %v702_v13 = vmul.f32 0.044715, %v1832_v3  ;;  %v704_v16 = vmul.f32 0.044715, %v1835_v4 }
 0x19a   : > { %v711_v7 = vmul.f32 %v695_v63, %v543_v56  ;;  %v713_v9 = vmul.f32 %v697_v0, %v1826_v57  ;;  %v703_v55 = vmul.f32 0.044715, %v1839_v10 }
 0x19b   : > { %v726_v11 = vmul.f32 %v710_v1, %v541_v52  ;;  %v728_v12 = vmul.f32 %v712_v2, %v584_v53  ;;  %v718_v42 = vmul.f32 %v702_v13, %v1832_v3  ;;  %v720_v54 = vmul.f32 %v704_v16, %v1835_v4 }
 0x19c   : > { %v727_v14 = vmul.f32 %v711_v7, %v543_v56  ;;  %v729_v15 = vmul.f32 %v713_v9, %v1826_v57  ;;  %v626_v17 = vpop.f32.mrb[4].mxu0  ;;  %v669_v18 = vpop.f32.mrb[4].mxu1  ;;  %v719_v6 = vmul.f32 %v703_v55, %v1839_v10  ;;  %v1866_v16 = vmul.f32 0.5, %v541_v52 }
 0x19d   : > { %v742_v36 = vadd.f32 %v726_v11, %v541_v52  ;;  %v744_v41 = vadd.f32 %v728_v12, %v584_v53  ;;  %v628_v44 = vpop.f32.mrb[5].mxu0  ;;  %v671_v49 = vpop.f32.mrb[5].mxu1  ;;  %v734_v63 = vmul.f32 %v718_v42, %v1832_v3  ;;  %v736_v5 = vmul.f32 %v720_v54, %v1835_v4 }
 0x19e   : > { %v743_v50 = vadd.f32 %v727_v14, %v543_v56  ;;  %v745_v51 = vadd.f32 %v729_v15, %v1826_v57  ;;  %v630_v58 = vpop.f32.mrb[6].mxu0  ;;  %v1851_v59 = vpop.f32.mrb[6].mxu1  ;;  %v705_v11 = vmul.f32 0.044715, %v1846_v43  ;;  %v627_v12 = vadd.f32 %v626_v17, %v1820_v35 }
 0x19f   : > { %v758_v60 = vmul.f32 0.7978846, %v742_v36  ;;  %v760_v61 = vmul.f32 0.7978846, %v744_v41  ;;  %v1854_v0 = vpop.f32.mrb[7].mxu0  ;;  %v1858_v7 = vpop.f32.mrb[7].mxu1  ;;  %v750_v9 = vadd.f32 %v734_v63, %v1832_v3  ;;  %v752_v13 = vadd.f32 %v736_v5, %v1835_v4 }
 0x1a0   : > { %v759_v1 = vmul.f32 0.7978846, %v743_v50  ;;  %v761_v2 = vmul.f32 0.7978846, %v745_v51  ;;  %v735_v14 = vmul.f32 %v719_v6, %v1839_v10  ;;  %v670_v15 = vadd.f32 %v669_v18, %v1820_v35 }
 0x1a1   : > { %1479 = vtanh.f32 %v758_v60  ;;  %v766_v36 = vmul.f32 0.7978846, %v750_v9  ;;  %v721_v41 = vmul.f32 %v705_v11, %v1846_v43  ;;  %v1869_v42 = vmul.f32 0.5, %v584_v53 }
 0x1a2   : > { %1481 = vtanh.f32 %v760_v61  ;;  %v679_v50 = vmul.f32 0.5, %v543_v56  ;;  %v751_v51 = vadd.f32 %v735_v14, %v1839_v10  ;;  %v698_v54 = vmul.f32 0.044715, %v627_v12 }
 0x1a3   : > { %1483 = vtanh.f32 %v759_v1  ;;  %v768_v17 = vmul.f32 0.7978846, %v752_v13  ;;  %v737_v55 = vmul.f32 %v721_v41, %v1846_v43  ;;  %v700_v60 = vmul.f32 0.044715, %v670_v15 }
 0x1a4   : > { %1485 = vtanh.f32 %v761_v2  ;;  %v767_v61 = vmul.f32 0.7978846, %v751_v51  ;;  %v714_v18 = vmul.f32 %v698_v54, %v627_v12  ;;  %v629_v52 = vadd.f32 %v628_v44, %v1820_v35 }
 0x1a5   : > { %1487 = vtanh.f32 %v766_v36  ;;  %v753_v63 = vadd.f32 %v737_v55, %v1846_v43  ;;  %v716_v1 = vmul.f32 %v700_v60, %v670_v15  ;;  %v672_v53 = vadd.f32 %v671_v49, %v1820_v35 }
 0x1a6   : > { %v631_v56 = vadd.f32 %v630_v58, %v1828_v62  ;;  %v1878_v5 = vmul.f32 0.5, %v1826_v57  ;;  %1489 = vtanh.f32 %v767_v61  ;;  %v730_v2 = vmul.f32 %v714_v18, %v627_v12 }
 0x1a7   : > { %v699_v6 = vmul.f32 0.044715, %v629_v52  ;;  %1491 = vtanh.f32 %v768_v17  ;;  %v769_v9 = vmul.f32 0.7978846, %v753_v63  ;;  %v732_v11 = vmul.f32 %v716_v1, %v670_v15 }
 0x1a8   : > { %v701_v13 = vmul.f32 0.044715, %v672_v53  ;;  %v1881_v14 = vmul.f32 0.5, %v1832_v3  ;;  %v746_v44 = vadd.f32 %v730_v2, %v627_v12  ;;  %v706_v41 = vmul.f32 0.044715, %v631_v56 }
 0x1a9   : > { %v715_v36 = vmul.f32 %v699_v6, %v629_v52  ;;  %v1884_v35 = vmul.f32 0.5, %v1835_v4  ;;  %v687_v57 = vmul.f32 0.5, %v1839_v10  ;;  %1493 = vtanh.f32 %v769_v9 }
 0x1aa   : > { %v717_v49 = vmul.f32 %v701_v13, %v672_v53  ;;  %v689_v54 = vmul.f32 0.5, %v1846_v43  ;;  %v748_v17 = vadd.f32 %v732_v11, %v670_v15  ;;  %v722_v60 = vmul.f32 %v706_v41, %v631_v56 }
 0x1ab   : > { %v1480_v51 = vpop.eup %1479  ;;  %v731_v55 = vmul.f32 %v715_v36, %v629_v52  ;;  %v1888_v3 = vmul.f32 0.5, %v627_v12  ;;  %v762_v18 = vmul.f32 0.7978846, %v746_v44  ;;  %v674_v1 = vadd.f32 %v1851_v59, %v1828_v62 }
 0x1ac   : > { %v1482_v58 = vpop.eup %1481  ;;  %v733_v63 = vmul.f32 %v717_v49, %v672_v53  ;;  %v1892_v2 = vmul.f32 0.5, %v670_v15  ;;  %v1894_v10 = vmul.f32 0.5, %v629_v52  ;;  %v790_v13 = vadd.f32 1.0, %v1480_v51 }
 0x1ad   : > { %v1484_v61 = vpop.eup %1483  ;;  %v747_v6 = vadd.f32 %v731_v55, %v629_v52  ;;  %v1896_v43 = vmul.f32 0.5, %v672_v53  ;;  %v1898_v36 = vmul.f32 0.5, %v631_v56  ;;  %v792_v41 = vadd.f32 1.0, %v1482_v58 }
 0x1ae   : > { %v791_v4 = vadd.f32 1.0, %v1484_v61  ;;  %v1486_v9 = vpop.eup %1485  ;;  %v749_v11 = vadd.f32 %v733_v63, %v672_v53  ;;  %v764_v44 = vmul.f32 0.7978846, %v748_v17  ;;  %v738_v48 = vmul.f32 %v722_v60, %v631_v56 }
 0x1af   : > { %v1488_v12 = vpop.eup %1487  ;;  %v763_v49 = vmul.f32 0.7978846, %v747_v6  ;;  %1495 = vtanh.f32 %v762_v18  ;;  %v708_v15 = vmul.f32 0.044715, %v674_v1  ;;  %v1900_v52 = vmul.f32 0.5, %v674_v1 }
 0x1b0   : > { %v807_v47 = vmul.f32 %v791_v4, %v679_v50  ;;  %v765_v59 = vmul.f32 0.7978846, %v749_v11  ;;  %v1490_v61 = vpop.eup %1489  ;;  %v754_v34 = vadd.f32 %v738_v48, %v631_v56  ;;  %v633_v51 = vadd.f32 %v1854_v0, %v1828_v62 }
 0x1b1   : > { %1497 = vtanh.f32 %v763_v49  ;;  %v1492_v53 = vpop.eup %1491  ;;  %v793_v55 = vadd.f32 1.0, %v1486_v9  ;;  %v799_v63 = vadd.f32 1.0, %v1490_v61  ;;  %v724_v58 = vmul.f32 %v708_v15, %v674_v1 }
 0x1b2   : > { %1499 = vtanh.f32 %v765_v59  ;;  %v770_v17 = vmul.f32 0.7978846, %v754_v34  ;;  %v707_v60 = vmul.f32 0.044715, %v633_v51  ;;  %v676_v50 = vadd.f32 %v1858_v7, %v1828_v62 }
 0x1b3   : > { %1501 = vtanh.f32 %v764_v44  ;;  %v1494_v18 = vpop.eup %1493  ;;  %v1907_v4 = vmul.f32 %v790_v13, %v1866_v16  ;;  %v815_v48 = vmul.f32 %v799_v63, %v687_v57  ;;  %v740_v56 = vmul.f32 %v724_v58, %v674_v1 }
 0x1b4   : > { %v839_v6 = vmul.f32 0.044715, %v807_v47  ;;  %v798_v11 = vadd.f32 1.0, %v1488_v12  ;;  %v800_v0 = vadd.f32 1.0, %v1492_v53  ;;  %v801_v49 = vadd.f32 1.0, %v1494_v18 }
 0x1b5   : > { %v723_v9 = vmul.f32 %v707_v60, %v633_v51  ;;  %v1910_v59 = vmul.f32 %v792_v41, %v1869_v42  ;;  %v756_v44 = vadd.f32 %v740_v56, %v674_v1  ;;  %v709_v34 = vmul.f32 0.044715, %v676_v50 }
 0x1b6   : > { %v847_v15 = vmul.f32 0.044715, %v815_v48  ;;  %v809_v61 = vmul.f32 %v793_v55, %v1878_v5  ;;  %1503 = vtanh.f32 %v770_v17  ;;  %v855_v7 = vmul.f32 %v839_v6, %v807_v47 }
 0x1b7   : > { %v739_v62 = vmul.f32 %v723_v9, %v633_v51  ;;  %v817_v16 = vmul.f32 %v801_v49, %v689_v54  ;;  %v772_v13 = vmul.f32 0.7978846, %v756_v44  ;;  %v725_v57 = vmul.f32 %v709_v34, %v676_v50 }
 0x1b8   : > { %v863_v63 = vmul.f32 %v847_v15, %v815_v48  ;;  %v1914_v12 = vmul.f32 %v798_v11, %v1881_v14  ;;  %v1917_v53 = vmul.f32 %v800_v0, %v1884_v35  ;;  %v871_v41 = vmul.f32 %v855_v7, %v807_v47 }
 0x1b9   : > { %v755_v42 = vadd.f32 %v739_v62, %v633_v51  ;;  %v1496_v1 = vpop.eup %1495  ;;  %v1919_v58 = vmul.f32 0.5, %v633_v51  ;;  %v741_v60 = vmul.f32 %v725_v57, %v676_v50  ;;  %v1921_v5 = vmul.f32 0.5, %v807_v47 }
 0x1ba   : > { %v879_v55 = vmul.f32 %v863_v63, %v815_v48  ;;  %v1923_v18 = vmul.f32 0.5, %v676_v50  ;;  %v887_v56 = vadd.f32 %v871_v41, %v807_v47  ;;  %v841_v6 = vmul.f32 0.044715, %v809_v61 }
 0x1bb   : > { %v1498_v17 = vpop.eup %1497  ;;  %v771_v54 = vmul.f32 0.7978846, %v755_v42  ;;  %1505 = vtanh.f32 %v772_v13  ;;  %v757_v11 = vadd.f32 %v741_v60, %v676_v50  ;;  %v849_v0 = vmul.f32 0.044715, %v817_v16 }
 0x1bc   : > { %v1500_v14 = vpop.eup %1499  ;;  %v895_v35 = vadd.f32 %v879_v55, %v815_v48  ;;  %v795_v9 = vadd.f32 1.0, %v1498_v17  ;;  %v903_v51 = vmul.f32 0.7978846, %v887_v56  ;;  %v857_v44 = vmul.f32 %v841_v6, %v809_v61 }
 0x1bd   : > { %v1502_v49 = vpop.eup %1501  ;;  %1507 = vtanh.f32 %v771_v54  ;;  %v797_v34 = vadd.f32 1.0, %v1500_v14  ;;  %v773_v15 = vmul.f32 0.7978846, %v757_v11  ;;  %v865_v7 = vmul.f32 %v849_v0, %v817_v16 }
 0x1be   : > { %v911_v62 = vmul.f32 0.7978846, %v895_v35  ;;  %v1925_v57 = vmul.f32 0.5, %v815_v48  ;;  %1509 = vtanh.f32 %v903_v51  ;;  %v1927_v63 = vmul.f32 0.5, %v809_v61 }
 0x1bf   : > { %v873_v47 = vmul.f32 %v857_v44, %v809_v61  ;;  %v794_v42 = vadd.f32 1.0, %v1496_v1  ;;  %v796_v13 = vadd.f32 1.0, %v1502_v49  ;;  %1511 = vtanh.f32 %v773_v15 }
 0x1c0   : > { %v881_v50 = vmul.f32 %v865_v7, %v817_v16  ;;  %v1504_v41 = vpop.eup %1503  ;;  %1513 = vtanh.f32 %v911_v62  ;;  %v838_v55 = vmul.f32 0.044715, %v1907_v4  ;;  %v846_v17 = vmul.f32 0.044715, %v1914_v12 }
 0x1c1   : > { %v889_v60 = vadd.f32 %v873_v47, %v809_v61  ;;  %v1932_v54 = vmul.f32 %v795_v9, %v1894_v10  ;;  %v1935_v48 = vmul.f32 %v797_v34, %v1896_v43  ;;  %v1937_v56 = vmul.f32 0.5, %v817_v16 }
 0x1c2   : > { %v897_v6 = vadd.f32 %v881_v50, %v817_v16  ;;  %v854_v14 = vmul.f32 %v838_v55, %v1907_v4  ;;  %v862_v11 = vmul.f32 %v846_v17, %v1914_v12  ;;  %v840_v61 = vmul.f32 0.044715, %v1910_v59 }
 0x1c3   : > { %v905_v1 = vmul.f32 0.7978846, %v889_v60  ;;  %v1943_v35 = vmul.f32 %v794_v42, %v1888_v3  ;;  %v1946_v0 = vmul.f32 %v796_v13, %v1892_v2  ;;  %v848_v43 = vmul.f32 0.044715, %v1917_v53 }
 0x1c4   : > { %v913_v10 = vmul.f32 0.7978846, %v897_v6  ;;  %v802_v49 = vadd.f32 1.0, %v1504_v41  ;;  %v870_v16 = vmul.f32 %v854_v14, %v1907_v4  ;;  %v878_v9 = vmul.f32 %v862_v11, %v1914_v12 }
 0x1c5   : > { %1515 = vtanh.f32 %v905_v1  ;;  %v1506_v51 = vpop.eup %1505  ;;  %v856_v44 = vmul.f32 %v840_v61, %v1910_v59  ;;  %v864_v34 = vmul.f32 %v848_v43, %v1917_v53  ;;  %v843_v3 = vmul.f32 0.044715, %v1932_v54 }
 0x1c6   : > { %1517 = vtanh.f32 %v913_v10  ;;  %v1955_v2 = vmul.f32 0.5, %v1907_v4  ;;  %v886_v62 = vadd.f32 %v870_v16, %v1907_v4  ;;  %v894_v7 = vadd.f32 %v878_v9, %v1914_v12 }
 0x1c7   : > { %v1508_v15 = vpop.eup %1507  ;;  %v845_v47 = vmul.f32 0.044715, %v1935_v48  ;;  %v872_v13 = vmul.f32 %v856_v44, %v1910_v59  ;;  %v880_v50 = vmul.f32 %v864_v34, %v1917_v53  ;;  %v859_v41 = vmul.f32 %v843_v3, %v1932_v54 }
 0x1c8   : > { %v803_v42 = vadd.f32 1.0, %v1508_v15  ;;  %v1510_v60 = vpop.eup %1509  ;;  %v1964_v55 = vmul.f32 %v802_v49, %v1898_v36  ;;  %v902_v17 = vmul.f32 0.7978846, %v886_v62  ;;  %v910_v6 = vmul.f32 0.7978846, %v894_v7 }
 0x1c9   : > { %v861_v1 = vmul.f32 %v845_v47, %v1935_v48  ;;  %v1512_v4 = vpop.eup %1511  ;;  %v935_v11 = vadd.f32 1.0, %v1510_v60  ;;  %v888_v61 = vadd.f32 %v872_v13, %v1910_v59  ;;  %v896_v10 = vadd.f32 %v880_v50, %v1917_v53 }
 0x1ca   : > { %v1968_v14 = vmul.f32 %v803_v42, %v1919_v58  ;;  %v1514_v43 = vpop.eup %1513  ;;  %v805_v16 = vadd.f32 1.0, %v1512_v4  ;;  %1519 = vtanh.f32 %v902_v17  ;;  %v875_v9 = vmul.f32 %v859_v41, %v1932_v54 }
 0x1cb   : > { %v877_v36 = vmul.f32 %v861_v1, %v1935_v48  ;;  %v804_v49 = vadd.f32 1.0, %v1506_v51  ;;  %v943_v44 = vadd.f32 1.0, %v1514_v43  ;;  %1521 = vtanh.f32 %v910_v6 }
 0x1cc   : > { %v904_v34 = vmul.f32 0.7978846, %v888_v61  ;;  %v1975_v3 = vmul.f32 %v805_v16, %v1923_v18  ;;  %v951_v58 = vmul.f32 %v935_v11, %v1921_v5  ;;  %v912_v15 = vmul.f32 0.7978846, %v896_v10 }
 0x1cd   : > { %v851_v62 = vmul.f32 0.044715, %v1968_v14  ;;  %v959_v7 = vmul.f32 %v943_v44, %v1925_v57  ;;  %v891_v47 = vadd.f32 %v875_v9, %v1932_v54  ;;  %v893_v42 = vadd.f32 %v877_v36, %v1935_v48 }
 0x1ce   : > { %1523 = vtanh.f32 %v904_v34  ;;  %v830_v51 = vmul.f32 0.5, %v1914_v12  ;;  %v853_v18 = vmul.f32 0.044715, %v1975_v3  ;;  %v824_v57 = vmul.f32 0.5, %v1910_v59 }
 0x1cf   : > { %v1516_v13 = vpop.eup %1515  ;;  %1525 = vtanh.f32 %v912_v15  ;;  %v867_v50 = vmul.f32 %v851_v62, %v1968_v14  ;;  %v967_v5 = vpack.c.bf16 %v959_v7, %v951_v58  ;;  %v907_v17 = vmul.f32 0.7978846, %v891_v47 }
 0x1d0   : > { %v1518_v41 = vpop.eup %1517  ;;  %v937_v60 = vadd.f32 1.0, %v1516_v13  ;;  %v909_v6 = vmul.f32 0.7978846, %v893_v42  ;;  %v869_v11 = vmul.f32 %v853_v18, %v1975_v3  ;;  %v1989_v61 = vmul.f32 %v804_v49, %v1900_v52 }
 0x1d1   : > { %v945_v1 = vadd.f32 1.0, %v1518_v41  ;;  %v883_v4 = vmul.f32 %v867_v50, %v1968_v14  ;;  %996 = vmatprep.subr.bf16.mxu0 %v967_v5  ;;  %v842_v10 = vmul.f32 0.044715, %v1943_v35  ;;  %v850_v43 = vmul.f32 0.044715, %v1964_v55 }
 0x1d2   : > { %v953_v12 = vmul.f32 %v937_v60, %v1927_v63  ;;  %1527 = vtanh.f32 %v907_v17  ;;  %v885_v59 = vmul.f32 %v869_v11, %v1975_v3  ;;  %v832_v36 = vmul.f32 0.5, %v1917_v53 }
 0x1d3   : > { %v961_v16 = vmul.f32 %v945_v1, %v1937_v56  ;;  %v899_v9 = vadd.f32 %v883_v4, %v1968_v14  ;;  %1529 = vtanh.f32 %v909_v6  ;;  %v858_v52 = vmul.f32 %v842_v10, %v1943_v35 }
 0x1d4   : > { %v866_v49 = vmul.f32 %v850_v43, %v1964_v55  ;;  %v1520_v44 = vpop.eup %1519  ;;  %v901_v58 = vadd.f32 %v885_v59, %v1975_v3  ;;  %v844_v15 = vmul.f32 0.044715, %v1946_v0  ;;  %v852_v53 = vmul.f32 0.044715, %v1989_v61 }
 0x1d5   : > { %v969_v63 = vpack.c.bf16 %v961_v16, %v953_v12  ;;  %v915_v34 = vmul.f32 0.7978846, %v899_v9  ;;  %v1522_v56 = vpop.eup %1521  ;;  %v934_v62 = vadd.f32 1.0, %v1520_v44  ;;  %v874_v7 = vmul.f32 %v858_v52, %v1943_v35 }
 0x1d6   : > { %v882_v47 = vmul.f32 %v866_v49, %v1964_v55  ;;  %v942_v42 = vadd.f32 1.0, %v1522_v56  ;;  %v917_v13 = vmul.f32 0.7978846, %v901_v58  ;;  %v860_v50 = vmul.f32 %v844_v15, %v1946_v0  ;;  %v1478_v49 = vld [vmem:[%s2162_s5] sm:$0xff]  }
 0x1d7   : > { %1039 = vmatprep.subr.bf16.mxu1 %v969_v63  ;;  %1531 = vtanh.f32 %v915_v34  ;;  %v950_v41 = vmul.f32 %v934_v62, %v1955_v2  ;;  %v890_v5 = vadd.f32 %v874_v7, %v1943_v35  ;;  %v868_v17 = vmul.f32 %v852_v53, %v1989_v61 }
 0x1d8   : > { %v1524_v18 = vpop.eup %1523  ;;  %v898_v60 = vadd.f32 %v882_v47, %v1964_v55  ;;  %v958_v1 = vmul.f32 %v942_v42, %v830_v51  ;;  %1533 = vtanh.f32 %v917_v13  ;;  %v876_v11 = vmul.f32 %v860_v50, %v1946_v0 }
 0x1d9   : > { %v1526_v6 = vpop.eup %1525  ;;  %v936_v4 = vadd.f32 1.0, %v1524_v18  ;;  %v906_v10 = vmul.f32 0.7978846, %v890_v5  ;;  %v884_v16 = vmul.f32 %v868_v17, %v1989_v61  ;;  %v827_v56 = vmul.f32 0.5, %v1932_v54 }
 0x1da   : > { %v944_v12 = vadd.f32 1.0, %v1526_v6  ;;  %v914_v43 = vmul.f32 0.7978846, %v898_v60  ;;  %v966_v9 = vpack.c.bf16 %v958_v1, %v950_v41  ;;  %v892_v2 = vadd.f32 %v876_v11, %v1946_v0 }
 0x1db   : > { %v952_v59 = vmul.f32 %v936_v4, %v824_v57  ;;  %1535 = vtanh.f32 %v906_v10  ;;  %v900_v51 = vadd.f32 %v884_v16, %v1989_v61  ;;  %v835_v62 = vmul.f32 0.5, %v1968_v14 }
 0x1dc   : > { %v960_v52 = vmul.f32 %v944_v12, %v832_v36  ;;  %v1528_v44 = vpop.eup %1527  ;;  %997 = vmatpush1.bf16.msra.mxu0 %v966_v9  ;;  %1537 = vtanh.f32 %v914_v43  ;;  %v908_v63 = vmul.f32 0.7978846, %v892_v2  ;;  %v829_v42 = vmul.f32 0.5, %v1935_v48 }
 0x1dd   : > { %v1530_v34 = vpop.eup %1529  ;;  %v916_v15 = vmul.f32 0.7978846, %v900_v51  ;;  %v939_v57 = vadd.f32 1.0, %v1528_v44  ;;  %v837_v18 = vmul.f32 0.5, %v1975_v3  ;;  %v826_v4 = vmul.f32 0.5, %v1943_v35  ;;  %v2031_v44 = vpop.permute.xlu1 %985 }
 0x1de   : > { %v968_v58 = vpack.c.bf16 %v960_v52, %v952_v59  ;;  %1539 = vtanh.f32 %v908_v63  ;;  %v941_v47 = vadd.f32 1.0, %v1530_v34  ;;  %v834_v11 = vmul.f32 0.5, %v1964_v55  ;;  %v981_v55 = vpop.permute.xlu0 %980 }
 0x1df   : > { %1406 = vmatmul.mubr.msk.bf16.vlgmr.msra.gmra.mrb[8].mxu0 %vm502_vm0, %v1478_v49  ;;  %1541 = vtanh.f32 %v916_v15  ;;  %v955_v13 = vmul.f32 %v939_v57, %v827_v56  ;;  %v828_v16 = vmul.f32 0.5, %v1946_v0  ;;  %v836_v9 = vmul.f32 0.5, %v1989_v61 }
 0x1e0   : > { %1040 = vmatpush1.bf16.msra.mxu1 %v968_v58  ;;  %1114 = vmatprep.mubr.bf16.mxu0 %v1599_v8  ;;  %v957_v17 = vmul.f32 %v941_v47, %v829_v42 }
 0x1e1   : > { %v1532_v36 = vpop.eup %1531 }
 0x1e2   : > { %v947_v7 = vadd.f32 1.0, %v1532_v36  ;;  %v1534_v53 = vpop.eup %1533  ;;  %v2035_v61 = vpop.permute.xlu0 %1172 }
 0x1e3   : > { %1407 = vmatmul.mubr.msk.bf16.vlgmr.msra.gmra.mrb[8].mxu1 %vm502_vm0, %v1478_v49  ;;  %v949_v41 = vadd.f32 1.0, %v1534_v53 }
 0x1e4   : > { %v963_v50 = vmul.f32 %v947_v7, %v835_v62  ;;  %1157 = vmatprep.mubr.bf16.mxu1 %v1599_v8  ;;  %v2039_v7 = vpop.permute.xlu1 %1177 }
 0x1e5   : > { %v1536_v5 = vpop.eup %1535  ;;  %v965_v54 = vmul.f32 %v949_v41, %v837_v18 }
 0x1e6   : > { %v971_v60 = vpack.c.bf16 %v963_v50, %v955_v13  ;;  %v1538_v6 = vpop.eup %1537  ;;  %v938_v14 = vadd.f32 1.0, %v1536_v5 }
 0x1e7   : > { %v973_v1 = vpack.c.bf16 %v965_v54, %v957_v17  ;;  %v946_v48 = vadd.f32 1.0, %v1538_v6 }
 0x1e8   : > { %1082 = vmatprep.subr.bf16.mxu0 %v971_v60  ;;  %v1540_v12 = vpop.eup %1539  ;;  %v954_v3 = vmul.f32 %v938_v14, %v826_v4 }
 0x1e9   : > { %v1542_v10 = vpop.eup %1541  ;;  %1125 = vmatprep.subr.bf16.mxu1 %v973_v1  ;;  %v962_v43 = vmul.f32 %v946_v48, %v834_v11  ;;  %v940_v8 = vadd.f32 1.0, %v1540_v12 }
 0x1ea   : > { %v948_v2 = vadd.f32 1.0, %v1542_v10 }
 0x1eb   : > { %v970_v59 = vpack.c.bf16 %v962_v43, %v954_v3  ;;  %v956_v52 = vmul.f32 %v940_v8, %v828_v16 }
 0x1ec   : > { %v964_v51 = vmul.f32 %v948_v2, %v836_v9 }
 0x1ed   : > { %1083 = vmatpush1.bf16.msra.mxu0 %v970_v59 }
 0x1ee   : > { %v972_v35 = vpack.c.bf16 %v964_v51, %v956_v52 }
 0x1f0   : > { %1126 = vmatpush1.bf16.msra.mxu1 %v972_v35  ;;  %1408 = vmatmul.mubr.msk.bf16.vlgmr.msra.gmra.mrb[12].mxu0 %vm502_vm0, %v1478_v49 }
 0x1f3   : > { %1409 = vmatmul.mubr.msk.bf16.vlgmr.msra.gmra.mrb[12].mxu1 %vm502_vm0, %v1478_v49 }
 0x2b2   : > { %v1030_v63 = vpop.f32.mrb[8].mxu0 }
 0x2b3   : > { %v1031_v0 = vadd.f32 %v1030_v63, %v981_v55  ;;  %v1032_v34 = vpop.f32.mrb[9].mxu0 }
 0x2b4   : > { %v1033_v58 = vadd.f32 %v1032_v34, %v981_v55  ;;  %v1034_v15 = vpop.f32.mrb[10].mxu0 }
 0x2b5   : > { %v1180_v57 = vmul.f32 %v2035_v61, %v1031_v0  ;;  %v1035_v56 = vadd.f32 %v1034_v15, %v2031_v44  ;;  %v1036_v62 = vpop.f32.mrb[11].mxu0 }
 0x2b6   : > { %v1073_v36 = vpop.f32.mrb[8].mxu1  ;;  %v1181_v47 = vmul.f32 %v2035_v61, %v1033_v58  ;;  %v1037_v42 = vadd.f32 %v1036_v62, %v2031_v44 }
 0x2b7   : > { %v1074_v49 = vadd.f32 %v1073_v36, %v981_v55  ;;  %v1075_v53 = vpop.f32.mrb[9].mxu1  ;;  %v1196_v13 = vadd.f32 %v1180_v57, %v403_v27  ;;  %v1188_v18 = vmul.f32 %v2039_v7, %v1035_v56  ;;  %v2172_v57 = vunpack.c.h.bf16 %v1751_v22 }
 0x2b8   : > { %v1076_v50 = vadd.f32 %v1075_v53, %v981_v55  ;;  %v1077_v41 = vpop.f32.mrb[10].mxu1  ;;  %v1197_v60 = vadd.f32 %v1181_v47, %v404_v24  ;;  %v1189_v54 = vmul.f32 %v2039_v7, %v1037_v42 }
 0x2b9   : > { %v1182_v5 = vmul.f32 %v2035_v61, %v1074_v49  ;;  %v1078_v17 = vadd.f32 %v1077_v41, %v2031_v44  ;;  %v1079_v6 = vpop.f32.mrb[11].mxu1  ;;  %1212 = vst [vmem:[%s2051_s27] sm:$0xff] %v1196_v13  ;;  %v1204_v19 = vadd.f32 %v1188_v18, %v411_v39 }
 0x2ba   : > { %v1183_v27 = vmul.f32 %v2035_v61, %v1076_v50  ;;  %v1080_v24 = vadd.f32 %v1079_v6, %v2031_v44  ;;  %1213 = vst [vmem:[%s2051_s27 + $0x8] sm:$0xff] %v1197_v60  ;;  %v1205_v4 = vadd.f32 %v1189_v54, %v412_v37 }
 0x2bb   : > { %v1198_v14 = vadd.f32 %v1182_v5, %v405_v28  ;;  %v1190_v1 = vmul.f32 %v2039_v7, %v1078_v17  ;;  %1220 = vst [vmem:[%s2051_s27 + $0x40] sm:$0xff] %v1204_v19 }
 0x2bc   : > { %v1199_v11 = vadd.f32 %v1183_v27, %v406_v26  ;;  %v1191_v48 = vmul.f32 %v2039_v7, %v1080_v24  ;;  %1221 = vst [vmem:[%s2051_s27 + $0x48] sm:$0xff] %v1205_v4 }
 0x2bd   : > { %1214 = vst [vmem:[%s2051_s27 + $0x10] sm:$0xff] %v1198_v14  ;;  %v1206_v39 = vadd.f32 %v1190_v1, %v413_v40 }
 0x2be   : > { %1215 = vst [vmem:[%s2051_s27 + $0x18] sm:$0xff] %v1199_v11  ;;  %v1207_v28 = vadd.f32 %v1191_v48, %v414_v38 }
 0x2bf   : > { %1222 = vst [vmem:[%s2051_s27 + $0x50] sm:$0xff] %v1206_v39 }
 0x2c0   : > { %1223 = vst [vmem:[%s2051_s27 + $0x58] sm:$0xff] %v1207_v28  ;;  %v1252_v22 = vld [vmem:[%s2051_s27] sm:$0xff] (%p1693_p6) }
 0x2c1   : > { %v1254_v29 = vld [vmem:[%s2051_s27 + $0x8] sm:$0xff] (%p1693_p6)  ;;  %1253 = vst [vmem:[%s1239_s14] sm:$0xff] (%p1693_p6), %v1252_v22 }
 0x2c2   : > { %v1268_v53 = vld [vmem:[%s2051_s27 + $0x40] sm:$0xff] (%p1693_p6)  ;;  %1255 = vst [vmem:[%s1239_s14 + $0x8] sm:$0xff] (%p1693_p6), %v1254_v29 }
 0x2c3   : > { %v1116_v12 = vpop.f32.mrb[12].mxu0  ;;  %v1270_v42 = vld [vmem:[%s2051_s27 + $0x48] sm:$0xff] (%p1693_p6)  ;;  %1269 = vst [vmem:[%s1239_s14 + $0x80] sm:$0xff] (%p1693_p6), %v1268_v53 }
 0x2c4   : > { %v1117_v23 = vadd.f32 %v1116_v12, %v981_v55  ;;  %v1118_v37 = vpop.f32.mrb[13].mxu0  ;;  %1271 = vst [vmem:[%s1239_s14 + $0x88] sm:$0xff] (%p1693_p6), %v1270_v42 }
 0x2c5   : > { %v1119_v10 = vadd.f32 %v1118_v37, %v981_v55  ;;  %v1120_v20 = vpop.f32.mrb[14].mxu0 }
 0x2c6   : > { %v1184_v26 = vmul.f32 %v2035_v61, %v1117_v23  ;;  %v1159_v3 = vpop.f32.mrb[12].mxu1  ;;  %v1121_v43 = vadd.f32 %v1120_v20, %v2031_v44  ;;  %v1122_v8 = vpop.f32.mrb[15].mxu0  ;;  %v1272_v13 = vld [vmem:[%s2051_s27 + $0x50] sm:$0xff] (%p1693_p6) }
 0x2c7   : > { %v1160_v40 = vadd.f32 %v1159_v3, %v981_v55  ;;  %v1185_v16 = vmul.f32 %v2035_v61, %v1119_v10  ;;  %v1161_v9 = vpop.f32.mrb[13].mxu1  ;;  %v1123_v25 = vadd.f32 %v1122_v8, %v2031_v44  ;;  %v1274_v50 = vld [vmem:[%s2051_s27 + $0x58] sm:$0xff] (%p1693_p6)  ;;  %1273 = vst [vmem:[%s1239_s14 + $0x90] sm:$0xff] (%p1693_p6), %v1272_v13 }
 0x2c8   : > { %v1200_v38 = vadd.f32 %v1184_v26, %v407_v30  ;;  %v1162_v2 = vadd.f32 %v1161_v9, %v981_v55  ;;  %v1192_v59 = vmul.f32 %v2039_v7, %v1121_v43  ;;  %v1163_v52 = vpop.f32.mrb[14].mxu1  ;;  %1275 = vst [vmem:[%s1239_s14 + $0x98] sm:$0xff] (%p1693_p6), %v1274_v50 }
 0x2c9   : > { %v1186_v51 = vmul.f32 %v2035_v61, %v1160_v40  ;;  %v1201_v35 = vadd.f32 %v1185_v16, %v408_v31  ;;  %v1164_v63 = vadd.f32 %v1163_v52, %v2031_v44  ;;  %v1193_v0 = vmul.f32 %v2039_v7, %v1123_v25  ;;  %v1165_v34 = vpop.f32.mrb[15].mxu1 }
 0x2ca   : > { %1216 = vst [vmem:[%s2051_s27 + $0x20] sm:$0xff] %v1200_v38  ;;  %v1187_v30 = vmul.f32 %v2035_v61, %v1162_v2  ;;  %v1208_v55 = vadd.f32 %v1192_v59, %v415_v45  ;;  %v1166_v58 = vadd.f32 %v1165_v34, %v2031_v44  ;;  %v2173_v45 = vunpack.c.l.bf16 %v1765_v32  ;;  %1234 = sbr.rel (!%p1693_p6) target bundleno = 729 (0x2d9), region = 79 }
 0x2cb   : > { %v1202_v21 = vadd.f32 %v1186_v51, %v409_v33  ;;  %1217 = vst [vmem:[%s2051_s27 + $0x28] sm:$0xff] %v1201_v35  ;;  %v1194_v31 = vmul.f32 %v2039_v7, %v1164_v63  ;;  %v1209_v15 = vadd.f32 %v1193_v0, %v416_v46  ;;  %v2174_v33 = vunpack.c.h.bf16 %v1765_v32  ;;  %v1256_v32 = vld [vmem:[%s2051_s27 + $0x10] sm:$0xff] (%p1693_p6)  ;;  %v1258_v46 = vld [vmem:[%s2051_s27 + $0x18] sm:$0xff] (%p1693_p6) }
 0x2cc   : > { %v1203_v36 = vadd.f32 %v1187_v30, %v2172_v57  ;;  %1224 = vst [vmem:[%s2051_s27 + $0x60] sm:$0xff] %v1208_v55  ;;  %v1195_v61 = vmul.f32 %v2039_v7, %v1166_v58  ;;  %1257 = vst [vmem:[%s1239_s14 + $0x10] sm:$0xff] (%p1693_p6), %v1256_v32 }
 0x2cd   : > { %1218 = vst [vmem:[%s2051_s27 + $0x30] sm:$0xff] %v1202_v21  ;;  %v1210_v56 = vadd.f32 %v1194_v31, %v2173_v45  ;;  %1225 = vst [vmem:[%s2051_s27 + $0x68] sm:$0xff] %v1209_v15 }
 0x2ce   : > { %1219 = vst [vmem:[%s2051_s27 + $0x38] sm:$0xff] %v1203_v36  ;;  %v1211_v44 = vadd.f32 %v1195_v61, %v2174_v33  ;;  %1259 = vst [vmem:[%s1239_s14 + $0x18] sm:$0xff] (%p1693_p6), %v1258_v46 }
 0x2cf   : > { %1226 = vst [vmem:[%s2051_s27 + $0x70] sm:$0xff] %v1210_v56 }
 0x2d0   : > { %1227 = vst [vmem:[%s2051_s27 + $0x78] sm:$0xff] %v1211_v44 }
 0x2d1   : > { %v1260_v62 = vld [vmem:[%s2051_s27 + $0x20] sm:$0xff] }
 0x2d2   : > { %v1262_v7 = vld [vmem:[%s2051_s27 + $0x28] sm:$0xff]  ;;  %1261 = vst [vmem:[%s1239_s14 + $0x20] sm:$0xff] %v1260_v62 }
 0x2d3   : > { %1263 = vst [vmem:[%s1239_s14 + $0x28] sm:$0xff] %v1262_v7  ;;  %v1276_v18 = vld [vmem:[%s2051_s27 + $0x60] sm:$0xff] }
 0x2d4   : > { %v1264_v49 = vld [vmem:[%s2051_s27 + $0x30] sm:$0xff]  ;;  %v1278_v41 = vld [vmem:[%s2051_s27 + $0x68] sm:$0xff]  ;;  %1277 = vst [vmem:[%s1239_s14 + $0xa0] sm:$0xff] %v1276_v18 }
 0x2d5   : > { %v1266_v47 = vld [vmem:[%s2051_s27 + $0x38] sm:$0xff]  ;;  %1265 = vst [vmem:[%s1239_s14 + $0x30] sm:$0xff] %v1264_v49  ;;  %1279 = vst [vmem:[%s1239_s14 + $0xa8] sm:$0xff] %v1278_v41 }
 0x2d6   : > { %1267 = vst [vmem:[%s1239_s14 + $0x38] sm:$0xff] %v1266_v47  ;;  %v1280_v5 = vld [vmem:[%s2051_s27 + $0x70] sm:$0xff] }
 0x2d7   : > { %1281 = vst [vmem:[%s1239_s14 + $0xb0] sm:$0xff] %v1280_v5  ;;  %v1282_v60 = vld [vmem:[%s2051_s27 + $0x78] sm:$0xff] }
 0x2d8   : > { %1283 = vst [vmem:[%s1239_s14 + $0xb8] sm:$0xff] %v1282_v60 }
 0x2d9 PF: > { %s18_s11 = sadd.s32 1, %s1597_s11   ;;  %s2175_s15 = sld [smem:[#allocation4_spill]] }
 0x2da   : > { %p15_p13 = scmp.ge.s32.totalorder %s18_s11, 6   ;;  %s2176_s27 = smov %s1577_s28 }
 0x2db   : > { %s2177_s28 = smov %s1701_s20  ;;  %s2178_s29 = smov %s1589_s9 }
 0x2dc   : > { %s2179_s30 = smov %s1593_s10  ;;  %s2180_s9 = smov %s2183_s12 }
 0x2dd   :  { %17 = sbr.rel (!%p15_p13) target bundleno = 4 (0x4), region = 139 }
 0x2df   : > { %s2181_s10 = smov %s2175_s15 }

// kernel: _lambda_.3
= control target key start
LH: loop header
LB: loop body
LE: loop exit
PB: predicated region body
PF: predicated region fallthrough
CT: control target
= control target key end

     0   :  { %s3822_s0 = inlined_call_operand.vmem [shape: f32[2,16,2048], index: 0, kind: input, shape index: {}]   ;;  %s3823_s1 = inlined_call_operand.vmem [shape: f32[2,2,16,256], index: 1, kind: input, shape index: {}]   ;;  %s3824_s2 = inlined_call_operand.vmem [shape: f32[2,16,1], index: 2, kind: input, shape index: {}]   ;;  %s3825_s3 = inlined_call_operand.vmem [shape: f32[2,16,1], index: 3, kind: input, shape index: {}]   ;;  %s3826_s4 = inlined_call_operand.vmem [shape: bf16[16,16], index: 4, kind: input, shape index: {}]   ;;  %s3827_s5 = inlined_call_operand.vmem [shape: f32[16,1], index: 5, kind: input, shape index: {}]   ;;  %s3828_s6 = inlined_call_operand.vmem [shape: f32[16,9], index: 6, kind: input, shape index: {}]   ;;  %s3829_s7 = inlined_call_operand.vmem [shape: f32[16,1], index: 7, kind: input, shape index: {}]   ;;  %s3830_s8 = inlined_call_operand.vmem [shape: bf16[2,16,2048], index: 8, kind: output, shape index: {0}]   ;;  %s3831_s9 = inlined_call_operand.vmem [shape: f32[2,16,1], index: 9, kind: output, shape index: {1}]  }
   0x1   :  { %3857 = sst [smem:[#allocation23_spill]] %s3822_s0 }
   0x2   :  { %s2529_s30 = smov 0   ;;  %s2531_s10 = smov 0  }
   0x3   :  { %s2533_s11 = smov 0   ;;  %s2535_s12 = smov 0  }
   0x4   :  { %s2537_s13 = smov 0   ;;  %s2539_s14 = smov 0  }
   0x5   :  { %s2541_s15 = smov 0  }
   0x6 LB: > { %3858 = sst [smem:[#allocation5_spill]] %s2438_s10  ;;  %s29_s16 = sadd.s32 1, %s2450_s13  ;;  %s2458_s15 = sphi %s2541_s15, %s20_s15   ;;  %s2454_s14 = sphi %s2539_s14, %s3901_s14   ;;  %s2450_s13 = sphi %s2537_s13, %s3900_s13   ;;  %s2446_s12 = sphi %s2535_s12, %s3899_s12   ;;  %s2442_s11 = sphi %s2533_s11, %s3898_s11   ;;  %s2438_s10 = sphi %s2531_s10, %s3897_s10   ;;  %s2434_s30 = sphi %s2529_s30, %s3896_s30  }
   0x7   : > { %3859 = sst [smem:[#allocation6_spill]] %s2450_s13  ;;  %p30_p0 = scmp.ge.s32.totalorder %s29_s16, 2 }
   0x8   : > { %3860 = sst [smem:[#allocation7_spill]] %s2454_s14  ;;  %s32_s17 = sadd.s32 1, %s2454_s14 }
   0x9   : > { %s2157_s18 = sadd.s32 4294967295, %s2458_s15   ;;  %p48_p1 = scmp.ne.s32.totalorder %s2438_s10, %s2434_s30 }
   0xa   : > { %s3903_s16 = smov (%p30_p0, %s29_s16), 0  ;;  %s3905_s17 = smov (!%p30_p0, %s32_s17), %s2454_s14 }
   0xb   : > { %3861 = sst [smem:[#allocation8_spill]] %s3903_s16  ;;  %p49_p2 = scmp.eq.s32.totalorder %s2458_s15, 0 }
   0xc   : > { %p34_p3 = scmp.ge.s32.totalorder %s3905_s17, 2  ;;  %p244_p4 = scmp.eq.s32.totalorder %s2157_s18, 3 }
   0xd   : > { %s37_s19 = ssub.s32 %s2450_s13, %s3903_s16  ;;  %p50_p5 = por %p49_p2, %p48_p1 }
   0xe   : > { %s3907_s17 = smov (%p34_p3, %s3905_s17), 0  ;;  %p2577_p6 = por %p244_p4, %p48_p1 }
   0xf   : > { %3862 = sst [smem:[#allocation9_spill]] %s3907_s17  ;;  %s36_s21 = ssub.s32 %s2454_s14, %s3907_s17 }
  0x10   : > { %s38_s22 = sor.u32 %s37_s19, %s36_s21  ;;  %s41_s23 = sadd.s32 1, %s2438_s10 }
  0x11   : > { %p39_p7 = scmp.eq.s32.totalorder %s38_s22, 0  ;;  %p2160_p8 = scmp.ge.s32.totalorder %s2458_s15, 4 }
  0x13   : > { %s2585_s24 = scalar_select %p39_p7, %s2438_s10, %s41_s23  }
  0x14   : > { %304 = sbr.rel (%p2160_p8) target bundleno = 45 (0x2d), region = 32 }
  0x15   : > { %3864 = sst [smem:[#allocation10_spill]] %s2585_s24 }
  0x1b   : > { %307 = sbr.rel (!%p50_p5) target bundleno = 45 (0x2d), region = 36  ;;  %s309_s25 = sand.u32 (%p50_p5), 1, %s2438_s10  }
  0x1c   : > { %s2162_s26 = sshll.u32 (%p50_p5), %s2450_s13, 3  ;;  %s2161_s27 = sshll.u32 (%p50_p5), %s309_s25, 7 }
  0x1d   : > { %s2163_s28 = sshll.u32 (%p50_p5), %s2454_s14, 5  ;;  %s3865_s0 = sld [smem:[#allocation23_spill]] (%p50_p5) }
  0x1e   : > { %s314_s29 = sadd.s32 (%p50_p5), %s2163_s28, %s2162_s26  ;;  %s311_s21 = scalar_lea.vmem (%p50_p5), [#allocation3], %s2161_s27 }
  0x1f   : > { %s2164_s18 = sshll.u32 (%p50_p5), %s314_s29, 3 }
  0x23   : > { %s2594_s19 = scalar_lea.vmem %s3865_s0, %s2164_s18 }
  0x24   : > { %v329_v0 = vld [vmem:[%s2594_s19] sm:$0xff]  ;;  %v331_v1 = vld [vmem:[%s2594_s19 + $0x8] sm:$0xff]  ;;  %v333_v2 = vld [vmem:[%s2594_s19 + $0x10] sm:$0xff] }
  0x25   : > { %330 = vst [vmem:[%s311_s21] sm:$0xff] %v329_v0  ;;  %332 = vst [vmem:[%s311_s21 + $0x8] sm:$0xff] %v331_v1  ;;  %v335_v3 = vld [vmem:[%s2594_s19 + $0x18] sm:$0xff]  ;;  %v337_v4 = vld [vmem:[%s2594_s19 + $0x20] sm:$0xff] }
  0x26   : > { %334 = vst [vmem:[%s311_s21 + $0x10] sm:$0xff] %v333_v2  ;;  %v339_v5 = vld [vmem:[%s2594_s19 + $0x28] sm:$0xff]  ;;  %336 = vst [vmem:[%s311_s21 + $0x18] sm:$0xff] %v335_v3  ;;  %v341_v6 = vld [vmem:[%s2594_s19 + $0x30] sm:$0xff] }
  0x27   : > { %338 = vst [vmem:[%s311_s21 + $0x20] sm:$0xff] %v337_v4  ;;  %340 = vst [vmem:[%s311_s21 + $0x28] sm:$0xff] %v339_v5  ;;  %v343_v7 = vld [vmem:[%s2594_s19 + $0x38] sm:$0xff]  ;;  %v345_v8 = vld [vmem:[%s2594_s19 + $0x80] sm:$0xff] }
  0x28   : > { %342 = vst [vmem:[%s311_s21 + $0x30] sm:$0xff] %v341_v6  ;;  %344 = vst [vmem:[%s311_s21 + $0x38] sm:$0xff] %v343_v7  ;;  %v347_v9 = vld [vmem:[%s2594_s19 + $0x88] sm:$0xff]  ;;  %v349_v10 = vld [vmem:[%s2594_s19 + $0x90] sm:$0xff] }
  0x29   : > { %346 = vst [vmem:[%s311_s21 + $0x40] sm:$0xff] %v345_v8  ;;  %v351_v11 = vld [vmem:[%s2594_s19 + $0x98] sm:$0xff]  ;;  %348 = vst [vmem:[%s311_s21 + $0x48] sm:$0xff] %v347_v9  ;;  %v353_v12 = vld [vmem:[%s2594_s19 + $0xa0] sm:$0xff] }
  0x2a   : > { %350 = vst [vmem:[%s311_s21 + $0x50] sm:$0xff] %v349_v10  ;;  %352 = vst [vmem:[%s311_s21 + $0x58] sm:$0xff] %v351_v11  ;;  %v355_v13 = vld [vmem:[%s2594_s19 + $0xa8] sm:$0xff]  ;;  %v357_v14 = vld [vmem:[%s2594_s19 + $0xb0] sm:$0xff] }
  0x2b   : > { %354 = vst [vmem:[%s311_s21 + $0x60] sm:$0xff] %v353_v12  ;;  %356 = vst [vmem:[%s311_s21 + $0x68] sm:$0xff] %v355_v13  ;;  %v359_v15 = vld [vmem:[%s2594_s19 + $0xb8] sm:$0xff] }
  0x2c   : > { %358 = vst [vmem:[%s311_s21 + $0x70] sm:$0xff] %v357_v14  ;;  %360 = vst [vmem:[%s311_s21 + $0x78] sm:$0xff] %v359_v15 }
  0x2d PF: > { %p2165_p9 = scmp.ge.s32.totalorder %s2458_s15, 1  ;;  %p393_p10 = scmp.lt.s32.totalorder %s2458_s15, 5 }
  0x2f   : > { %p394_p11 = pnand %p2165_p9, %p393_p10 }
  0x31   : > { %397 = sbr.rel (%p394_p11) target bundleno = 1465 (0x5b9), region = 71 }
  0x38   : > { %p459_p12 = scmp.lt.s32.totalorder %s2446_s12, 1  ;;  %p461_p13 = scmp.lt.s32.totalorder %s2442_s11, 1  ;;  %v2460_v16 = vmov 0   ;;  %v492_v21 = vld [vmem:[%s3827_s5 + $0x8] sm:$0xff]  ;;  %v491_v22 = vld [vmem:[%s3827_s5] sm:$0xff]  ;;  %vm584_vm0 = vcmask 130048  }
  0x39   : > { %2322 = vset.pattern.permute.xlu1 %v2460_v16  ;;  %2321 = vset.pattern.permute.xlu0 %v2460_v16  ;;  %s400_s13 = sand.u32 1, %s2434_s30   ;;  %v2688_v15 = vld [vmem:[%s3826_s4] sm:$0xff]   ;;  %p2182_p0 = scmp.le.s32.totalorder %s2442_s11, 0 }
  0x3a   : > { %s460_s16 = scalar_select %p459_p12, %s2446_s12, 1  ;;  %620 = vmatprep.mubr.bf16.mxu0 %v2460_v16  ;;  %663 = vmatprep.mubr.bf16.mxu1 %v2460_v16 }
  0x3b   : > { %s462_s17 = scalar_select %p461_p13, %s2442_s11, 1 }
  0x3c   : > { %s2219_s22 = sshll.u32 %s460_s16, 4  ;;  %s2169_s23 = sshll.u32 %s460_s16, 3  ;;  %vm2462_vm1 = vmmov (!%p2182_p0), 0  }
  0x3d   : > { %s2168_s25 = sshll.u32 %s462_s17, 2  ;;  %s477_s28 = scalar_lea.vmem %s3825_s3, %s2219_s22 }
  0x3e   : > { %s2628_s19 = scalar_lea.vmem %s3831_s9, %s2219_s22  ;;  %v487_v17 = vld [vmem:[%s477_s28] sm:$0xff]  ;;  %s465_s21 = sadd.s32 %s2169_s23, %s2168_s25  ;;  %v488_v19 = vld [vmem:[%s477_s28 + $0x8] sm:$0xff] }
  0x3f   : > { %537 = vperm.xlu1 %2322, %v487_v17   ;;  %s2170_s0 = sshll.u32 %s465_s21, 3  ;;  %s472_s24 = scalar_lea.vmem %s3824_s2, %s2219_s22 }
  0x40   : > { %s2636_s10 = scalar_lea.vmem %s3823_s1, %s2170_s0  ;;  %v485_v18 = vld [vmem:[%s472_s24] sm:$0xff]  ;;  %v486_v20 = vld [vmem:[%s472_s24 + $0x8] sm:$0xff]  ;;  %s2645_s14 = sshll.u32 %s400_s13, 6 }
  0x41   : > { %511 = vperm.xlu0 %2321, %v485_v18   ;;  %s2166_s0 = sshll.u32 %s400_s13, 7  ;;  %s2771_s28 = scalar_lea.vmem [#allocation4], %s2645_s14 }
  0x42   : > { %s402_s22 = scalar_lea.vmem [#allocation3], %s2166_s0 }
  0x43   : > { %542 = vperm.xlu1 %2322, %v488_v19   ;;  %v494_v23 = vld [vmem:[%s402_s22 + $0x8] sm:$0xff]  ;;  %v496_v24 = vld [vmem:[%s402_s22 + $0x18] sm:$0xff]  ;;  %v493_v25 = vld [vmem:[%s402_s22] sm:$0xff] }
  0x44   : > { %v495_v26 = vld [vmem:[%s402_s22 + $0x10] sm:$0xff]  ;;  %v498_v27 = vld [vmem:[%s402_s22 + $0x28] sm:$0xff]  ;;  %v500_v30 = vld [vmem:[%s402_s22 + $0x38] sm:$0xff] }
  0x45   : > { %516 = vperm.xlu0 %2321, %v486_v20   ;;  %v497_v31 = vld [vmem:[%s402_s22 + $0x20] sm:$0xff]  ;;  %v499_v32 = vld [vmem:[%s402_s22 + $0x30] sm:$0xff]  ;;  %v502_v33 = vld [vmem:[%s402_s22 + $0x48] sm:$0xff] }
  0x46   : > { %v504_v35 = vld [vmem:[%s402_s22 + $0x58] sm:$0xff]  ;;  %v501_v39 = vld [vmem:[%s402_s22 + $0x40] sm:$0xff]  ;;  %v503_v40 = vld [vmem:[%s402_s22 + $0x50] sm:$0xff] }
  0x47   : > { %576 = vperm.xlu1 %2322, %v492_v21   ;;  %v506_v41 = vld [vmem:[%s402_s22 + $0x68] sm:$0xff]  ;;  %v508_v43 = vld [vmem:[%s402_s22 + $0x78] sm:$0xff]  ;;  %v505_v45 = vld [vmem:[%s402_s22 + $0x60] sm:$0xff] }
  0x48   : > { %v507_v47 = vld [vmem:[%s402_s22 + $0x70] sm:$0xff] }
  0x49   : > { %571 = vperm.xlu0 %2321, %v491_v22  }
  0xbe   : > { %v2647_v28 = vpop.permute.xlu1 %537 }
  0xc0   : > { %v2649_v29 = vpop.permute.xlu0 %511 }
  0xc1   : > { %v520_v34 = vmul.f32 %v2649_v29, %v494_v23  ;;  %v522_v36 = vmul.f32 %v2649_v29, %v496_v24  ;;  %v519_v37 = vmul.f32 %v2649_v29, %v493_v25  ;;  %v521_v38 = vmul.f32 %v2649_v29, %v495_v26 }
  0xc2   : > { %v524_v42 = vmul.f32 %v2649_v29, %v498_v27  ;;  %v526_v44 = vmul.f32 %v2649_v29, %v500_v30  ;;  %v523_v46 = vmul.f32 %v2649_v29, %v497_v31  ;;  %v525_v48 = vmul.f32 %v2649_v29, %v499_v32  ;;  %v2669_v58 = vpop.permute.xlu1 %542 }
  0xc3   : > { %v546_v50 = vadd.f32 %v2647_v28, %v520_v34  ;;  %v548_v51 = vadd.f32 %v2647_v28, %v522_v36  ;;  %v545_v52 = vadd.f32 %v2647_v28, %v519_v37  ;;  %v547_v53 = vadd.f32 %v2647_v28, %v521_v38 }
  0xc4   : > { %v2659_v49 = vpop.permute.xlu0 %516  ;;  %v550_v3 = vadd.f32 %v2647_v28, %v524_v42  ;;  %v552_v5 = vadd.f32 %v2647_v28, %v526_v44  ;;  %v549_v17 = vadd.f32 %v2647_v28, %v523_v46  ;;  %v551_v18 = vadd.f32 %v2647_v28, %v525_v48 }
  0xc5   : > { %v528_v54 = vmul.f32 %v2659_v49, %v502_v33  ;;  %v530_v55 = vmul.f32 %v2659_v49, %v504_v35  ;;  %v527_v56 = vmul.f32 %v2659_v49, %v501_v39  ;;  %v529_v57 = vmul.f32 %v2659_v49, %v503_v40 }
  0xc6   : > { %v532_v59 = vmul.f32 %v2659_v49, %v506_v41  ;;  %v534_v60 = vmul.f32 %v2659_v49, %v508_v43  ;;  %v531_v61 = vmul.f32 %v2659_v49, %v505_v45  ;;  %v533_v62 = vmul.f32 %v2659_v49, %v507_v47  ;;  %v2702_v21 = vpop.permute.xlu1 %576 }
  0xc7   : > { %v554_v63 = vadd.f32 %v2669_v58, %v528_v54  ;;  %v556_v0 = vadd.f32 %v2669_v58, %v530_v55  ;;  %v553_v1 = vadd.f32 %v2669_v58, %v527_v56  ;;  %v555_v2 = vadd.f32 %v2669_v58, %v529_v57 }
  0xc8   : > { %v558_v4 = vadd.f32 %v2669_v58, %v532_v59  ;;  %v560_v6 = vadd.f32 %v2669_v58, %v534_v60  ;;  %v557_v11 = vadd.f32 %v2669_v58, %v531_v61  ;;  %v559_v12 = vadd.f32 %v2669_v58, %v533_v62  ;;  %v2704_v22 = vpop.permute.xlu0 %571  ;;  %v780_v59 = vld [vmem:[%s2636_s10] sm:$0xff] (!%p2182_p0)  ;;  %v781_v60 = vld [vmem:[%s2636_s10 + $0x10] sm:$0xff] (!%p2182_p0) }
  0xc9   : > { %v562_v7 = vpack.c.bf16 %v554_v63, %v546_v50  ;;  %v564_v8 = vpack.c.bf16 %v556_v0, %v548_v51  ;;  %v561_v9 = vpack.c.bf16 %v553_v1, %v545_v52  ;;  %v563_v10 = vpack.c.bf16 %v555_v2, %v547_v53 }
  0xca   : > { %v566_v13 = vpack.c.bf16 %v558_v4, %v550_v3  ;;  %v568_v14 = vpack.c.bf16 %v560_v6, %v552_v5  ;;  %v565_v19 = vpack.c.bf16 %v557_v11, %v549_v17  ;;  %v567_v20 = vpack.c.bf16 %v559_v12, %v551_v18 }
  0xcb   : > { %588 = vmatprep.subr.bf16.mxu0 %v562_v7  ;;  %631 = vmatprep.subr.bf16.mxu1 %v564_v8  ;;  %v2461_v61 = vmov (!%p2182_p0), 0.0   ;;  %v782_v62 = vmul.f32 (!%p2182_p0), %v780_v59, %v2649_v29  ;;  %v783_v63 = vmul.f32 (!%p2182_p0), %v781_v60, %v2659_v49 }
  0xcc   : > { %589 = vmatpush1.bf16.msra.mxu0 %v561_v9  ;;  %632 = vmatpush1.bf16.msra.mxu1 %v563_v10 }
  0xcd   : > { %674 = vmatprep.subr.bf16.mxu0 %v566_v13  ;;  %717 = vmatprep.subr.bf16.mxu1 %v568_v14  ;;  %v784_v0 = vadd.f32 (!%p2182_p0), %v782_v62, %v2647_v28  ;;  %v785_v1 = vadd.f32 (!%p2182_p0), %v783_v63, %v2669_v58 }
  0xcf   : > { %2178 = vmatmul.mubr.msk.bf16.vlgmr.msra.gmra.mrb[0].mxu0 %vm584_vm0, %v2688_v15  ;;  %2179 = vmatmul.mubr.msk.bf16.vlgmr.msra.gmra.mrb[0].mxu1 %vm584_vm0, %v2688_v15  ;;  %v786_v2 = vpack.c.bf16 (!%p2182_p0), %v785_v1, %v784_v0 }
  0xd0   : > { %675 = vmatpush1.bf16.msra.mxu0 %v565_v19  ;;  %718 = vmatpush1.bf16.msra.mxu1 %v567_v20 }
  0xd1   : > { %706 = vmatprep.mubr.bf16.mxu0 %v2460_v16  ;;  %749 = vmatprep.mubr.bf16.mxu1 %v2460_v16 }
  0xd2   : > { %2234 = vmatprep.subr.bf16.mxu0 (!%p2182_p0), %v2461_v61 }
  0xd7   : > { %2180 = vmatmul.mubr.msk.bf16.vlgmr.msra.gmra.mrb[4].mxu0 %vm584_vm0, %v2688_v15  ;;  %2181 = vmatmul.mubr.msk.bf16.vlgmr.msra.gmra.mrb[4].mxu1 %vm584_vm0, %v2688_v15 }
  0xd8   : > { %2236 = vmatprep.mubr.msk.bf16.mxu0 (!%p2182_p0), %vm2462_vm1, %v2461_v61  ;;  %2235 = vmatpush3.bf16.msra.mxu0 (!%p2182_p0), %v786_v2 }
 0x1a2   : > { %v622_v23 = vpop.f32.mrb[0].mxu0  ;;  %v665_v24 = vpop.f32.mrb[0].mxu1 }
 0x1a3   : > { %v2707_v25 = vadd.f32 %v622_v23, %v2704_v22  ;;  %v2710_v26 = vadd.f32 %v665_v24, %v2704_v22  ;;  %v624_v27 = vpop.f32.mrb[1].mxu0  ;;  %v667_v30 = vpop.f32.mrb[1].mxu1 }
 0x1a4   : > { %v2713_v31 = vadd.f32 %v624_v27, %v2704_v22  ;;  %v2716_v32 = vadd.f32 %v667_v30, %v2704_v22  ;;  %v626_v33 = vpop.f32.mrb[2].mxu0  ;;  %v669_v34 = vpop.f32.mrb[2].mxu1 }
 0x1a5   : > { %3866 = vst [vmem:[#allocation11_spill] sm:$0xff] %v2707_v25  ;;  %760 = vst [vmem:[#allocation2 + $0x8] sm:$0xff] %v2707_v25  ;;  %v2721_v35 = vadd.f32 %v626_v33, %v2702_v21  ;;  %v2724_v36 = vadd.f32 %v669_v34, %v2702_v21  ;;  %v628_v37 = vpop.f32.mrb[3].mxu0  ;;  %v671_v38 = vpop.f32.mrb[3].mxu1  ;;  %2237 = vmatmul.mubr.msk.bf16.vlgmr.msra.gmra.mrb[0].mxu0 (!%p2182_p0), %vm584_vm0, %v2688_v15 }
 0x1a6   : > { %762 = vst [vmem:[#allocation2 + $0x18] sm:$0xff] %v2710_v26  ;;  %761 = vst [vmem:[#allocation2 + $0x10] sm:$0xff] %v2713_v31  ;;  %v2729_v39 = vadd.f32 %v628_v37, %v2702_v21  ;;  %v2732_v40 = vadd.f32 %v671_v38, %v2702_v21 }
 0x1a7   : > { %3867 = vst [vmem:[#allocation12_spill] sm:$0xff] %v2721_v35  ;;  %763 = vst [vmem:[#allocation2 + $0x20] sm:$0xff] %v2716_v32 }
 0x1a8   : > { %768 = vst [vmem:[#allocation2 + $0x58] sm:$0xff] %v2721_v35  ;;  %770 = vst [vmem:[#allocation2 + $0x68] sm:$0xff] %v2724_v36 }
 0x1a9   : > { %769 = vst [vmem:[#allocation2 + $0x60] sm:$0xff] %v2729_v39  ;;  %771 = vst [vmem:[#allocation2 + $0x70] sm:$0xff] %v2732_v40 }
 0x1aa   : > { %v708_v41 = vpop.f32.mrb[4].mxu0  ;;  %v751_v42 = vpop.f32.mrb[4].mxu1 }
 0x1ab   : > { %v2739_v43 = vadd.f32 %v708_v41, %v2704_v22  ;;  %v2742_v44 = vadd.f32 %v751_v42, %v2704_v22  ;;  %v710_v45 = vpop.f32.mrb[5].mxu0  ;;  %v753_v46 = vpop.f32.mrb[5].mxu1 }
 0x1ac   : > { %v2745_v47 = vadd.f32 %v710_v45, %v2704_v22  ;;  %v2748_v48 = vadd.f32 %v753_v46, %v2704_v22  ;;  %v712_v50 = vpop.f32.mrb[6].mxu0  ;;  %v755_v51 = vpop.f32.mrb[6].mxu1  ;;  %779 = sbr.rel (%p2182_p0) target bundleno = 638 (0x27e), region = 79 }
 0x1ad   : > { %764 = vst [vmem:[#allocation2 + $0x28] sm:$0xff] %v2739_v43  ;;  %766 = vst [vmem:[#allocation2 + $0x38] sm:$0xff] %v2742_v44  ;;  %v2753_v52 = vadd.f32 %v712_v50, %v2702_v21  ;;  %v2756_v53 = vadd.f32 %v755_v51, %v2702_v21  ;;  %v714_v54 = vpop.f32.mrb[7].mxu0  ;;  %v757_v55 = vpop.f32.mrb[7].mxu1 }
 0x1ae   : > { %765 = vst [vmem:[#allocation2 + $0x30] sm:$0xff] %v2745_v47  ;;  %767 = vst [vmem:[#allocation2 + $0x40] sm:$0xff] %v2748_v48  ;;  %v2761_v56 = vadd.f32 %v714_v54, %v2702_v21  ;;  %v2764_v57 = vadd.f32 %v757_v55, %v2702_v21 }
 0x1af   : > { %3868 = vst [vmem:[#allocation13_spill] sm:$0xff] %v2753_v52  ;;  %3869 = vst [vmem:[#allocation14_spill] sm:$0xff] %v2756_v53 }
 0x1b0   : > { %3870 = vst [vmem:[#allocation15_spill] sm:$0xff] %v2761_v56  ;;  %3871 = vst [vmem:[#allocation16_spill] sm:$0xff] %v2764_v57 }
 0x1b1   : > { %772 = vst [vmem:[#allocation2 + $0x78] sm:$0xff] %v2753_v52  ;;  %774 = vst [vmem:[#allocation2 + $0x88] sm:$0xff] %v2756_v53 }
 0x1b2   : > { %773 = vst [vmem:[#allocation2 + $0x80] sm:$0xff] %v2761_v56  ;;  %775 = vst [vmem:[#allocation2 + $0x90] sm:$0xff] %v2764_v57 }
 0x278   : > { %v821_v3 = vpop.f32.mrb[0].mxu0 }
 0x279   : > { %v822_v4 = vadd.f32 %v821_v3, %v2704_v22  ;;  %v2238_v5 = vpop.f32.mrb[1].mxu0 }
 0x27a   : > { %v824_v6 = vpop.f32.mrb[2].mxu0 }
 0x27b   : > { %828 = vst [vmem:[#allocation2] sm:$0xff] %v822_v4  ;;  %v825_v7 = vadd.f32 %v824_v6, %v2702_v21  ;;  %v2239_v8 = vpop.f32.mrb[3].mxu0 }
 0x27d   : > { %829 = vst [vmem:[#allocation2 + $0x50] sm:$0xff] %v825_v7 }
 0x27e PF: > { %p2184_p1 = scmp.ne.s32.totalorder %s2442_s11, 0 }
 0x27f   : > { %v2463_v9 = vmov (!%p2184_p1), 0.0  }
 0x280   : > { %833 = sbr.rel (%p2184_p1) target bundleno = 647 (0x287), region = 83  ;;  %834 = vst [vmem:[#allocation2] sm:$0xff] (!%p2184_p1), %v2463_v9  ;;  %835 = vst [vmem:[#allocation2 + $0x50] sm:$0xff] (!%p2184_p1), %v2463_v9 }
 0x287 PF: > { %p2185_p2 = scmp.ge.s32.totalorder %s2442_s11, 1 }
 0x288   : > { %v840_v10 = vld [vmem:[%s2636_s10 + $0x8] sm:$0xff] (!%p2185_p2)  ;;  %v841_v11 = vld [vmem:[%s2636_s10 + $0x18] sm:$0xff] (!%p2185_p2)  ;;  %v2464_v12 = vmov (!%p2185_p2), 0.0   ;;  %vm2465_vm2 = vmmov (!%p2185_p2), 0  }
 0x289   : > { %839 = sbr.rel (%p2185_p2) target bundleno = 875 (0x36b), region = 87  ;;  %2240 = vmatprep.subr.bf16.mxu0 (!%p2185_p2), %v2464_v12  ;;  %v842_v13 = vmul.f32 (!%p2185_p2), %v840_v10, %v2649_v29  ;;  %v843_v14 = vmul.f32 (!%p2185_p2), %v841_v11, %v2659_v49  ;;  %2242 = vmatprep.mubr.msk.bf16.mxu0 (!%p2185_p2), %vm2465_vm2, %v2464_v12 }
 0x28b   : > { %v844_v17 = vadd.f32 (!%p2185_p2), %v842_v13, %v2647_v28  ;;  %v845_v18 = vadd.f32 (!%p2185_p2), %v843_v14, %v2669_v58 }
 0x28d   : > { %v846_v19 = vpack.c.bf16 (!%p2185_p2), %v845_v18, %v844_v17 }
 0x28f   : > { %2241 = vmatpush3.bf16.msra.mxu0 (!%p2185_p2), %v846_v19 }
 0x292   : > { %2243 = vmatmul.mubr.msk.bf16.vlgmr.msra.gmra.mrb[0].mxu0 %vm584_vm0, %v2688_v15 }
 0x365   : > { %v881_v20 = vpop.f32.mrb[0].mxu0 }
 0x366   : > { %v882_v23 = vadd.f32 %v881_v20, %v2704_v22  ;;  %v2244_v24 = vpop.f32.mrb[1].mxu0 }
 0x367   : > { %v884_v27 = vpop.f32.mrb[2].mxu0 }
 0x368   : > { %888 = vst [vmem:[#allocation2 + $0x48] sm:$0xff] %v882_v23  ;;  %v885_v29 = vadd.f32 %v884_v27, %v2702_v21  ;;  %v2245_v49 = vpop.f32.mrb[3].mxu0 }
 0x36a   : > { %889 = vst [vmem:[#allocation2 + $0x98] sm:$0xff] %v885_v29 }
 0x36b PF: > { %p2187_p3 = scmp.ne.s32.totalorder %s2442_s11, 1 }
 0x36c   : > { %v2466_v28 = vmov (!%p2187_p3), 0.0  }
 0x36d   : > { %893 = sbr.rel (%p2187_p3) target bundleno = 884 (0x374), region = 91  ;;  %894 = vst [vmem:[#allocation2 + $0x48] sm:$0xff] (!%p2187_p3), %v2466_v28  ;;  %895 = vst [vmem:[#allocation2 + $0x98] sm:$0xff] (!%p2187_p3), %v2466_v28 }
 0x374 PF: > { %2324 = vset.pattern.permute.xlu0 %v2460_v16  ;;  %v928_v58 = vld [vmem:[%s3828_s6] sm:$0xff]  ;;  %v2467_v15 = vmov 3   ;;  %v929_v21 = vld [vmem:[%s3828_s6 + $0x8] sm:$0xff]  ;;  %v2468_v22 = vmov 6   ;;  %v2469_v30 = vmov 2   ;;  %v2470_v33 = vmov 8  }
 0x375   : > { %2325 = vset.pattern.permute.xlu1 %v2467_v15  ;;  %1037 = vperm.xlu0 %2324, %v928_v58   ;;  %v2471_v34 = vmov 5   ;;  %v2472_v37 = vmov 1   ;;  %v2473_v38 = vmov 7   ;;  %v1560_v41 = vld [vmem:[%s3829_s7 + $0x8] sm:$0xff]  ;;  %v2474_v42 = vmov 4   ;;  %v1559_v45 = vld [vmem:[%s3829_s7] sm:$0xff] }
 0x376   : > { %1061 = vperm.xlu1 %2325, %v928_v58   ;;  %v2818_v51 = vld [vmem:[#allocation2] sm:$0xff]  ;;  %v2822_v55 = vld [vmem:[#allocation2 + $0x50] sm:$0xff]  ;;  %v2834_v63 = vld [vmem:[#allocation2 + $0x8] sm:$0xff]  ;;  %s2475_s23 = smov 1   ;;  %s2476_s25 = smov 127  }
 0x377   : > { %3872 = vst [vmem:[#allocation17_spill] sm:$0xff] %v2818_v51  ;;  %3873 = vst [vmem:[#allocation18_spill] sm:$0xff] %v2822_v55  ;;  %v2836_v0 = vld [vmem:[#allocation2 + $0x58] sm:$0xff]  ;;  %v2840_v2 = vld [vmem:[#allocation2 + $0x10] sm:$0xff] }
 0x378   : > { %v2846_v6 = vld [vmem:[#allocation2 + $0x60] sm:$0xff]  ;;  %v2854_v11 = vld [vmem:[#allocation2 + $0x18] sm:$0xff]  ;;  %v2862_v18 = vld [vmem:[#allocation2 + $0x68] sm:$0xff] }
 0x379   : > { %1041 = vperm.xlu0 %2324, %v929_v21   ;;  %v2866_v23 = vld [vmem:[#allocation2 + $0x20] sm:$0xff]  ;;  %v2873_v49 = vld [vmem:[#allocation2 + $0x28] sm:$0xff] }
 0x37a   : > { %1065 = vperm.xlu1 %2325, %v929_v21  }
 0x37d   : > { %2326 = vset.pattern.permute.xlu0 %v2468_v22 }
 0x37e   : > { %2327 = vset.pattern.permute.xlu1 %v2468_v22  ;;  %1101 = vperm.xlu0 %2326, %v928_v58  }
 0x37f   : > { %1105 = vperm.xlu1 %2327, %v929_v21  }
 0x382   : > { %2329 = vset.pattern.permute.xlu0 %v2469_v30 }
 0x383   : > { %2328 = vset.pattern.permute.xlu1 %v2469_v30  ;;  %1145 = vperm.xlu0 %2329, %v929_v21  }
 0x384   : > { %1141 = vperm.xlu1 %2328, %v928_v58  }
 0x387   : > { %2331 = vset.pattern.permute.xlu0 %v2470_v33 }
 0x388   : > { %2330 = vset.pattern.permute.xlu1 %v2471_v34  ;;  %1205 = vperm.xlu0 %2331, %v928_v58   ;;  %v2886_v34 = vld [vmem:[#allocation2 + $0x70] sm:$0xff] }
 0x389   : > { %1165 = vperm.xlu1 %2330, %v928_v58   ;;  %3874 = vst [vmem:[#allocation19_spill] sm:$0xff] %v2886_v34 }
 0x38c   : > { %2334 = vset.pattern.permute.xlu0 %v2472_v37 }
 0x38d   : > { %1169 = vperm.xlu1 %2330, %v929_v21   ;;  %937 = vperm.xlu0 %2334, %v929_v21  }
 0x391   : > { %2332 = vset.pattern.permute.xlu1 %v2470_v33  ;;  %2336 = vset.pattern.permute.xlu0 %v2473_v38 }
 0x392   : > { %1209 = vperm.xlu1 %2332, %v929_v21   ;;  %997 = vperm.xlu0 %2336, %v928_v58  }
 0x396   : > { %2333 = vset.pattern.permute.xlu1 %v2472_v37  ;;  %2339 = vset.pattern.permute.xlu0 %v2460_v16 }
 0x397   : > { %932 = vperm.xlu1 %2333, %v928_v58   ;;  %1568 = vperm.xlu0 %2339, %v1560_v41  }
 0x39b   : > { %2335 = vset.pattern.permute.xlu1 %v2474_v42 }
 0x39c   : > { %957 = vperm.xlu1 %2335, %v928_v58  }
 0x3a0   : > { %961 = vperm.xlu1 %2335, %v929_v21  }
 0x3a4   : > { %2337 = vset.pattern.permute.xlu1 %v2473_v38  ;;  %v2890_v38 = vld [vmem:[#allocation2 + $0x78] sm:$0xff] }
 0x3a5   : > { %1001 = vperm.xlu1 %2337, %v929_v21   ;;  %3875 = vst [vmem:[#allocation20_spill] sm:$0xff] %v2890_v38 }
 0x3a9   : > { %2338 = vset.pattern.permute.xlu1 %v2460_v16 }
 0x3aa   : > { %1563 = vperm.xlu1 %2338, %v1559_v45  }
 0x3f4   : > { %v2814_v46 = vpop.permute.xlu0 %1037 }
 0x3f5   : > { %v2816_v50 = vpop.permute.xlu1 %1061  ;;  %v1044_v60 = vmul.f32 %v2814_v46, %v2818_v51  ;;  %v1045_v7 = vmul.f32 %v2814_v46, %v2834_v63  ;;  %v1046_v27 = vmul.f32 %v2814_v46, %v2840_v2  ;;  %v1047_v22 = vmul.f32 %v2814_v46, %v2854_v11 }
 0x3f6   : > { %v1068_v61 = vmul.f32 %v2816_v50, %v2707_v25  ;;  %v1069_v8 = vmul.f32 %v2816_v50, %v2713_v31  ;;  %v1070_v29 = vmul.f32 %v2816_v50, %v2710_v26  ;;  %v1071_v37 = vmul.f32 %v2816_v50, %v2716_v32 }
 0x3f7   : > { %v1048_v41 = vmul.f32 %v2814_v46, %v2866_v23 }
 0x3f8   : > { %v2820_v54 = vpop.permute.xlu0 %1041  ;;  %v1084_v4 = vadd.f32 %v1068_v61, %v1044_v60  ;;  %v1085_v24 = vadd.f32 %v1069_v8, %v1045_v7  ;;  %v1072_v60 = vmul.f32 %v2816_v50, %v2739_v43  ;;  %v1049_v61 = vmul.f32 %v2814_v46, %v2873_v49 }
 0x3f9   : > { %v2824_v59 = vpop.permute.xlu1 %1065  ;;  %v1052_v16 = vmul.f32 %v2820_v54, %v2822_v55  ;;  %v1053_v12 = vmul.f32 %v2820_v54, %v2836_v0  ;;  %v1054_v58 = vmul.f32 %v2820_v54, %v2846_v6  ;;  %v1056_v8 = vmul.f32 %v2820_v54, %v2886_v34 }
 0x3fa   : > { %v1076_v62 = vmul.f32 %v2824_v59, %v2721_v35  ;;  %v1077_v13 = vmul.f32 %v2824_v59, %v2729_v39  ;;  %v1078_v15 = vmul.f32 %v2824_v59, %v2724_v36 }
 0x3fc   : > { %v1092_v9 = vadd.f32 %v1076_v62, %v1052_v16  ;;  %v1093_v28 = vadd.f32 %v1077_v13, %v1053_v12  ;;  %v1086_v16 = vadd.f32 %v1070_v29, %v1046_v27  ;;  %v1055_v62 = vmul.f32 %v2820_v54, %v2862_v18  ;;  %v2924_v29 = vld [vmem:[#allocation2 + $0x30] sm:$0xff] }
 0x3fd   : > { %v2838_v1 = vpop.permute.xlu0 %1101  ;;  %v1094_v7 = vadd.f32 %v1078_v15, %v1054_v58  ;;  %v2928_v58 = vld [vmem:[#allocation2 + $0x38] sm:$0xff] }
 0x3fe   : > { %v2842_v3 = vpop.permute.xlu1 %1105  ;;  %v1108_v5 = vmul.f32 %v2838_v1, %v2840_v2  ;;  %v1109_v17 = vmul.f32 %v2838_v1, %v2854_v11  ;;  %v1110_v33 = vmul.f32 %v2838_v1, %v2866_v23  ;;  %v1111_v13 = vmul.f32 %v2838_v1, %v2873_v49 }
 0x3ff   : > { %v1116_v10 = vmul.f32 %v2842_v3, %v2846_v6  ;;  %v1117_v20 = vmul.f32 %v2842_v3, %v2862_v18  ;;  %v1118_v45 = vmul.f32 %v2842_v3, %v2886_v34  ;;  %v1074_v34 = vmul.f32 %v2816_v50, %v2742_v44 }
 0x400   : > { %v1124_v14 = vadd.f32 %v1108_v5, %v1084_v4  ;;  %v1125_v30 = vadd.f32 %v1109_v17, %v1085_v24  ;;  %v1079_v4 = vmul.f32 %v2824_v59, %v2732_v40  ;;  %v1073_v5 = vmul.f32 %v2816_v50, %v2745_v47 }
 0x401   : > { %v1132_v19 = vadd.f32 %v1116_v10, %v1092_v9  ;;  %v1133_v42 = vadd.f32 %v1117_v20, %v1093_v28  ;;  %v1080_v9 = vmul.f32 %v2824_v59, %v2753_v52  ;;  %v1057_v10 = vmul.f32 %v2820_v54, %v2890_v38  ;;  %v2926_v28 = vld [vmem:[#allocation2 + $0x80] sm:$0xff] }
 0x402   : > { %1397 = vrot.lane.b32.xlu1 %v1124_v14, %s2475_s23  ;;  %v1126_v12 = vadd.f32 %v1110_v33, %v1086_v16  ;;  %v1119_v14 = vmul.f32 %v2842_v3, %v2890_v38  ;;  %v1134_v20 = vadd.f32 %v1118_v45, %v1094_v7  ;;  %v1087_v24 = vadd.f32 %v1071_v37, %v1047_v22  ;;  %v2922_v27 = vpop.permute.xlu0 %1145  ;;  %v2937_v37 = vld [vmem:[#allocation2 + $0x40] sm:$0xff] }
 0x403   : > { %1399 = vrot.lane.b32.xlu0 %v1132_v19, %s2475_s23  ;;  %v2880_v21 = vpop.permute.xlu1 %1141  ;;  %v1081_v19 = vmul.f32 %v2824_v59, %v2761_v56  ;;  %v1095_v15 = vadd.f32 %v1079_v4, %v1055_v62  ;;  %v1120_v33 = vmul.f32 %v2842_v3, %v2926_v28  ;;  %v1113_v22 = vmul.f32 %v2838_v1, %v2928_v58  ;;  %v2942_v62 = vld [vmem:[#allocation2 + $0x88] sm:$0xff] }
 0x404   : > { %v1096_v45 = vadd.f32 %v1080_v9, %v1056_v8  ;;  %v1089_v16 = vadd.f32 %v1073_v5, %v1049_v61  ;;  %v1127_v7 = vadd.f32 %v1111_v13, %v1087_v24  ;;  %v1050_v52 = vmul.f32 %v2814_v46, %v2924_v29  ;;  %v2960_v13 = vld [vmem:[#allocation2 + $0x90] sm:$0xff] }
 0x405   : > { %v1135_v56 = vadd.f32 %v1119_v14, %v1095_v15  ;;  %v1097_v4 = vadd.f32 %v1081_v19, %v1057_v10  ;;  %v1121_v38 = vmul.f32 %v2842_v3, %v2942_v62  ;;  %v1082_v9 = vmul.f32 %v2824_v59, %v2756_v53  ;;  %3876 = vst [vmem:[#allocation21_spill] sm:$0xff] %v2960_v13  ;;  %v2970_v15 = vld [vmem:[#allocation2 + $0x48] sm:$0xff] }
 0x406   : > { %1401 = vrot.lane.b32.xlu1 %v1125_v30, %s2475_s23  ;;  %v1112_v30 = vmul.f32 %v2838_v1, %v2924_v29  ;;  %v1136_v5 = vadd.f32 %v1120_v33, %v1096_v45  ;;  %v1129_v8 = vadd.f32 %v1113_v22, %v1089_v16  ;;  %v1051_v14 = vmul.f32 %v2814_v46, %v2928_v58 }
 0x407   : > { %1403 = vrot.lane.b32.xlu0 %v1133_v42, %s2475_s23  ;;  %v1088_v42 = vadd.f32 %v1072_v60, %v1048_v41  ;;  %v1114_v41 = vmul.f32 %v2838_v1, %v2937_v37  ;;  %v1058_v60 = vmul.f32 %v2820_v54, %v2926_v28  ;;  %v2958_v10 = vpop.permute.xlu0 %1205  ;;  %v1075_v19 = vmul.f32 %v2816_v50, %v2748_v48 }
 0x408   : > { %v2918_v17 = vpop.permute.xlu1 %1165  ;;  %v1083_v24 = vmul.f32 %v2824_v59, %v2764_v57  ;;  %v1149_v46 = vmul.f32 %v2880_v21, %v2834_v63  ;;  %v1090_v22 = vadd.f32 %v1074_v34, %v1050_v52  ;;  %v1150_v59 = vmul.f32 %v2880_v21, %v2840_v2 }
 0x409   : > { %v1128_v61 = vadd.f32 %v1112_v30, %v1088_v42  ;;  %v2972_v30 = vld [vmem:[#allocation2 + $0x98] sm:$0xff]  ;;  %v1172_v33 = vmul.f32 %v2918_v17, %v2707_v25  ;;  %v1173_v50 = vmul.f32 %v2918_v17, %v2713_v31  ;;  %v1174_v42 = vmul.f32 %v2918_v17, %v2710_v26 }
 0x40a   : > { %1405 = vrot.lane.b32.xlu1 %v1126_v12, %s2475_s23  ;;  %3877 = vst [vmem:[#allocation22_spill] sm:$0xff] %v2972_v30  ;;  %v1098_v16 = vadd.f32 %v1082_v9, %v1058_v60  ;;  %v1151_v57 = vmul.f32 %v2880_v21, %v2854_v11  ;;  %v1175_v52 = vmul.f32 %v2918_v17, %v2716_v32 }
 0x40b   : > { %1407 = vrot.lane.b32.xlu0 %v1134_v20, %s2475_s23  ;;  %v1059_v20 = vmul.f32 %v2820_v54, %v2942_v62  ;;  %v1137_v54 = vadd.f32 %v1121_v38, %v1097_v4  ;;  %v1091_v34 = vadd.f32 %v1075_v19, %v1051_v14  ;;  %v1115_v38 = vmul.f32 %v2838_v1, %v2970_v15 }
 0x40c   : > { %v2940_v12 = vpop.permute.xlu1 %1169  ;;  %v1123_v4 = vmul.f32 %v2842_v3, %v2972_v30  ;;  %v1212_v60 = vmul.f32 %v2958_v10, %v2840_v2  ;;  %v1189_v25 = vadd.f32 %v1173_v50, %v1149_v46  ;;  %v1190_v14 = vadd.f32 %v1174_v42, %v1150_v59 }
 0x40d   : > { %v1099_v9 = vadd.f32 %v1083_v24, %v1059_v20  ;;  %v1214_v1 = vmul.f32 %v2958_v10, %v2866_v23  ;;  %v1180_v19 = vmul.f32 %v2940_v12, %v2721_v35  ;;  %v1181_v20 = vmul.f32 %v2940_v12, %v2729_v39 }
 0x40e   : > { %1409 = vrot.lane.b32.xlu1 %v1127_v7, %s2475_s23  ;;  %v1122_v7 = vmul.f32 %v2842_v3, %v2960_v13  ;;  %v1213_v13 = vmul.f32 %v2958_v10, %v2854_v11  ;;  %v1157_v3 = vmul.f32 %v2922_v27, %v2836_v0  ;;  %v1191_v24 = vadd.f32 %v1175_v52, %v1151_v57 }
 0x40f   : > { %1411 = vrot.lane.b32.xlu0 %v1135_v56, %s2475_s23  ;;  %v1148_v56 = vmul.f32 %v2880_v21, %v2818_v51  ;;  %v1130_v46 = vadd.f32 %v1114_v41, %v1090_v22  ;;  %v1158_v59 = vmul.f32 %v2922_v27, %v2846_v6  ;;  %v1131_v42 = vadd.f32 %v1115_v38, %v1091_v34 }
 0x410   : > { %v1138_v50 = vadd.f32 %v1122_v7, %v1098_v16  ;;  %v1229_v35 = vadd.f32 %v1213_v13, %v1189_v25  ;;  %v1152_v57 = vmul.f32 %v2880_v21, %v2866_v23  ;;  %v1176_v52 = vmul.f32 %v2918_v17, %v2739_v43 }
 0x411   : > { %v2987_v45 = vpop.permute.xlu1 %1209  ;;  %v1188_v51 = vadd.f32 %v1172_v33, %v1148_v56  ;;  %v1215_v56 = vmul.f32 %v2958_v10, %v2873_v49  ;;  %v1159_v41 = vmul.f32 %v2922_v27, %v2862_v18  ;;  %v1230_v7 = vadd.f32 %v1214_v1, %v1190_v14 }
 0x412   : > { %1413 = vrot.lane.b32.xlu1 %v1128_v61, %s2475_s23  ;;  %v3002_v61 = vpop.permute.xlu0 %937  ;;  %v1216_v34 = vmul.f32 %v2958_v10, %v2924_v29  ;;  %v1153_v38 = vmul.f32 %v2880_v21, %v2873_v49 }
 0x413   : > { %1415 = vrot.lane.b32.xlu0 %v1136_v5, %s2475_s23  ;;  %v1156_v5 = vmul.f32 %v2922_v27, %v2822_v55  ;;  %v1139_v55 = vadd.f32 %v1123_v4, %v1099_v9  ;;  %v1228_v30 = vadd.f32 %v1212_v60, %v1188_v51  ;;  %v1197_v51 = vadd.f32 %v1181_v20, %v1157_v3 }
 0x414   : > { %v3037_v25 = vadd.f32 %v1215_v56, %v1191_v24  ;;  %v1177_v4 = vmul.f32 %v2918_v17, %v2745_v47  ;;  %v1220_v9 = vmul.f32 %v2987_v45, %v2846_v6  ;;  %v1221_v3 = vmul.f32 %v2987_v45, %v2862_v18 }
 0x415   : > { %v1196_v16 = vadd.f32 %v1180_v19, %v1156_v5  ;;  %v3878_v19 = vld [vmem:[#allocation19_spill] sm:$0xff]  ;;  %v1192_v24 = vadd.f32 %v1176_v52, %v1152_v57  ;;  %v949_v57 = vmul.f32 %v3002_v61, %v2836_v0  ;;  %v950_v52 = vmul.f32 %v3002_v61, %v2846_v6 }
 0x416   : > { %1417 = vrot.lane.b32.xlu1 %v1129_v8, %s2475_s23  ;;  %v3019_v33 = vpop.permute.xlu1 %932  ;;  %v1182_v8 = vmul.f32 %v2940_v12, %v2724_v36  ;;  %v3034_v22 = vpop.permute.xlu0 %997  ;;  %v1222_v20 = vmul.f32 %v2987_v45, %v3878_v19  ;;  %v1217_v0 = vmul.f32 %v2958_v10, %v2928_v58 }
 0x417   : > { %1419 = vrot.lane.b32.xlu0 %v1137_v54, %s2475_s23  ;;  %v1183_v54 = vmul.f32 %v2940_v12, %v2732_v40  ;;  %v941_v5 = vmul.f32 %v3019_v33, %v2834_v63  ;;  %v1005_v1 = vmul.f32 %v3034_v22, %v2854_v11 }
 0x418   : > { %v1198_v13 = vadd.f32 %v1182_v8, %v1158_v59  ;;  %v1193_v8 = vadd.f32 %v1177_v4, %v1153_v38  ;;  %v1236_v38 = vadd.f32 %v1220_v9, %v1196_v16  ;;  %v1237_v4 = vadd.f32 %v1221_v3, %v1197_v51 }
 0x419   : > { %v1199_v56 = vadd.f32 %v1183_v54, %v1159_v41  ;;  %v1007_v9 = vmul.f32 %v3034_v22, %v2873_v49 }
 0x41a   : > { %1421 = vrot.lane.b32.xlu1 %v1130_v46, %s2475_s23  ;;  %v3879_v46 = vld [vmem:[#allocation20_spill] sm:$0xff] }
 0x41b   : > { %1423 = vrot.lane.b32.xlu0 %v1138_v50, %s2475_s23  ;;  %v3046_v60 = vpop.permute.xlu1 %957  ;;  %v1223_v50 = vmul.f32 %v2987_v45, %v3879_v46 }
 0x41c   : > { %v965_v14 = vmul.f32 %v3046_v60, %v2713_v31  ;;  %v942_v31 = vmul.f32 %v3019_v33, %v2840_v2  ;;  %v966_v59 = vmul.f32 %v3046_v60, %v2710_v26 }
 0x41e   : > { %1425 = vrot.lane.b32.xlu1 %v1131_v42, %s2475_s23  ;;  %v981_v63 = vadd.f32 %v965_v14, %v941_v5  ;;  %v1006_v42 = vmul.f32 %v3034_v22, %v2866_v23  ;;  %v982_v26 = vadd.f32 %v966_v59, %v942_v31  ;;  %v943_v5 = vmul.f32 %v3019_v33, %v2854_v11 }
 0x41f   : > { %1427 = vrot.lane.b32.xlu0 %v1139_v55, %s2475_s23  ;;  %v3068_v53 = vpop.permute.xlu1 %961  ;;  %v1238_v14 = vadd.f32 %v1222_v20, %v1198_v13 }
 0x420   : > { %v3076_v41 = vadd.f32 %v1005_v1, %v981_v63  ;;  %v973_v54 = vmul.f32 %v3068_v53, %v2729_v39  ;;  %v974_v55 = vmul.f32 %v3068_v53, %v2724_v36  ;;  %v1232_v1 = vadd.f32 %v1216_v34, %v1192_v24  ;;  %v3880_v34 = vld [vmem:[#allocation13_spill] sm:$0xff] }
 0x421   : > { %v3087_v63 = vadd.f32 %v1006_v42, %v982_v26  ;;  %v967_v39 = vmul.f32 %v3046_v60, %v2716_v32  ;;  %v3092_v36 = vadd.f32 %v1223_v50, %v1199_v56  ;;  %v975_v13 = vmul.f32 %v3068_v53, %v2732_v40 }
 0x422   : > { %1478 = vrot.lane.b32.xlu1 %v1228_v30, %s2476_s25  ;;  %v989_v16 = vadd.f32 %v973_v54, %v949_v57  ;;  %v990_v51 = vadd.f32 %v974_v55, %v950_v52  ;;  %v951_v30 = vmul.f32 %v3002_v61, %v2862_v18  ;;  %v944_v32 = vmul.f32 %v3019_v33, %v2866_v23 }
 0x423   : > { %1482 = vrot.lane.b32.xlu0 %v1229_v35, %s2476_s25  ;;  %v983_v3 = vadd.f32 %v967_v39, %v943_v5  ;;  %v1160_v35 = vmul.f32 %v2922_v27, %v3878_v19  ;;  %v1184_v20 = vmul.f32 %v2940_v12, %v3880_v34  ;;  %v1233_v50 = vadd.f32 %v1217_v0, %v1193_v8 }
 0x424   : > { %v3096_v11 = vpop.permute.xlu1 %1001  ;;  %v1224_v40 = vmul.f32 %v2987_v45, %v2926_v28  ;;  %v1154_v23 = vmul.f32 %v2880_v21, %v2924_v29  ;;  %v1178_v8 = vmul.f32 %v2918_v17, %v2742_v44  ;;  %v1218_v52 = vmul.f32 %v2958_v10, %v2937_v37 }
 0x425   : > { %v1013_v24 = vmul.f32 %v3096_v11, %v2862_v18  ;;  %v1014_v56 = vmul.f32 %v3096_v11, %v3878_v19  ;;  %v3117_v31 = vadd.f32 %v1007_v9, %v983_v3  ;;  %v991_v18 = vadd.f32 %v975_v13, %v951_v30 }
 0x426   : > { %1480 = vrot.lane.b32.xlu1 %v1236_v38, %s2476_s25  ;;  %v1015_v42 = vmul.f32 %v3096_v11, %v3879_v46  ;;  %v968_v54 = vmul.f32 %v3046_v60, %v2739_v43  ;;  %v1200_v26 = vadd.f32 %v1184_v20, %v1160_v35  ;;  %v952_v38 = vmul.f32 %v3002_v61, %v3878_v19 }
 0x427   : > { %1486 = vrot.lane.b32.xlu0 %v1230_v7, %s2476_s25  ;;  %v3120_v59 = vadd.f32 %v1013_v24, %v989_v16  ;;  %v3122_v57 = vadd.f32 %v1014_v56, %v990_v51  ;;  %v1008_v7 = vmul.f32 %v3034_v22, %v2924_v29  ;;  %v976_v0 = vmul.f32 %v3068_v53, %v3880_v34  ;;  %v3881_v51 = vld [vmem:[#allocation15_spill] sm:$0xff] }
 0x428   : > { %v3134_v55 = vadd.f32 %v1015_v42, %v991_v18  ;;  %v1161_v5 = vmul.f32 %v2922_v27, %v3879_v46  ;;  %v984_v39 = vadd.f32 %v968_v54, %v944_v32  ;;  %v1016_v43 = vmul.f32 %v3096_v11, %v2926_v28 }
 0x429   : > { %v945_v16 = vmul.f32 %v3019_v33, %v2873_v49  ;;  %v1185_v19 = vmul.f32 %v2940_v12, %v3881_v51  ;;  %v992_v9 = vadd.f32 %v976_v0, %v952_v38  ;;  %v1009_v3 = vmul.f32 %v3034_v22, %v2928_v58 }
 0x42a   : > { %1484 = vrot.lane.b32.xlu1 %v1237_v4, %s2476_s25  ;;  %v969_v4 = vmul.f32 %v3046_v60, %v2745_v47  ;;  %v1225_v30 = vmul.f32 %v2987_v45, %v2942_v62  ;;  %v3157_v13 = vadd.f32 %v1008_v7, %v984_v39  ;;  %v953_v49 = vmul.f32 %v3002_v61, %v3879_v46 }
 0x42b   : > { %1490 = vrot.lane.b32.xlu0 %v3037_v25, %s2476_s25  ;;  %v977_v25 = vmul.f32 %v3068_v53, %v3881_v51  ;;  %v1194_v32 = vadd.f32 %v1178_v8, %v1154_v23  ;;  %v1155_v35 = vmul.f32 %v2880_v21, %v2928_v58  ;;  %v3165_v34 = vadd.f32 %v1016_v43, %v992_v9 }
 0x42c   : > { %v985_v47 = vadd.f32 %v969_v4, %v945_v16  ;;  %v1017_v24 = vmul.f32 %v3096_v11, %v2942_v62  ;;  %v946_v56 = vmul.f32 %v3019_v33, %v2924_v29  ;;  %v970_v46 = vmul.f32 %v3046_v60, %v2742_v44 }
 0x42d   : > { %v993_v20 = vadd.f32 %v977_v25, %v953_v49  ;;  %v1179_v21 = vmul.f32 %v2918_v17, %v2748_v48  ;;  %v1219_v23 = vmul.f32 %v2958_v10, %v2970_v15  ;;  %v1240_v42 = vadd.f32 %v1224_v40, %v1200_v26  ;;  %v3883_v17 = vld [vmem:[#allocation21_spill] sm:$0xff]  ;;  %v3884_v26 = vld [vmem:[#allocation11_spill] sm:$0xff]  ;;  %v3888_v25 = vld [vmem:[#allocation22_spill] sm:$0xff] }
 0x42e   : > { %1488 = vrot.lane.b32.xlu1 %v1238_v14, %s2476_s25  ;;  %v3179_v18 = vadd.f32 %v1009_v3, %v985_v47  ;;  %v1010_v14 = vmul.f32 %v3034_v22, %v2937_v37  ;;  %v986_v29 = vadd.f32 %v970_v46, %v946_v56  ;;  %v954_v44 = vmul.f32 %v3002_v61, %v2926_v28 }
 0x42f   : > { %1494 = vrot.lane.b32.xlu0 %v1232_v1, %s2476_s25  ;;  %v3183_v8 = vadd.f32 %v1017_v24, %v993_v20  ;;  %v1201_v54 = vadd.f32 %v1185_v19, %v1161_v5  ;;  %v3882_v1 = vld [vmem:[#allocation14_spill] sm:$0xff]  ;;  %v1018_v38 = vmul.f32 %v3096_v11, %v3883_v17  ;;  %v947_v10 = vmul.f32 %v3019_v33, %v2928_v58  ;;  %v3885_v19 = vld [vmem:[#allocation17_spill] sm:$0xff] }
 0x430   : > { %v978_v7 = vmul.f32 %v3068_v53, %v3882_v1  ;;  %v1162_v37 = vmul.f32 %v2922_v27, %v2926_v28  ;;  %v3197_v40 = vadd.f32 %v1010_v14, %v986_v29  ;;  %v964_v0 = vmul.f32 %v3046_v60, %v3884_v26  ;;  %v3250_v14 = vpop.permute.xlu0 %1568 }
 0x431   : > { %v971_v5 = vmul.f32 %v3046_v60, %v2748_v48  ;;  %v1234_v39 = vadd.f32 %v1218_v52, %v1194_v32  ;;  %v1186_v58 = vmul.f32 %v2940_v12, %v3882_v1  ;;  %v1195_v16 = vadd.f32 %v1179_v21, %v1155_v35  ;;  %v3889_v32 = vld [vmem:[#allocation18_spill] sm:$0xff] }
 0x432   : > { %1492 = vrot.lane.b32.xlu1 %v3092_v36, %s2476_s25  ;;  %v994_v43 = vadd.f32 %v978_v7, %v954_v44  ;;  %v1011_v36 = vmul.f32 %v3034_v22, %v2970_v15  ;;  %v1004_v51 = vmul.f32 %v3034_v22, %v2840_v2  ;;  %v940_v9 = vmul.f32 %v3019_v33, %v3885_v19  ;;  %v3886_v2 = vld [vmem:[#allocation12_spill] sm:$0xff] }
 0x433   : > { %1498 = vrot.lane.b32.xlu0 %v1233_v50, %s2476_s25  ;;  %v987_v28 = vadd.f32 %v971_v5, %v947_v10  ;;  %v1226_v48 = vmul.f32 %v2987_v45, %v3883_v17  ;;  %v1163_v60 = vmul.f32 %v2922_v27, %v2942_v62  ;;  %v955_v52 = vmul.f32 %v3002_v61, %v2942_v62  ;;  %v3887_v33 = vld [vmem:[#allocation16_spill] sm:$0xff] }
 0x434   : > { %v3216_v50 = vadd.f32 %v1018_v38, %v994_v43  ;;  %v980_v4 = vadd.f32 %v964_v0, %v940_v9  ;;  %v972_v22 = vmul.f32 %v3068_v53, %v3886_v2  ;;  %v979_v3 = vmul.f32 %v3068_v53, %v3887_v33 }
 0x435   : > { %v3221_v15 = vadd.f32 %v1011_v36, %v987_v28  ;;  %v1241_v49 = vadd.f32 %v1225_v30, %v1201_v54  ;;  %v1012_v27 = vmul.f32 %v3096_v11, %v2846_v6  ;;  %v1019_v62 = vmul.f32 %v3096_v11, %v3888_v25 }
 0x436   : > { %1496 = vrot.lane.b32.xlu1 %v1240_v42, %s2476_s25  ;;  %v948_v35 = vmul.f32 %v3002_v61, %v3889_v32  ;;  %v1202_v47 = vadd.f32 %v1186_v58, %v1162_v37  ;;  %v1187_v20 = vmul.f32 %v2940_v12, %v3887_v33  ;;  %v3236_v24 = vadd.f32 %v1004_v51, %v980_v4 }
 0x437   : > { %1502 = vrot.lane.b32.xlu0 %v1234_v39, %s2476_s25  ;;  %v995_v56 = vadd.f32 %v979_v3, %v955_v52  ;;  %v1235_v53 = vadd.f32 %v1219_v23, %v1195_v16  ;;  %v1227_v61 = vmul.f32 %v2987_v45, %v3888_v25  ;;  %v3248_v23 = vpop.permute.xlu1 %1563  ;;  %v1244_v42 = vlaneseq }
 0x438   : > { %v988_v46 = vadd.f32 %v972_v22, %v948_v35  ;;  %v1242_v11 = vadd.f32 %v1226_v48, %v1202_v47  ;;  %v1203_v21 = vadd.f32 %v1187_v20, %v1163_v60  ;;  %v2477_v58 = vmov 0.0  }
 0x439   : > { %v3239_v30 = vadd.f32 %v1019_v62, %v995_v56  ;;  %v3256_v54 = vand.u32 127, %v1244_v42 }
 0x43a   : > { %1500 = vrot.lane.b32.xlu1 %v1241_v49, %s2476_s25  ;;  %v3242_v6 = vadd.f32 %v1012_v27, %v988_v46  ;;  %v1243_v12 = vadd.f32 %v1227_v61, %v1203_v21 }
 0x43b   : > { %1506 = vrot.lane.b32.xlu0 %v1235_v53, %s2476_s25  ;;  %v3263_v45 = vadd.s32 512, %v3256_v54  ;;  %v3271_v37 = vadd.s32 640, %v3256_v54  ;;  %v3276_v0 = vadd.s32 768, %v3256_v54  ;;  %vm1429_vm4 = vcmp.lt.s32.totalorder %v3256_v54, 1 }
 0x43c   : > { %v3293_v51 = vadd.s32 896, %v3256_v54  ;;  %v1246_v9 = vadd.s32 128, %v3256_v54  ;;  %v1247_v60 = vadd.s32 256, %v3256_v54  ;;  %v1248_v52 = vadd.s32 384, %v3256_v54 }
 0x43d   : > { %v1285_v10 = vand.u32 127, %v3263_v45  ;;  %v1292_v39 = vand.u32 127, %v3271_v37  ;;  %v1299_v16 = vand.u32 127, %v3276_v0  ;;  %vm1349_vm7 = vcmp.ne.s32.totalorder %v3256_v54, 0 }
 0x43e   : > { %1504 = vrot.lane.b32.xlu1 %v1242_v11, %s2476_s25  ;;  %v1306_v3 = vand.u32 127, %v3293_v51  ;;  %v1264_v27 = vand.u32 127, %v1246_v9  ;;  %v1271_v32 = vand.u32 127, %v1247_v60  ;;  %v1278_v35 = vand.u32 127, %v1248_v52 }
 0x43f   : > { %vm1353_vm3 = vcmp.ne.s32.totalorder %v1285_v10, 0  ;;  %vm1354_vm5 = vcmp.ne.s32.totalorder %v1292_v39, 0  ;;  %vm1355_vm6 = vcmp.ne.s32.totalorder %v1299_v16, 0  ;;  %v2188_v61 = vsel %vm1349_vm7, 1.0, %v2477_v58 }
 0x440   : > { %v3284_v43 = vsel %vm1353_vm3, 1.0, %v2477_v58  ;;  %v3303_v4 = vsel %vm1354_vm5, 1.0, %v2477_v58  ;;  %v2194_v62 = vsel %vm1355_vm6, 1.0, %v2477_v58  ;;  %vm1356_vm8 = vcmp.ne.s32.totalorder %v1306_v3, 0 }
 0x441   : > { %vm1350_vm9 = vcmp.ne.s32.totalorder %v1264_v27, 0  ;;  %vm3329_vm10 = vcmp.ne.s32.totalorder %v1271_v32, 0  ;;  %vm1352_vm11 = vcmp.ne.s32.totalorder %v1278_v35, 0  ;;  %vm1373_vm12 = vcmp.ne.s32.totalorder %v3256_v54, 127 }
 0x442   : > { %1508 = vrot.lane.b32.xlu1 %v1243_v12, %s2476_s25  ;;  %v3338_v12 = vsel %vm1356_vm8, 1.0, %v2477_v58  ;;  %vm1510_vm13 = vcmp.lt.s32.totalorder %v3256_v54, 127  ;;  %vm1374_vm14 = vcmp.ne.s32.totalorder %v1264_v27, 127  ;;  %vm1375_vm15 = vcmp.ne.s32.totalorder %v1271_v32, 127 }
 0x443   : > { %v2190_v52 = vsel %vm3329_vm10, 1.0, %v2477_v58  ;;  %vm1376_vm0 = vcmp.ne.s32.totalorder %v1278_v35, 127  ;;  %vm1377_vm1 = vcmp.ne.s32.totalorder %v1285_v10, 127  ;;  %vm3382_vm2 = vcmp.ne.s32.totalorder %v1292_v39, 127 }
 0x444   : > { %vm3408_vm3 = vcmp.ne.s32.totalorder %v1299_v16, 127  ;;  %vm1380_vm5 = vcmp.ne.s32.totalorder %v1306_v3, 127  ;;  %v3425_v16 = vsel %vm3382_vm2, 1.0, %v2477_v58 }
 0x474   : > { %v3252_v29 = vpop.permute.xlu1 %1397 }
 0x475   : > { %v3254_v44 = vpop.permute.xlu0 %1399 }
 0x478   : > { %v3258_v1 = vpop.permute.xlu1 %1401 }
 0x479   : > { %v3260_v7 = vpop.permute.xlu0 %1403 }
 0x47a   : > { %v1443_v45 = vsel %vm1429_vm4, %v3254_v44, %v3260_v7 }
 0x47c   : > { %v3265_v17 = vpop.permute.xlu1 %1405 }
 0x47d   : > { %v3267_v38 = vpop.permute.xlu0 %1407  ;;  %v1440_v37 = vsel %vm1429_vm4, %v3258_v1, %v3265_v17 }
 0x480   : > { %v3273_v26 = vpop.permute.xlu1 %1409 }
 0x481   : > { %v3278_v5 = vpop.permute.xlu0 %1411 }
 0x484   : > { %v3286_v36 = vpop.permute.xlu1 %1413 }
 0x485   : > { %v1416_v28 = vpop.permute.xlu0 %1415 }
 0x486   : > { %v1437_v19 = vsel %vm1429_vm4, %v3278_v5, %v1416_v28 }
 0x487   : > { %v1458_v48 = vmul.f32 %v3284_v43, %v1437_v19 }
 0x488   : > { %v3305_v2 = vpop.permute.xlu1 %1417 }
 0x489   : > { %v3310_v22 = vadd.f32 %v1458_v48, %v3165_v34  ;;  %v1420_v33 = vpop.permute.xlu0 %1419 }
 0x48a   : > { %v1435_v49 = vsel %vm1429_vm4, %v1416_v28, %v1420_v33 }
 0x48b   : > { %v1459_v25 = vmul.f32 %v3303_v4, %v1435_v49 }
 0x48c   : > { %v3317_v47 = vpop.permute.xlu1 %1421 }
 0x48d   : > { %v3320_v20 = vadd.f32 %v1459_v25, %v3183_v8  ;;  %v1432_v34 = vsel %vm1429_vm4, %v3305_v2, %v3317_v47  ;;  %v1424_v56 = vpop.permute.xlu0 %1423  ;;  %v2196_v25 = vsel %vm1373_vm12, 1.0, %v2477_v58 }
 0x48e   : > { %v1452_v53 = vmul.f32 %v2194_v62, %v1432_v34  ;;  %v1433_v46 = vsel %vm1429_vm4, %v1420_v33, %v1424_v56  ;;  %v2191_v33 = vsel %vm1352_vm11, 1.0, %v2477_v58 }
 0x48f   : > { %v1460_v11 = vmul.f32 %v2194_v62, %v1433_v46  ;;  %v3401_v46 = vsel %vm1376_vm0, 1.0, %v2477_v58 }
 0x490   : > { %v3334_v8 = vadd.f32 %v1452_v53, %v3197_v40  ;;  %v3340_v42 = vpop.permute.xlu1 %1425  ;;  %v2189_v40 = vsel %vm1350_vm9, 1.0, %v2477_v58 }
 0x491   : > { %v3343_v28 = vadd.f32 %v1460_v11, %v3216_v50  ;;  %v1444_v51 = vsel %vm1429_vm4, %v3340_v42, %v3252_v29  ;;  %v1428_v19 = vpop.permute.xlu0 %1427  ;;  %v1442_v50 = vsel %vm1429_vm4, %v3252_v29, %v3258_v1  ;;  %v3370_v29 = vsel %vm1374_vm14, 1.0, %v2477_v58 }
 0x492   : > { %v1431_v9 = vsel %vm1429_vm4, %v1424_v56, %v1428_v19  ;;  %v1446_v48 = vmul.f32 %v2188_v61, %v1444_v51  ;;  %v1447_v32 = vmul.f32 %v2189_v40, %v1442_v50  ;;  %v3378_v56 = vsel %vm1375_vm15, 1.0, %v2477_v58 }
 0x493   : > { %v1461_v60 = vmul.f32 %v3338_v12, %v1431_v9  ;;  %v1445_v35 = vsel %vm1429_vm4, %v1428_v19, %v3254_v44  ;;  %v3404_v11 = vsel %vm1377_vm1, 1.0, %v2477_v58  ;;  %v1441_v44 = vsel %vm1429_vm4, %v3260_v7, %v3267_v38 }
 0x494   : > { %v3363_v49 = vpop.permute.xlu1 %1478  ;;  %v1462_v10 = vadd.f32 %v1446_v48, %v3236_v24  ;;  %v1438_v1 = vsel %vm1429_vm4, %v3265_v17, %v3273_v26  ;;  %v1455_v19 = vmul.f32 %v2189_v40, %v1443_v45  ;;  %v1454_v9 = vmul.f32 %v2188_v61, %v1445_v35 }
 0x495   : > { %v3367_v27 = vadd.f32 %v1461_v60, %v3239_v30  ;;  %v1483_v62 = vpop.permute.xlu0 %1482  ;;  %v1463_v7 = vadd.f32 %v1447_v32, %v3076_v41  ;;  %v1448_v50 = vmul.f32 %v2190_v52, %v1440_v37  ;;  %v1456_v60 = vmul.f32 %v2190_v52, %v1441_v44 }
 0x496   : > { %v1523_v34 = vsel %vm1510_vm13, %v3363_v49, %v1483_v62  ;;  %v1449_v3 = vmul.f32 %v2191_v33, %v1438_v1  ;;  %v3435_v61 = vsel %vm3408_vm3, 1.0, %v2477_v58  ;;  %v1439_v41 = vsel %vm1429_vm4, %v3267_v38, %v3278_v5 }
 0x497   : > { %v1527_v53 = vmul.f32 %v2196_v25, %v1523_v34  ;;  %v1471_v45 = vadd.f32 %v1455_v19, %v3120_v59  ;;  %v1472_v24 = vadd.f32 %v1456_v60, %v3122_v57  ;;  %v1457_v59 = vmul.f32 %v2191_v33, %v1439_v41 }
 0x498   : > { %v3398_v39 = vpop.permute.xlu1 %1480  ;;  %v1465_v44 = vadd.f32 %v1449_v3, %v3117_v31  ;;  %v1434_v57 = vsel %vm1429_vm4, %v3286_v36, %v3305_v2 }
 0x499   : > { %v1543_v21 = vadd.f32 %v1527_v53, %v1462_v10  ;;  %v1487_v51 = vpop.permute.xlu0 %1486  ;;  %v1470_v10 = vadd.f32 %v1454_v9, %v3242_v6  ;;  %v1464_v53 = vadd.f32 %v1448_v50, %v3087_v63 }
 0x49a   : > { %v1521_v0 = vsel %vm1510_vm13, %v1483_v62, %v1487_v51  ;;  %v3438_v62 = vsel %vm1380_vm5, 1.0, %v2477_v58 }
 0x49b   : > { %v3429_v48 = vadd.f32 %v3248_v23, %v1543_v21  ;;  %v1528_v17 = vmul.f32 %v3370_v29, %v1521_v0 }
 0x49c   : > { %v1485_v40 = vpop.permute.xlu1 %1484 }
 0x49d   : > { %v1603_v32 = vmul.f32 0.044715, %v3429_v48  ;;  %v1544_v34 = vadd.f32 %v1528_v17, %v1463_v7  ;;  %v1524_v52 = vsel %vm1510_vm13, %v3398_v39, %v1485_v40  ;;  %v1491_v30 = vpop.permute.xlu0 %1490 }
 0x49e   : > { %v1535_v35 = vmul.f32 %v2196_v25, %v1524_v52  ;;  %v1519_v58 = vsel %vm1510_vm13, %v1487_v51, %v1491_v30  ;;  %v1436_v25 = vsel %vm1429_vm4, %v3273_v26, %v3286_v36  ;;  %v1473_v36 = vadd.f32 %v1457_v59, %v3134_v55 }
 0x49f   : > { %v1619_v38 = vmul.f32 %v1603_v32, %v3429_v48  ;;  %v3455_v5 = vadd.f32 %v3248_v23, %v1544_v34  ;;  %v1529_v37 = vmul.f32 %v3378_v56, %v1519_v58  ;;  %v1450_v2 = vmul.f32 %v3284_v43, %v1436_v25 }
 0x4a0   : > { %v1551_v1 = vadd.f32 %v1535_v35, %v1470_v10  ;;  %v1489_v6 = vpop.permute.xlu1 %1488 }
 0x4a1   : > { %v1635_v63 = vmul.f32 %v1619_v38, %v3429_v48  ;;  %v1604_v21 = vmul.f32 0.044715, %v3455_v5  ;;  %v1545_v51 = vadd.f32 %v1529_v37, %v1464_v53  ;;  %v1495_v19 = vpop.permute.xlu0 %1494  ;;  %v1522_v33 = vsel %vm1510_vm13, %v1485_v40, %v1489_v6 }
 0x4a2   : > { %v3471_v31 = vadd.f32 %v3250_v14, %v1551_v1  ;;  %v1517_v26 = vsel %vm1510_vm13, %v1491_v30, %v1495_v19  ;;  %v1536_v50 = vmul.f32 %v3370_v29, %v1522_v33  ;;  %v1451_v40 = vmul.f32 %v3303_v4, %v1434_v57 }
 0x4a3   : > { %v1651_v9 = vadd.f32 %v1635_v63, %v3429_v48  ;;  %v1620_v0 = vmul.f32 %v1604_v21, %v3455_v5  ;;  %v3480_v7 = vadd.f32 %v3248_v23, %v1545_v51  ;;  %v1530_v60 = vmul.f32 %v3401_v46, %v1517_v26 }
 0x4a4   : > { %v1611_v17 = vmul.f32 0.044715, %v3471_v31  ;;  %v1493_v3 = vpop.permute.xlu1 %1492  ;;  %v1552_v29 = vadd.f32 %v1536_v50, %v1471_v45  ;;  %v1467_v25 = vadd.f32 %v1451_v40, %v3179_v18 }
 0x4a5   : > { %v1667_v41 = vmul.f32 0.7978846, %v1651_v9  ;;  %v1636_v32 = vmul.f32 %v1620_v0, %v3455_v5  ;;  %v1605_v34 = vmul.f32 0.044715, %v3480_v7  ;;  %v1499_v52 = vpop.permute.xlu0 %1498  ;;  %v1546_v10 = vadd.f32 %v1530_v60, %v1465_v44 }
 0x4a6   : > { %v1627_v30 = vmul.f32 %v1611_v17, %v3471_v31  ;;  %v1520_v55 = vsel %vm1510_vm13, %v1489_v6, %v1493_v3  ;;  %v3498_v53 = vadd.f32 %v3250_v14, %v1552_v29  ;;  %v1515_v45 = vsel %vm1510_vm13, %v1495_v19, %v1499_v52 }
 0x4a7   : > { %2340 = vtanh.f32 %v1667_v41  ;;  %v1652_v43 = vadd.f32 %v1636_v32, %v3455_v5  ;;  %v1621_v35 = vmul.f32 %v1605_v34, %v3480_v7  ;;  %v1537_v4 = vmul.f32 %v3378_v56, %v1520_v55 }
 0x4a8   : > { %v1643_v58 = vmul.f32 %v1627_v30, %v3471_v31  ;;  %v3501_v38 = vadd.f32 %v3248_v23, %v1546_v10  ;;  %v1531_v1 = vmul.f32 %v3404_v11, %v1515_v45  ;;  %v1497_v6 = vpop.permute.xlu1 %1496  ;;  %v1466_v56 = vadd.f32 %v1450_v2, %v3157_v13 }
 0x4a9   : > { %v1668_v37 = vmul.f32 0.7978846, %v1652_v43  ;;  %v1637_v44 = vmul.f32 %v1621_v35, %v3480_v7  ;;  %v1553_v59 = vadd.f32 %v1537_v4, %v1472_v24  ;;  %v1612_v21 = vmul.f32 0.044715, %v3498_v53  ;;  %v3519_v18 = vpop.permute.xlu0 %1502 }
 0x4aa   : > { %v1659_v63 = vadd.f32 %v1643_v58, %v3471_v31  ;;  %v1606_v19 = vmul.f32 0.044715, %v3501_v38  ;;  %v1547_v26 = vadd.f32 %v1531_v1, %v1466_v56  ;;  %v1518_v13 = vsel %vm1510_vm13, %v1493_v3, %v1497_v6 }
 0x4ab   : > { %2342 = vtanh.f32 %v1668_v37  ;;  %v1653_v51 = vadd.f32 %v1637_v44, %v3480_v7  ;;  %v3514_v57 = vadd.f32 %v3250_v14, %v1553_v59  ;;  %v1628_v33 = vmul.f32 %v1612_v21, %v3498_v53 }
 0x4ac   : > { %v1675_v24 = vmul.f32 0.7978846, %v1659_v63  ;;  %v1430_v9 = vsel %vm1429_vm4, %v3317_v47, %v3340_v42  ;;  %v1622_v50 = vmul.f32 %v1606_v19, %v3501_v38  ;;  %v3529_v60 = vadd.f32 %v3248_v23, %v1547_v26  ;;  %v3540_v29 = vpop.permute.xlu1 %1500 }
 0x4ad   : > { %v1669_v0 = vmul.f32 0.7978846, %v1653_v51  ;;  %v1613_v2 = vmul.f32 0.044715, %v3514_v57  ;;  %v1644_v17 = vmul.f32 %v1628_v33, %v3498_v53  ;;  %v1538_v3 = vmul.f32 %v3401_v46, %v1518_v13 }
 0x4ae   : > { %2344 = vtanh.f32 %v1675_v24  ;;  %v1638_v40 = vmul.f32 %v1622_v50, %v3501_v38  ;;  %v1513_v47 = vsel %vm1510_vm13, %v1499_v52, %v3519_v18  ;;  %v1453_v42 = vmul.f32 %v3338_v12, %v1430_v9 }
 0x4af   : > { %2346 = vtanh.f32 %v1669_v0  ;;  %v1629_v41 = vmul.f32 %v1613_v2, %v3514_v57  ;;  %v1660_v32 = vadd.f32 %v1644_v17, %v3498_v53  ;;  %v1607_v34 = vmul.f32 0.044715, %v3529_v60 }
 0x4b0   : > { %v1554_v30 = vadd.f32 %v1538_v3, %v1473_v36  ;;  %v1587_v46 = vmul.f32 0.5, %v3429_v48  ;;  %v1654_v55 = vadd.f32 %v1638_v40, %v3501_v38  ;;  %v1532_v35 = vmul.f32 %v3425_v16, %v1513_v47 }
 0x4b1   : > { %v2341_v10 = vpop.eup %2340  ;;  %v1645_v43 = vmul.f32 %v1629_v41, %v3514_v57  ;;  %v1676_v52 = vmul.f32 0.7978846, %v1660_v32  ;;  %v1623_v12 = vmul.f32 %v1607_v34, %v3529_v60  ;;  %v1516_v48 = vsel %vm1510_vm13, %v1497_v6, %v3540_v29 }
 0x4b2   : > { %v1699_v4 = vadd.f32 1.0, %v2341_v10  ;;  %v3548_v58 = vadd.f32 %v3250_v14, %v1554_v30  ;;  %v1670_v45 = vmul.f32 0.7978846, %v1654_v55  ;;  %v1548_v37 = vadd.f32 %v1532_v35, %v1467_v25 }
 0x4b3   : > { %v1661_v36 = vadd.f32 %v1645_v43, %v3514_v57  ;;  %v1588_v59 = vmul.f32 0.5, %v3455_v5  ;;  %2348 = vtanh.f32 %v1676_v52  ;;  %v1639_v1 = vmul.f32 %v1623_v12, %v3529_v60 }
 0x4b4   : > { %v3554_v44 = vmul.f32 %v1699_v4, %v1587_v46  ;;  %2350 = vtanh.f32 %v1670_v45  ;;  %v1614_v21 = vmul.f32 0.044715, %v3548_v58  ;;  %v3560_v51 = vadd.f32 %v3248_v23, %v1548_v37 }
 0x4b5   : > { %v2343_v56 = vpop.eup %2342  ;;  %v1677_v63 = vmul.f32 0.7978846, %v1661_v36  ;;  %v1655_v6 = vadd.f32 %v1639_v1, %v3529_v60  ;;  %v1539_v24 = vmul.f32 %v3404_v11, %v1516_v48  ;;  %v3566_v5 = vadd.f32 %v1453_v42, %v3221_v15 }
 0x4b6   : > { %v1747_v25 = vmul.f32 0.044715, %v3554_v44  ;;  %v1700_v19 = vadd.f32 1.0, %v2343_v56  ;;  %v1630_v33 = vmul.f32 %v1614_v21, %v3548_v58  ;;  %v1608_v26 = vmul.f32 0.044715, %v3560_v51 }
 0x4b7   : > { %2352 = vtanh.f32 %v1677_v63  ;;  %v1595_v50 = vmul.f32 0.5, %v3471_v31  ;;  %v1671_v2 = vmul.f32 0.7978846, %v1655_v6  ;;  %v1589_v11 = vmul.f32 0.5, %v3480_v7 }
 0x4b8   : > { %v2345_v13 = vpop.eup %2344  ;;  %v1763_v9 = vmul.f32 %v1747_v25, %v3554_v44  ;;  %v3571_v0 = vmul.f32 %v1700_v19, %v1588_v59  ;;  %v1646_v15 = vmul.f32 %v1630_v33, %v3548_v58  ;;  %v1624_v40 = vmul.f32 %v1608_v26, %v3560_v51 }
 0x4b9   : > { %v2347_v17 = vpop.eup %2346  ;;  %v1707_v3 = vadd.f32 1.0, %v2345_v13  ;;  %v1555_v32 = vadd.f32 %v1539_v24, %v3310_v22  ;;  %2354 = vtanh.f32 %v1671_v2  ;;  %v1596_v55 = vmul.f32 0.5, %v3498_v53 }
 0x4ba   : > { %v1779_v41 = vmul.f32 %v1763_v9, %v3554_v44  ;;  %v1748_v47 = vmul.f32 0.044715, %v3571_v0  ;;  %v1701_v42 = vadd.f32 1.0, %v2347_v17  ;;  %v1662_v31 = vadd.f32 %v1646_v15, %v3548_v58 }
 0x4bb   : > { %v3580_v34 = vmul.f32 %v1707_v3, %v1595_v50  ;;  %v1640_v30 = vmul.f32 %v1624_v40, %v3560_v51  ;;  %v1590_v35 = vmul.f32 0.5, %v3501_v38  ;;  %v3595_v37 = vadd.f32 %v3250_v14, %v1555_v32  ;;  %v1507_v3 = vpop.permute.xlu0 %1506 }
 0x4bc   : > { %v1795_v7 = vadd.f32 %v1779_v41, %v3554_v44  ;;  %v1764_v10 = vmul.f32 %v1748_v47, %v3571_v0  ;;  %v3586_v46 = vmul.f32 %v1701_v42, %v1589_v11  ;;  %v1678_v22 = vmul.f32 0.7978846, %v1662_v31 }
 0x4bd   : > { %v1755_v43 = vmul.f32 0.044715, %v3580_v34  ;;  %v1656_v4 = vadd.f32 %v1640_v30, %v3560_v51  ;;  %v2349_v52 = vpop.eup %2348  ;;  %v1597_v6 = vmul.f32 0.5, %v3514_v57  ;;  %v1591_v2 = vmul.f32 0.5, %v3529_v60 }
 0x4be   : > { %v1811_v12 = vmul.f32 0.7978846, %v1795_v7  ;;  %v1780_v45 = vmul.f32 %v1764_v10, %v3571_v0  ;;  %v1749_v36 = vmul.f32 0.044715, %v3586_v46  ;;  %v2351_v48 = vpop.eup %2350  ;;  %v1708_v53 = vadd.f32 1.0, %v2349_v52 }
 0x4bf   : > { %v1771_v59 = vmul.f32 %v1755_v43, %v3580_v34  ;;  %2356 = vtanh.f32 %v1678_v22  ;;  %v1672_v1 = vmul.f32 0.7978846, %v1656_v4  ;;  %v1702_v63 = vadd.f32 1.0, %v2351_v48 }
 0x4c0   : > { %2358 = vtanh.f32 %v1811_v12  ;;  %v1796_v38 = vadd.f32 %v1780_v45, %v3571_v0  ;;  %v1765_v56 = vmul.f32 %v1749_v36, %v3586_v46  ;;  %v3601_v19 = vmul.f32 %v1708_v53, %v1596_v55 }
 0x4c1   : > { %v2353_v21 = vpop.eup %2352  ;;  %v1787_v25 = vmul.f32 %v1771_v59, %v3580_v34  ;;  %2360 = vtanh.f32 %v1672_v1  ;;  %v3605_v26 = vmul.f32 %v1702_v63, %v1590_v35  ;;  %v1615_v17 = vmul.f32 0.044715, %v3595_v37 }
 0x4c2   : > { %v1812_v24 = vmul.f32 0.7978846, %v1796_v38  ;;  %v1781_v33 = vmul.f32 %v1765_v56, %v3586_v46  ;;  %v1709_v13 = vadd.f32 1.0, %v2353_v21  ;;  %v1756_v50 = vmul.f32 0.044715, %v3601_v19 }
 0x4c3   : > { %v1803_v9 = vadd.f32 %v1787_v25, %v3580_v34  ;;  %v1750_v57 = vmul.f32 0.044715, %v3605_v26  ;;  %v1598_v15 = vmul.f32 0.5, %v3548_v58  ;;  %v2355_v40 = vpop.eup %2354  ;;  %v1631_v32 = vmul.f32 %v1615_v17, %v3595_v37 }
 0x4c4   : > { %2362 = vtanh.f32 %v1812_v24  ;;  %v1797_v11 = vadd.f32 %v1781_v33, %v3586_v46  ;;  %v1772_v47 = vmul.f32 %v1756_v50, %v3601_v19  ;;  %v3615_v42 = vmul.f32 %v1709_v13, %v1597_v6 }
 0x4c5   : > { %v1819_v41 = vmul.f32 0.7978846, %v1803_v9  ;;  %v1766_v60 = vmul.f32 %v1750_v57, %v3605_v26  ;;  %v1703_v30 = vadd.f32 1.0, %v2355_v40  ;;  %v1511_v7 = vsel %vm1510_vm13, %v3519_v18, %v1507_v3 }
 0x4c6   : > { %v1813_v31 = vmul.f32 0.7978846, %v1797_v11  ;;  %v1788_v10 = vmul.f32 %v1772_v47, %v3601_v19  ;;  %v1757_v58 = vmul.f32 0.044715, %v3615_v42  ;;  %v1525_v55 = vsel %vm1510_vm13, %v1507_v3, %v3363_v49  ;;  %v1505_v3 = vpop.permute.xlu1 %1504 }
 0x4c7   : > { %2364 = vtanh.f32 %v1819_v41  ;;  %v1782_v43 = vmul.f32 %v1766_v60, %v3605_v26  ;;  %v3628_v35 = vmul.f32 %v1703_v30, %v1591_v2  ;;  %v1647_v22 = vmul.f32 %v1631_v32, %v3595_v37 }
 0x4c8   : > { %2366 = vtanh.f32 %v1813_v31  ;;  %v1731_v52 = vmul.f32 0.5, %v3554_v44  ;;  %v1804_v18 = vadd.f32 %v1788_v10, %v3601_v19  ;;  %v1773_v12 = vmul.f32 %v1757_v58, %v3615_v42 }
 0x4c9   : > { %v2357_v4 = vpop.eup %2356  ;;  %v1592_v45 = vmul.f32 0.5, %v3560_v51  ;;  %v1798_v48 = vadd.f32 %v1782_v43, %v3605_v26  ;;  %v1751_v49 = vmul.f32 0.044715, %v3628_v35  ;;  %v1533_v53 = vmul.f32 %v3435_v61, %v1511_v7 }
 0x4ca   : > { %v2359_v36 = vpop.eup %2358  ;;  %v1710_v59 = vadd.f32 1.0, %v2357_v4  ;;  %v1820_v38 = vmul.f32 0.7978846, %v1804_v18  ;;  %v1789_v56 = vmul.f32 %v1773_v12, %v3615_v42  ;;  %v1663_v44 = vadd.f32 %v1647_v22, %v3595_v37  ;;  %v1509_v12 = vpop.permute.xlu1 %1508 }
 0x4cb   : > { %v2361_v1 = vpop.eup %2360  ;;  %v1534_v63 = vmul.f32 %v3438_v62, %v1525_v55  ;;  %v1814_v21 = vmul.f32 0.7978846, %v1798_v48  ;;  %v1767_v25 = vmul.f32 %v1751_v49, %v3628_v35  ;;  %v1843_v24 = vadd.f32 1.0, %v2359_v36 }
 0x4cc   : > { %v3642_v51 = vmul.f32 %v1710_v59, %v1598_v15  ;;  %v1704_v6 = vadd.f32 1.0, %v2361_v1  ;;  %v1732_v33 = vmul.f32 0.5, %v3571_v0  ;;  %2368 = vtanh.f32 %v1820_v38 }
 0x4cd   : > { %v1805_v13 = vadd.f32 %v1789_v56, %v3615_v42  ;;  %v1739_v50 = vmul.f32 0.5, %v3580_v34  ;;  %2370 = vtanh.f32 %v1814_v21  ;;  %v1783_v2 = vmul.f32 %v1767_v25, %v3628_v35 }
 0x4ce   : > { %v2363_v9 = vpop.eup %2362  ;;  %v1758_v17 = vmul.f32 0.044715, %v3642_v51  ;;  %v3649_v15 = vmul.f32 %v1704_v6, %v1592_v45  ;;  %v1679_v40 = vmul.f32 0.7978846, %v1663_v44  ;;  %v1549_v47 = vadd.f32 %v1533_v53, %v3334_v8 }
 0x4cf   : > { %v1844_v11 = vadd.f32 1.0, %v2363_v9  ;;  %v1821_v57 = vmul.f32 0.7978846, %v1805_v13  ;;  %v1799_v41 = vadd.f32 %v1783_v2, %v3628_v35  ;;  %v1550_v32 = vadd.f32 %v1534_v63, %v3566_v5 }
 0x4d0   : > { %v1774_v0 = vmul.f32 %v1758_v17, %v3642_v51  ;;  %v3655_v31 = vmul.f32 %v1843_v24, %v1731_v52  ;;  %v1733_v30 = vmul.f32 0.5, %v3586_v46  ;;  %v1752_v7 = vmul.f32 0.044715, %v3649_v15 }
 0x4d1   : > { %v2365_v34 = vpop.eup %2364  ;;  %v3657_v60 = vmul.f32 %v1844_v11, %v1732_v33  ;;  %v1815_v55 = vmul.f32 0.7978846, %v1799_v41  ;;  %v3663_v22 = vadd.f32 %v3248_v23, %v1549_v47  ;;  %2372 = vtanh.f32 %v1679_v40 }
 0x4d2   : > { %v2367_v10 = vpop.eup %2366  ;;  %v1851_v58 = vadd.f32 1.0, %v2365_v34  ;;  %v1790_v43 = vmul.f32 %v1774_v0, %v3642_v51  ;;  %v1768_v5 = vmul.f32 %v1752_v7, %v3649_v15  ;;  %v3669_v4 = vadd.f32 %v3248_v23, %v1550_v32 }
 0x4d3   : > { %v2222_v8 = vpack.c.bf16 %v3657_v60, %v3655_v31  ;;  %v1740_v46 = vmul.f32 0.5, %v3601_v19  ;;  %v1734_v52 = vmul.f32 0.5, %v3605_v26  ;;  %2374 = vtanh.f32 %v1821_v57 }
 0x4d4   : > { %v1806_v18 = vadd.f32 %v1790_v43, %v3642_v51  ;;  %v3675_v45 = vmul.f32 %v1851_v58, %v1739_v50  ;;  %v1845_v36 = vadd.f32 1.0, %v2367_v10  ;;  %v1784_v48 = vmul.f32 %v1768_v5, %v3649_v15 }
 0x4d5   : > { %1923 = vst [vmem:[%s2771_s28] sm:$0xff] %v2222_v8  ;;  %v1609_v49 = vmul.f32 0.044715, %v3663_v22  ;;  %2376 = vtanh.f32 %v1815_v55  ;;  %v1610_v23 = vmul.f32 0.044715, %v3669_v4  ;;  %v1514_v19 = vsel %vm1510_vm13, %v3540_v29, %v1505_v3 }
 0x4d6   : > { %v1822_v59 = vmul.f32 0.7978846, %v1806_v18  ;;  %v2369_v26 = vpop.eup %2368  ;;  %v1800_v53 = vadd.f32 %v1784_v48, %v3649_v15  ;;  %v1540_v38 = vmul.f32 %v3425_v16, %v1514_v19  ;;  %v1512_v56 = vsel %vm1510_vm13, %v1505_v3, %v1509_v12 }
 0x4d7   : > { %v1625_v1 = vmul.f32 %v1609_v49, %v3663_v22  ;;  %v2371_v44 = vpop.eup %2370  ;;  %v1852_v63 = vadd.f32 1.0, %v2369_v26  ;;  %v1626_v21 = vmul.f32 %v1610_v23, %v3669_v4  ;;  %v1526_v25 = vsel %vm1510_vm13, %v1509_v12, %v3398_v39 }
 0x4d8   : > { %2378 = vtanh.f32 %v1822_v59  ;;  %v1846_v29 = vadd.f32 1.0, %v2371_v44  ;;  %v1816_v6 = vmul.f32 0.7978846, %v1800_v53  ;;  %v1556_v33 = vadd.f32 %v1540_v38, %v3320_v20 }
 0x4d9   : > { %v1641_v24 = vmul.f32 %v1625_v1, %v3663_v22  ;;  %v3694_v13 = vmul.f32 %v1845_v36, %v1733_v30  ;;  %v3696_v16 = vmul.f32 %v1852_v63, %v1740_v46  ;;  %v1642_v9 = vmul.f32 %v1626_v21, %v3669_v4 }
 0x4da   : > { %v1541_v50 = vmul.f32 %v3435_v61, %v1512_v56  ;;  %v3700_v2 = vmul.f32 %v1846_v29, %v1734_v52  ;;  %2380 = vtanh.f32 %v1816_v6  ;;  %v3704_v39 = vadd.f32 %v3250_v14, %v1556_v33 }
 0x4db   : > { %v1657_v54 = vadd.f32 %v1641_v24, %v3663_v22  ;;  %v2226_v20 = vpack.c.bf16 %v3696_v16, %v3675_v45  ;;  %v1658_v17 = vadd.f32 %v1642_v9, %v3669_v4  ;;  %v1542_v3 = vmul.f32 %v3438_v62, %v1526_v25  ;;  %v2373_v11 = vpop.eup %2372 }
 0x4dc   : > { %v2223_v57 = vpack.c.bf16 %v3700_v2, %v3694_v13  ;;  %v1616_v40 = vmul.f32 0.044715, %v3704_v39  ;;  %v1557_v32 = vadd.f32 %v1541_v50, %v3343_v28  ;;  %v1711_v30 = vadd.f32 1.0, %v2373_v11 }
 0x4dd   : > { %v1673_v61 = vmul.f32 0.7978846, %v1657_v54  ;;  %v2375_v41 = vpop.eup %2374  ;;  %1927 = vst [vmem:[%s2771_s28 + $0x20] sm:$0xff] %v2226_v20  ;;  %v1674_v0 = vmul.f32 0.7978846, %v1658_v17  ;;  %v1558_v62 = vadd.f32 %v1542_v3, %v3367_v27  ;;  %v1741_v43 = vmul.f32 0.5, %v3615_v42 }
 0x4de   : > { %1924 = vst [vmem:[%s2771_s28 + $0x8] sm:$0xff] %v2223_v57  ;;  %v1632_v47 = vmul.f32 %v1616_v40, %v3704_v39  ;;  %v1853_v7 = vadd.f32 1.0, %v2375_v41  ;;  %v3720_v58 = vadd.f32 %v3250_v14, %v1557_v32  ;;  %v1599_v8 = vmul.f32 0.5, %v3595_v37 }
 0x4df   : > { %2382 = vtanh.f32 %v1673_v61  ;;  %v2377_v34 = vpop.eup %2376  ;;  %v3725_v5 = vadd.f32 %v3250_v14, %v1558_v62  ;;  %v1742_v28 = vmul.f32 0.5, %v3642_v51  ;;  %v1735_v51 = vmul.f32 0.5, %v3628_v35 }
 0x4e0   : > { %2384 = vtanh.f32 %v1674_v0  ;;  %v1648_v10 = vmul.f32 %v1632_v47, %v3704_v39  ;;  %v1617_v27 = vmul.f32 0.044715, %v3720_v58  ;;  %v1847_v18 = vadd.f32 1.0, %v2377_v34 }
 0x4e1   : > { %v3730_v12 = vmul.f32 %v1711_v30, %v1599_v8  ;;  %v1618_v36 = vmul.f32 0.044715, %v3725_v5  ;;  %v3733_v49 = vmul.f32 %v1853_v7, %v1741_v43  ;;  %v1736_v59 = vmul.f32 0.5, %v3649_v15 }
 0x4e2   : > { %v2379_v55 = vpop.eup %2378  ;;  %v1664_v52 = vadd.f32 %v1648_v10, %v3704_v39  ;;  %v1633_v42 = vmul.f32 %v1617_v27, %v3720_v58  ;;  %v3744_v1 = vmul.f32 %v1847_v18, %v1735_v51  ;;  %v1593_v25 = vmul.f32 0.5, %v3663_v22 }
 0x4e3   : > { %v1854_v46 = vadd.f32 1.0, %v2379_v55  ;;  %v1634_v19 = vmul.f32 %v1618_v36, %v3725_v5  ;;  %v1759_v56 = vmul.f32 0.044715, %v3730_v12  ;;  %v1594_v24 = vmul.f32 0.5, %v3669_v4 }
 0x4e4   : > { %v2381_v48 = vpop.eup %2380  ;;  %v1680_v14 = vmul.f32 0.7978846, %v1664_v52  ;;  %v1649_v53 = vmul.f32 %v1633_v42, %v3720_v58  ;;  %v1600_v4 = vmul.f32 0.5, %v3704_v39  ;;  %v1601_v8 = vmul.f32 0.5, %v3720_v58 }
 0x4e5   : > { %v3735_v37 = vmul.f32 %v1854_v46, %v1742_v28  ;;  %v1848_v23 = vadd.f32 1.0, %v2381_v48  ;;  %v1650_v35 = vmul.f32 %v1634_v19, %v3725_v5  ;;  %v1775_v50 = vmul.f32 %v1759_v56, %v3730_v12 }
 0x4e6   : > { %2386 = vtanh.f32 %v1680_v14  ;;  %v1665_v15 = vadd.f32 %v1649_v53, %v3720_v58  ;;  %v1602_v39 = vmul.f32 0.5, %v3725_v5  ;;  %vm1934_vm4 = vcmask (!%p2184_p1), 7168  }
 0x4e7   : > { %v2227_v26 = vpack.c.bf16 %v3735_v37, %v3733_v49  ;;  %v3746_v38 = vmul.f32 %v1848_v23, %v1736_v59  ;;  %v1666_v6 = vadd.f32 %v1650_v35, %v3725_v5  ;;  %v1791_v57 = vmul.f32 %v1775_v50, %v3730_v12 }
 0x4e8   : > { %v1681_v9 = vmul.f32 0.7978846, %v1665_v15 }
 0x4e9   : > { %v2383_v44 = vpop.eup %2382  ;;  %1928 = vst [vmem:[%s2771_s28 + $0x28] sm:$0xff] %v2227_v26  ;;  %v2224_v21 = vpack.c.bf16 %v3746_v38, %v3744_v1  ;;  %v1682_v20 = vmul.f32 0.7978846, %v1666_v6  ;;  %v1807_v32 = vadd.f32 %v1791_v57, %v3730_v12 }
 0x4ea   : > { %v2385_v63 = vpop.eup %2384  ;;  %v1705_v29 = vadd.f32 1.0, %v2383_v44  ;;  %2388 = vtanh.f32 %v1681_v9 }
 0x4eb   : > { %v1706_v33 = vadd.f32 1.0, %v2385_v63  ;;  %1925 = vst [vmem:[%s2771_s28 + $0x10] sm:$0xff] %v2224_v21  ;;  %2390 = vtanh.f32 %v1682_v20  ;;  %v1823_v46 = vmul.f32 0.7978846, %v1807_v32 }
 0x4ec   : > { %v1721_v54 = vmul.f32 %v1705_v29, %v1593_v25 }
 0x4ed   : > { %v1722_v17 = vmul.f32 %v1706_v33, %v1594_v24 }
 0x4ee   : > { %v1753_v3 = vmul.f32 0.044715, %v1721_v54  ;;  %v1737_v15 = vmul.f32 0.5, %v1721_v54 }
 0x4ef   : > { %v1754_v11 = vmul.f32 0.044715, %v1722_v17  ;;  %v1738_v21 = vmul.f32 0.5, %v1722_v17 }
 0x4f0   : > { %v1769_v22 = vmul.f32 %v1753_v3, %v1721_v54  ;;  %v2387_v61 = vpop.eup %2386 }
 0x4f1   : > { %v1770_v40 = vmul.f32 %v1754_v11, %v1722_v17  ;;  %v1712_v0 = vadd.f32 1.0, %v2387_v61  ;;  %v1743_v11 = vmul.f32 0.5, %v3730_v12  ;;  %v2478_v12 = vmov (!%p2184_p1), 0.0  }
 0x4f2   : > { %v1785_v41 = vmul.f32 %v1769_v22, %v1721_v54  ;;  %1935 = vst.msk [vmem:[%s2628_s19] sm:$0xff] (!%p2184_p1), %vm1934_vm4, %v2478_v12  ;;  %1936 = vst.msk [vmem:[%s2628_s19 + $0x8] sm:$0xff] (!%p2184_p1), %vm1934_vm4, %v2478_v12 }
 0x4f3   : > { %v1786_v47 = vmul.f32 %v1770_v40, %v1722_v17  ;;  %v1728_v30 = vmul.f32 %v1712_v0, %v1600_v4 }
 0x4f4   : > { %v1801_v34 = vadd.f32 %v1785_v41, %v1721_v54  ;;  %v2389_v55 = vpop.eup %2388 }
 0x4f5   : > { %v1802_v62 = vadd.f32 %v1786_v47, %v1722_v17  ;;  %v1760_v10 = vmul.f32 0.044715, %v1728_v30  ;;  %v2391_v28 = vpop.eup %2390  ;;  %v1713_v27 = vadd.f32 1.0, %v2389_v55  ;;  %v1744_v54 = vmul.f32 0.5, %v1728_v30 }
 0x4f6   : > { %v1817_v7 = vmul.f32 0.7978846, %v1801_v34  ;;  %v1714_v18 = vadd.f32 1.0, %v2391_v28 }
 0x4f7   : > { %v1818_v43 = vmul.f32 0.7978846, %v1802_v62  ;;  %v1776_v52 = vmul.f32 %v1760_v10, %v1728_v30  ;;  %v1729_v48 = vmul.f32 %v1713_v27, %v1601_v8 }
 0x4f8   : > { %2392 = vtanh.f32 %v1817_v7  ;;  %v1730_v14 = vmul.f32 %v1714_v18, %v1602_v39 }
 0x4f9   : > { %2394 = vtanh.f32 %v1818_v43  ;;  %v1792_v36 = vmul.f32 %v1776_v52, %v1728_v30  ;;  %v1761_v51 = vmul.f32 0.044715, %v1729_v48  ;;  %v1745_v4 = vmul.f32 0.5, %v1729_v48 }
 0x4fa   : > { %2396 = vtanh.f32 %v1823_v46  ;;  %v1762_v59 = vmul.f32 0.044715, %v1730_v14  ;;  %v1746_v47 = vmul.f32 0.5, %v1730_v14 }
 0x4fb   : > { %v1808_v42 = vadd.f32 %v1792_v36, %v1728_v30  ;;  %v1777_v19 = vmul.f32 %v1761_v51, %v1729_v48 }
 0x4fc   : > { %v1778_v26 = vmul.f32 %v1762_v59, %v1730_v14 }
 0x4fd   : > { %v1824_v23 = vmul.f32 0.7978846, %v1808_v42  ;;  %v1793_v58 = vmul.f32 %v1777_v19, %v1729_v48 }
 0x4fe   : > { %v1794_v53 = vmul.f32 %v1778_v26, %v1730_v14 }
 0x4ff   : > { %2398 = vtanh.f32 %v1824_v23  ;;  %v1809_v35 = vadd.f32 %v1793_v58, %v1729_v48 }
 0x500   : > { %v1810_v63 = vadd.f32 %v1794_v53, %v1730_v14 }
 0x501   : > { %v1825_v29 = vmul.f32 0.7978846, %v1809_v35 }
 0x502   : > { %v2393_v56 = vpop.eup %2392  ;;  %v1826_v24 = vmul.f32 0.7978846, %v1810_v63 }
 0x503   : > { %v2395_v44 = vpop.eup %2394  ;;  %v1849_v5 = vadd.f32 1.0, %v2393_v56  ;;  %2400 = vtanh.f32 %v1825_v29 }
 0x504   : > { %v1850_v25 = vadd.f32 1.0, %v2395_v44  ;;  %v2397_v33 = vpop.eup %2396  ;;  %2402 = vtanh.f32 %v1826_v24 }
 0x505   : > { %v1865_v6 = vmul.f32 %v1849_v5, %v1737_v15  ;;  %v1855_v20 = vadd.f32 1.0, %v2397_v33 }
 0x506   : > { %v1866_v9 = vmul.f32 %v1850_v25, %v1738_v21 }
 0x507   : > { %v1871_v22 = vmul.f32 %v1855_v20, %v1743_v11 }
 0x508   : > { %v2225_v50 = vpack.c.bf16 %v1866_v9, %v1865_v6 }
 0x509   : > { %v2399_v3 = vpop.eup %2398 }
 0x50a   : > { %1926 = vst [vmem:[%s2771_s28 + $0x18] sm:$0xff] %v2225_v50  ;;  %v1856_v57 = vadd.f32 1.0, %v2399_v3 }
 0x50c   : > { %v1872_v17 = vmul.f32 %v1856_v57, %v1744_v54 }
 0x50d   : > { %v2401_v40 = vpop.eup %2400 }
 0x50e   : > { %v2228_v61 = vpack.c.bf16 %v1872_v17, %v1871_v22  ;;  %v2403_v41 = vpop.eup %2402  ;;  %v1857_v0 = vadd.f32 1.0, %v2401_v40 }
 0x50f   : > { %v1858_v32 = vadd.f32 1.0, %v2403_v41  ;;  %1933 = sbr.rel (%p2184_p1) target bundleno = 1302 (0x516), region = 95 }
 0x510   : > { %1929 = vst [vmem:[%s2771_s28 + $0x30] sm:$0xff] %v2228_v61  ;;  %v1873_v34 = vmul.f32 %v1857_v0, %v1745_v4 }
 0x511   : > { %v1874_v62 = vmul.f32 %v1858_v32, %v1746_v47 }
 0x513   : > { %v2229_v7 = vpack.c.bf16 %v1874_v62, %v1873_v34 }
 0x515   : > { %1930 = vst [vmem:[%s2771_s28 + $0x38] sm:$0xff] %v2229_v7 }
 0x516 PF: > { %v1939_v30 = vadd.f32 %v3657_v60, %v3655_v31  ;;  %v1948_v10 = vadd.f32 %v3696_v16, %v3675_v45  ;;  %v1937_v16 = vld [vmem:[%s2628_s19] sm:$0xff]  ;;  %vm1959_vm6 = vcmask 7168   ;;  %v1938_v18 = vld [vmem:[%s2628_s19 + $0x8] sm:$0xff]  ;;  %s2214_s13 = sshll.u32 (%p2577_p6), %s2442_s11, 3  ;;  %s2215_s14 = sshll.u32 (%p2577_p6), %s2446_s12, 5  ;;  %v1995_v48 = vld [vmem:[%s2771_s28 + $0x10] sm:$0xff] (%p2577_p6) }
 0x517   : > { %s1976_s0 = sadd.s32 (%p2577_p6), %s2215_s14, %s2214_s13  ;;  %v1997_v14 = vld [vmem:[%s2771_s28 + $0x18] sm:$0xff] (%p2577_p6)  ;;  %v1999_v42 = vld [vmem:[%s2771_s28 + $0x20] sm:$0xff] (%p2577_p6)  ;;  %v2001_v51 = vld [vmem:[%s2771_s28 + $0x28] sm:$0xff] (%p2577_p6) }
 0x518   : > { %v1940_v55 = vadd.f32 %v1939_v30, %v3694_v13  ;;  %v1949_v43 = vadd.f32 %v1948_v10, %v3733_v49  ;;  %s2216_s20 = sshll.u32 (%p2577_p6), %s1976_s0, 2  ;;  %v2003_v59 = vld [vmem:[%s2771_s28 + $0x30] sm:$0xff] (%p2577_p6) }
 0x519   : > { %s1978_s30 = scalar_lea.vmem (%p2577_p6), %s3830_s8, %s2216_s20 }
 0x51a   : > { %v1941_v8 = vadd.f32 %v1940_v55, %v3700_v2  ;;  %v1950_v28 = vadd.f32 %v1949_v43, %v3735_v37  ;;  %1996 = vst [vmem:[%s1978_s30 + $0x10] sm:$0xff] (%p2577_p6), %v1995_v48  ;;  %1998 = vst [vmem:[%s1978_s30 + $0x18] sm:$0xff] (%p2577_p6), %v1997_v14 }
 0x51b   : > { %2000 = vst [vmem:[%s1978_s30 + $0x40] sm:$0xff] (%p2577_p6), %v1999_v42  ;;  %2002 = vst [vmem:[%s1978_s30 + $0x48] sm:$0xff] (%p2577_p6), %v2001_v51 }
 0x51c   : > { %v1942_v46 = vadd.f32 %v1941_v8, %v3744_v1  ;;  %v1951_v52 = vadd.f32 %v1950_v28, %v1871_v22  ;;  %v1991_v1 = vld [vmem:[%s2771_s28] sm:$0xff] (%p2577_p6)  ;;  %v2005_v23 = vld [vmem:[%s2771_s28 + $0x38] sm:$0xff] (%p2577_p6)  ;;  %2004 = vst [vmem:[%s1978_s30 + $0x50] sm:$0xff] (%p2577_p6), %v2003_v59 }
 0x51d   : > { %1992 = vst [vmem:[%s1978_s30] sm:$0xff] (%p2577_p6), %v1991_v1  ;;  %2006 = vst [vmem:[%s1978_s30 + $0x58] sm:$0xff] (%p2577_p6), %v2005_v23 }
 0x51e   : > { %v1943_v27 = vadd.f32 %v1942_v46, %v3746_v38  ;;  %v1952_v31 = vadd.f32 %v1951_v52, %v1872_v17  ;;  %v1993_v38 = vld [vmem:[%s2771_s28 + $0x8] sm:$0xff] (%p2577_p6) }
 0x51f   : > { %1994 = vst [vmem:[%s1978_s30 + $0x8] sm:$0xff] (%p2577_p6), %v1993_v38 }
 0x520   : > { %v1944_v60 = vadd.f32 %v1943_v27, %v1865_v6  ;;  %v1953_v39 = vadd.f32 %v1952_v31, %v1873_v34 }
 0x522   : > { %v1945_v45 = vadd.f32 %v1944_v60, %v1866_v9  ;;  %v1954_v13 = vadd.f32 %v1953_v39, %v1874_v62 }
 0x524   : > { %1946 = vadd.xlane.f32.xlu0 %v1945_v45 }
 0x528   : > { %1955 = vadd.xlane.f32.xlu0 %v1954_v13 }
 0x5b1   : > { %v1947_v2 = vpop.xlane.xlu0 %1946 }
 0x5b2   : > { %v1957_v49 = vadd.f32 %v1947_v2, %v1937_v16  ;;  %1973 = sbr.rel (!%p2577_p6) target bundleno = 1465 (0x5b9), region = 99 }
 0x5b4   : > { %1960 = vst.msk [vmem:[%s2628_s19] sm:$0xff] %vm1959_vm6, %v1957_v49 }
 0x5b5   : > { %v1956_v37 = vpop.xlane.xlu0 %1955 }
 0x5b6   : > { %v1958_v36 = vadd.f32 %v1956_v37, %v1938_v18 }
 0x5b8   : > { %1961 = vst.msk [vmem:[%s2628_s19 + $0x8] sm:$0xff] %vm1959_vm6, %v1958_v36 }
 0x5b9 PF: > { %s20_s15 = sadd.s32 1, %s2458_s15   ;;  %s3896_s30 = sld [smem:[#allocation5_spill]] }
 0x5ba   : > { %p17_p4 = scmp.ge.s32.totalorder %s20_s15, 6   ;;  %s3897_s10 = sld [smem:[#allocation10_spill]] }
 0x5bb   : > { %s3898_s11 = sld [smem:[#allocation6_spill]]  ;;  %s3899_s12 = sld [smem:[#allocation7_spill]] }
 0x5bc   : > { %s3900_s13 = sld [smem:[#allocation8_spill]]  ;;  %s3901_s14 = sld [smem:[#allocation9_spill]] }
 0x5bd   :  { %19 = sbr.rel (!%p17_p4) target bundleno = 6 (0x6), region = 174 }

</bundles_post_ra>
